<compile_context>
chip_gen: v5e
topology: v5e:2x2
jax: 0.10.0
libtpu: 0.0.40
codegen_flags: <defaults>
</compile_context>

<pallas_src>
import math

import jax
import jax.numpy as jnp
from jax.experimental import pallas as pl
from jax.experimental.pallas import tpu as pltpu

# ---- config (mirrors `args` in APIHypernet) ----
N_AGENTS = 4          # args.n_agents
N_ENEMIES = 5         # args.n_enemies
ALLY_FEATS = 8        # args.state_ally_feats_size
ENEMY_FEATS = 6       # args.state_enemy_feats_size
API_HYPER_DIM = 32    # args.api_hyper_dim
HYPER_EMBED = 32      # args.hypernet_embed (== args.mixing_embed_dim, asserted in torch)
EMBED_DIM = 32        # args.mixing_embed_dim

_MW1_W = N_AGENTS * EMBED_DIM        # 128, lane-dense main_w1 slab
_OUT_W = _MW1_W + 128                # 256: [main_w1 | w2b2 (padded to 128 lanes)]


# ------------------------------------------------------------------ parameters
def _kaiming_uniform(key, shape, fan_in, gain=10 ** (-0.5)):
    std = gain / math.sqrt(fan_in)
    bound = math.sqrt(3.0) * std
    return jax.random.uniform(key, shape, jnp.float32, -bound, bound)


def init_params(key):
    ks = jax.random.split(key, 6)
    p = {}
    p["w1a"] = _kaiming_uniform(ks[0], (ALLY_FEATS, API_HYPER_DIM), ALLY_FEATS)
    p["b1a"] = jnp.zeros((1, API_HYPER_DIM), jnp.float32)
    p["wwa"] = _kaiming_uniform(ks[1], (API_HYPER_DIM, ALLY_FEATS * HYPER_EMBED), API_HYPER_DIM)
    p["bwa"] = jnp.zeros((1, ALLY_FEATS * HYPER_EMBED), jnp.float32)
    p["w1e"] = _kaiming_uniform(ks[2], (ENEMY_FEATS, API_HYPER_DIM), ENEMY_FEATS)
    p["b1e"] = jnp.zeros((1, API_HYPER_DIM), jnp.float32)
    p["wwe"] = _kaiming_uniform(ks[3], (API_HYPER_DIM, ENEMY_FEATS * HYPER_EMBED), API_HYPER_DIM)
    p["bwe"] = jnp.zeros((1, ENEMY_FEATS * HYPER_EMBED), jnp.float32)
    p["wm1"] = _kaiming_uniform(ks[4], (API_HYPER_DIM, HYPER_EMBED * EMBED_DIM), API_HYPER_DIM)
    p["bm1"] = jnp.zeros((1, HYPER_EMBED * EMBED_DIM), jnp.float32)
    p["wm2"] = _kaiming_uniform(ks[5], (HYPER_EMBED, EMBED_DIM + 1), HYPER_EMBED)
    p["bm2"] = jnp.zeros((1, EMBED_DIM + 1), jnp.float32)
    return p


def _block_diag(w, reps):
    r, c = w.shape
    out = jnp.zeros((reps * r, reps * c), w.dtype)
    for i in range(reps):
        out = out.at[i * r:(i + 1) * r, i * c:(i + 1) * c].set(w)
    return out


# ------------------------------------------------------------------ kernel
def api_hypernet_kernel(a_ref, e_ref,
                        w1a_ref, b1a_ref, wwa_ref, bwa_ref,
                        w1e_ref, b1e_ref, wwe_ref, bwe_ref,
                        rdh_ref, wm1_ref, wtail_ref, btail_ref,
                        out_ref):
    f32, bf16 = jnp.float32, jnp.bfloat16
    NA, NE, FA, FE = N_AGENTS, N_ENEMIES, ALLY_FEATS, ENEMY_FEATS
    D, H, E = API_HYPER_DIM, HYPER_EMBED, EMBED_DIM

    A = a_ref[...]                   # [TB, NA*FA]  bf16
    En = e_ref[...]                  # [TB, NE*FE]  bf16
    A32 = A.astype(f32)
    En32 = En.astype(f32)

    # ---- batched per-entity embeddings (block-diagonal first-layer weights) ----
    emb_all = jnp.maximum(
        jnp.dot(A, w1a_ref[...], preferred_element_type=f32) + b1a_ref[...], 0.0
    ).astype(bf16)                   # [TB, NA*D]
    embe_all = jnp.maximum(
        jnp.dot(En, w1e_ref[...], preferred_element_type=f32) + b1e_ref[...], 0.0
    ).astype(bf16)                   # [TB, NE*D]

    # ---- hyper_hidden: collapsed bias matmuls + reassociated bilinear terms ----
    hh = (jnp.dot(A, bwa_ref[...], preferred_element_type=f32)
          + jnp.dot(En, bwe_ref[...], preferred_element_type=f32))       # [TB, H]

    wwa = wwa_ref[...]               # [D, FA*H]  (original layout)
    for n in range(NA):
        m = jnp.dot(emb_all[:, n * D:(n + 1) * D], wwa,
                    preferred_element_type=f32)                           # [TB, FA*H]
        for f in range(FA):
            c = n * FA + f
            hh = hh + A32[:, c:c + 1] * m[:, f * H:(f + 1) * H]

    wwe = wwe_ref[...]               # [D, FE*H]
    for j in range(NE):
        m = jnp.dot(embe_all[:, j * D:(j + 1) * D], wwe,
                    preferred_element_type=f32)                           # [TB, FE*H]
        for f in range(FE):
            c = j * FE + f
            hh = hh + En32[:, c:c + 1] * m[:, f * H:(f + 1) * H]

    hh_bf = hh.astype(bf16)

    # ---- merged tail matmul: [bm1 tiled per agent | wm2b2 | 0] in one full-width pass ----
    tail = jnp.dot(hh_bf, wtail_ref[...], preferred_element_type=f32) + btail_ref[...]  # [TB, 256]

    # ---- main_w1: q_n[b, d*H + h] = emb_n[b, d] * hh[b, h]; result = q_n @ wm1_dh ----
    hh_tile = jnp.concatenate([hh_bf] * D, axis=1)                        # [TB, D*H] bf16 (shared)
    rdh = rdh_ref[...]               # [D, D*H] 0/1 interleave-repeat matrix (resident)
    wm1 = wm1_ref[...]               # [D*H, E]
    blocks = []
    for n in range(NA):
        emb_rep = jnp.dot(emb_all[:, n * D:(n + 1) * D], rdh,
                          preferred_element_type=f32)                     # exact lane repeat
        q = (emb_rep * hh_tile).astype(bf16)                              # [TB, D*H]
        blocks.append(jnp.dot(q, wm1, preferred_element_type=f32))        # [TB, E]

    out_ref[:, :_MW1_W] = jnp.concatenate(blocks, axis=1) + tail[:, :_MW1_W]
    out_ref[:, _MW1_W:] = tail[:, _MW1_W:]


# ------------------------------------------------------------------ wrapper
def api_hypernet_forward(ally_features, enemy_features, qvals, params, *, tile_b=256):
    del qvals  # not used by the torch forward
    p = params
    f32, bf16 = jnp.float32, jnp.bfloat16
    NA, NE, FA, FE = N_AGENTS, N_ENEMIES, ALLY_FEATS, ENEMY_FEATS
    D, H, E = API_HYPER_DIM, HYPER_EMBED, EMBED_DIM

    bs = ally_features.shape[0]
    ally_d = ally_features.reshape(bs, NA * FA).astype(bf16)
    enemy_d = enemy_features.reshape(bs, NE * FE).astype(bf16)

    # Batch tile: multiple of 8; keep >= 2 grid steps when batch allows (v7x: 2 TCs).
    TB = int(tile_b)
    if bs < TB:
        TB = max(8, ((bs + 7) // 8) * 8)
    if bs >= 16 and -(-bs // TB) < 2:
        TB = max(8, (((bs + 1) // 2 + 7) // 8) * 8)
    bs_pad = -(-bs // TB) * TB
    if bs_pad != bs:
        ally_d = jnp.pad(ally_d, ((0, bs_pad - bs), (0, 0)))
        enemy_d = jnp.pad(enemy_d, ((0, bs_pad - bs), (0, 0)))

    # ---- host-side weight re-layouts (tiny, done once per call) ----
    w1a_bd = _block_diag(p["w1a"], NA).astype(bf16)                        # [NA*FA, NA*D]
    b1a_t = jnp.tile(p["b1a"], (1, NA)).astype(f32)                        # [1, NA*D]
    w1e_bd = _block_diag(p["w1e"], NE).astype(bf16)                        # [NE*FE, NE*D]
    b1e_t = jnp.tile(p["b1e"], (1, NE)).astype(f32)
    wwa = p["wwa"].astype(bf16)                                            # [D, FA*H]
    wwe = p["wwe"].astype(bf16)                                            # [D, FE*H]
    bwa_s = jnp.tile(p["bwa"].reshape(FA, H), (NA, 1)).astype(bf16)        # [NA*FA, H]
    bwe_s = jnp.tile(p["bwe"].reshape(FE, H), (NE, 1)).astype(bf16)        # [NE*FE, H]
    r_dh = jnp.repeat(jnp.eye(D, dtype=f32), H, axis=1).astype(bf16)       # [D, D*H] (exact in bf16)
    wm1_dh = p["wm1"].reshape(D * H, E).astype(bf16)                       # [D*H, E] pure reshape
    w_tail = jnp.zeros((H, _OUT_W), f32)
    w_tail = w_tail.at[:, :_MW1_W].set(jnp.tile(p["bm1"].reshape(H, E), (1, NA)))
    w_tail = w_tail.at[:, _MW1_W:_MW1_W + E + 1].set(p["wm2"])
    w_tail = w_tail.astype(bf16)
    b_tail = jnp.zeros((1, _OUT_W), f32).at[:, _MW1_W:_MW1_W + E + 1].set(p["bm2"])

    grid = (bs_pad // TB,)

    def batched(width):
        return pl.BlockSpec((TB, width), lambda i: (i, 0))

    def full2d(arr):
        return pl.BlockSpec(arr.shape, lambda i: (0, 0))

    in_arrays = [ally_d, enemy_d,
                 w1a_bd, b1a_t, wwa, bwa_s,
                 w1e_bd, b1e_t, wwe, bwe_s,
                 r_dh, wm1_dh, w_tail, b_tail]
    in_specs = [batched(NA * FA), batched(NE * FE)] + [full2d(a) for a in in_arrays[2:]]

    # ~10 MB live VMEM at TB=256; raise the scoped limit for bigger tiles (v5e/v6e).
    vmem_limit = 32 * 1024 * 1024 if TB <= 256 else 64 * 1024 * 1024

    out = pl.pallas_call(
        api_hypernet_kernel,
        grid=grid,
        in_specs=in_specs,
        out_specs=pl.BlockSpec((TB, _OUT_W), lambda i: (i, 0)),
        out_shape=jax.ShapeDtypeStruct((bs_pad, _OUT_W), f32),
        compiler_params=pltpu.CompilerParams(
            dimension_semantics=("parallel",),
            vmem_limit_bytes=vmem_limit),
    )(*in_arrays)

    main_w1 = out[:bs, :_MW1_W].reshape(bs, NA, E)
    main_w2 = out[:bs, _MW1_W:_MW1_W + E, None]                 # [bs, E, 1]
    main_b2 = out[:bs, _MW1_W + E:_MW1_W + E + 1, None]         # [bs, 1, 1]
    return main_w1, main_w2, main_b2


# ------------------------------------------------------------------ pure-JAX f32 reference
def reference_forward(ally, enemy, qvals, p):
    del qvals
    bs = ally.shape[0]
    A2 = ally.reshape(bs * N_AGENTS, ALLY_FEATS)
    emb_a = jax.nn.relu(A2 @ p["w1a"] + p["b1a"])
    w_ally = (emb_a @ p["wwa"] + p["bwa"]).reshape(-1, ALLY_FEATS, HYPER_EMBED)
    hidden_ally = jnp.einsum("rf,rfh->rh", A2, w_ally).reshape(bs, N_AGENTS, HYPER_EMBED).sum(1)

    E2 = enemy.reshape(bs * N_ENEMIES, ENEMY_FEATS)
    emb_e = jax.nn.relu(E2 @ p["w1e"] + p["b1e"])
    w_enemy = (emb_e @ p["wwe"] + p["bwe"]).reshape(-1, ENEMY_FEATS, HYPER_EMBED)
    hidden_enemy = jnp.einsum("rf,rfh->rh", E2, w_enemy).reshape(bs, N_ENEMIES, HYPER_EMBED).sum(1)

    hh = hidden_ally + hidden_enemy
    hyper_w2 = (emb_a @ p["wm1"] + p["bm1"]).reshape(bs, N_AGENTS, HYPER_EMBED, EMBED_DIM)
    main_w1 = jnp.einsum("bh,bnhe->bne", hh, hyper_w2)
    w2b2 = hh @ p["wm2"] + p["bm2"]
    return main_w1, w2b2[:, :EMBED_DIM, None], w2b2[:, EMBED_DIM:, None]


if __name__ == "__main__":
    key = jax.random.PRNGKey(0)
    kp, kb, ka, ke, kq = jax.random.split(key, 5)
    params = init_params(kp)
    # Torch zero-inits biases; use small random biases so the bias paths are exercised.
    bks = jax.random.split(kb, 6)
    for i, name in enumerate(["b1a", "bwa", "b1e", "bwe", "bm1", "bm2"]):
        params[name] = 0.05 * jax.random.normal(bks[i], params[name].shape, jnp.float32)

    B, T = 2, 4
    bs = B * T
    ally = jax.random.normal(ka, (bs, N_AGENTS, ALLY_FEATS), jnp.float32)
    enemy = jax.random.normal(ke, (bs, N_ENEMIES, ENEMY_FEATS), jnp.float32)
    qvals = jax.random.normal(kq, (B, T, N_AGENTS), jnp.float32)  # unused, parity with torch

    out = api_hypernet_forward(ally, enemy, qvals, params)
    out = jax.tree_util.tree_map(jax.block_until_ready, out)

    ref = reference_forward(ally, enemy, qvals, params)
    for name, o, r in zip(("main_w1", "main_w2", "main_b2"), out, ref):
        assert o.shape == r.shape, (name, o.shape, r.shape)
        err = float(jnp.max(jnp.abs(o - r)))
        scale = float(jnp.max(jnp.abs(r))) + 1e-6
        # bf16 MXU operands (f32 accumulation) -> allow a few percent drift vs f32 reference
        assert err <= 5e-2 * scale + 1e-3, (name, err, scale)

    print("KERNEL_OK")
</pallas_src>

<mosaic_0001>
module attributes {stable_mosaic.version = 11 : i64} {
  func.func @api_hypernet_kernel(%arg0: i32, %arg1: memref<8x32xbf16, #tpu.memory_space<vmem>>, %arg2: memref<8x30xbf16, #tpu.memory_space<vmem>>, %arg3: memref<32x128xbf16, #tpu.memory_space<vmem>>, %arg4: memref<1x128xf32, #tpu.memory_space<vmem>>, %arg5: memref<32x256xbf16, #tpu.memory_space<vmem>>, %arg6: memref<32x32xbf16, #tpu.memory_space<vmem>>, %arg7: memref<30x160xbf16, #tpu.memory_space<vmem>>, %arg8: memref<1x160xf32, #tpu.memory_space<vmem>>, %arg9: memref<32x192xbf16, #tpu.memory_space<vmem>>, %arg10: memref<30x32xbf16, #tpu.memory_space<vmem>>, %arg11: memref<32x1024xbf16, #tpu.memory_space<vmem>>, %arg12: memref<1024x32xbf16, #tpu.memory_space<vmem>>, %arg13: memref<32x256xbf16, #tpu.memory_space<vmem>>, %arg14: memref<1x256xf32, #tpu.memory_space<vmem>>, %arg15: memref<8x256xf32, #tpu.memory_space<vmem>>) attributes {dimension_semantics = [#tpu.dimension_semantics<parallel>], iteration_bounds = array<i64: 1>, scalar_prefetch = 0 : i64, scratch_operands = 0 : i64, tpu.core_type = #tpu.core_type<tc>, window_params = [{transform_indices = @transform_0, window_bounds = array<i64: 8, 32>}, {transform_indices = @transform_1, window_bounds = array<i64: 8, 30>}, {pipeline_mode = #tpu.pipeline_mode<synchronous>, transform_indices = @transform_2, window_bounds = array<i64: 32, 128>}, {pipeline_mode = #tpu.pipeline_mode<synchronous>, transform_indices = @transform_3, window_bounds = array<i64: 1, 128>}, {pipeline_mode = #tpu.pipeline_mode<synchronous>, transform_indices = @transform_4, window_bounds = array<i64: 32, 256>}, {pipeline_mode = #tpu.pipeline_mode<synchronous>, transform_indices = @transform_5, window_bounds = array<i64: 32, 32>}, {pipeline_mode = #tpu.pipeline_mode<synchronous>, transform_indices = @transform_6, window_bounds = array<i64: 30, 160>}, {pipeline_mode = #tpu.pipeline_mode<synchronous>, transform_indices = @transform_7, window_bounds = array<i64: 1, 160>}, {pipeline_mode = #tpu.pipeline_mode<synchronous>, transform_indices = @transform_8, window_bounds = array<i64: 32, 192>}, {pipeline_mode = #tpu.pipeline_mode<synchronous>, transform_indices = @transform_9, window_bounds = array<i64: 30, 32>}, {pipeline_mode = #tpu.pipeline_mode<synchronous>, transform_indices = @transform_10, window_bounds = array<i64: 32, 1024>}, {pipeline_mode = #tpu.pipeline_mode<synchronous>, transform_indices = @transform_11, window_bounds = array<i64: 1024, 32>}, {pipeline_mode = #tpu.pipeline_mode<synchronous>, transform_indices = @transform_12, window_bounds = array<i64: 32, 256>}, {pipeline_mode = #tpu.pipeline_mode<synchronous>, transform_indices = @transform_13, window_bounds = array<i64: 1, 256>}, {transform_indices = @transform_14, window_bounds = array<i64: 8, 256>}]} {
    %c0 = arith.constant 0 : index
    %c0_0 = arith.constant 0 : index
    %0 = vector.load %arg1[%c0, %c0_0] : memref<8x32xbf16, #tpu.memory_space<vmem>>, vector<8x32xbf16>
    %c0_1 = arith.constant 0 : index
    %c0_2 = arith.constant 0 : index
    %1 = vector.load %arg2[%c0_1, %c0_2] : memref<8x30xbf16, #tpu.memory_space<vmem>>, vector<8x30xbf16>
    %2 = arith.extf %0 : vector<8x32xbf16> to vector<8x32xf32>
    %3 = arith.extf %1 : vector<8x30xbf16> to vector<8x30xf32>
    %c0_3 = arith.constant 0 : index
    %c0_4 = arith.constant 0 : index
    %4 = vector.load %arg3[%c0_3, %c0_4] : memref<32x128xbf16, #tpu.memory_space<vmem>>, vector<32x128xbf16>
    %cst = arith.constant dense<0.000000e+00> : vector<8x128xf32>
    %5 = tpu.matmul %0, %4, %cst {dimension_numbers = #tpu.dot_dimension_numbers<[1], [0], [0], [1], [0, 0, 1, 1], [], []>} : vector<8x32xbf16>, vector<32x128xbf16>, vector<8x128xf32> -> vector<8x128xf32>
    %c0_5 = arith.constant 0 : index
    %c0_6 = arith.constant 0 : index
    %6 = vector.load %arg4[%c0_5, %c0_6] : memref<1x128xf32, #tpu.memory_space<vmem>>, vector<1x128xf32>
    %7 = vector.broadcast %6 : vector<1x128xf32> to vector<8x128xf32>
    %8 = arith.addf %5, %7 : vector<8x128xf32>
    %cst_7 = arith.constant 0.000000e+00 : f32
    %9 = vector.broadcast %cst_7 : f32 to vector<8x128xf32>
    %10 = arith.maximumf %8, %9 : vector<8x128xf32>
    %11 = arith.truncf %10 : vector<8x128xf32> to vector<8x128xbf16>
    %c0_8 = arith.constant 0 : index
    %c0_9 = arith.constant 0 : index
    %12 = vector.load %arg7[%c0_8, %c0_9] : memref<30x160xbf16, #tpu.memory_space<vmem>>, vector<30x160xbf16>
    %cst_10 = arith.constant dense<0.000000e+00> : vector<8x160xf32>
    %13 = tpu.matmul %1, %12, %cst_10 {dimension_numbers = #tpu.dot_dimension_numbers<[1], [0], [0], [1], [0, 0, 1, 1], [], []>} : vector<8x30xbf16>, vector<30x160xbf16>, vector<8x160xf32> -> vector<8x160xf32>
    %c0_11 = arith.constant 0 : index
    %c0_12 = arith.constant 0 : index
    %14 = vector.load %arg8[%c0_11, %c0_12] : memref<1x160xf32, #tpu.memory_space<vmem>>, vector<1x160xf32>
    %15 = vector.broadcast %14 : vector<1x160xf32> to vector<8x160xf32>
    %16 = arith.addf %13, %15 : vector<8x160xf32>
    %cst_13 = arith.constant 0.000000e+00 : f32
    %17 = vector.broadcast %cst_13 : f32 to vector<8x160xf32>
    %18 = arith.maximumf %16, %17 : vector<8x160xf32>
    %19 = arith.truncf %18 : vector<8x160xf32> to vector<8x160xbf16>
    %c0_14 = arith.constant 0 : index
    %c0_15 = arith.constant 0 : index
    %20 = vector.load %arg6[%c0_14, %c0_15] : memref<32x32xbf16, #tpu.memory_space<vmem>>, vector<32x32xbf16>
    %cst_16 = arith.constant dense<0.000000e+00> : vector<8x32xf32>
    %21 = tpu.matmul %0, %20, %cst_16 {dimension_numbers = #tpu.dot_dimension_numbers<[1], [0], [0], [1], [0, 0, 1, 1], [], []>} : vector<8x32xbf16>, vector<32x32xbf16>, vector<8x32xf32> -> vector<8x32xf32>
    %c0_17 = arith.constant 0 : index
    %c0_18 = arith.constant 0 : index
    %22 = vector.load %arg10[%c0_17, %c0_18] : memref<30x32xbf16, #tpu.memory_space<vmem>>, vector<30x32xbf16>
    %cst_19 = arith.constant dense<0.000000e+00> : vector<8x32xf32>
    %23 = tpu.matmul %1, %22, %cst_19 {dimension_numbers = #tpu.dot_dimension_numbers<[1], [0], [0], [1], [0, 0, 1, 1], [], []>} : vector<8x30xbf16>, vector<30x32xbf16>, vector<8x32xf32> -> vector<8x32xf32>
    %24 = arith.addf %21, %23 : vector<8x32xf32>
    %c0_20 = arith.constant 0 : index
    %c0_21 = arith.constant 0 : index
    %25 = vector.load %arg5[%c0_20, %c0_21] : memref<32x256xbf16, #tpu.memory_space<vmem>>, vector<32x256xbf16>
    %26 = vector.extract_strided_slice %11 {offsets = [0, 0], sizes = [8, 32], strides = [1, 1]} : vector<8x128xbf16> to vector<8x32xbf16>
    %cst_22 = arith.constant dense<0.000000e+00> : vector<8x256xf32>
    %27 = tpu.matmul %26, %25, %cst_22 {dimension_numbers = #tpu.dot_dimension_numbers<[1], [0], [0], [1], [0, 0, 1, 1], [], []>} : vector<8x32xbf16>, vector<32x256xbf16>, vector<8x256xf32> -> vector<8x256xf32>
    %28 = vector.extract_strided_slice %2 {offsets = [0, 0], sizes = [8, 1], strides = [1, 1]} : vector<8x32xf32> to vector<8x1xf32>
    %29 = vector.extract_strided_slice %27 {offsets = [0, 0], sizes = [8, 32], strides = [1, 1]} : vector<8x256xf32> to vector<8x32xf32>
    %30 = vector.broadcast %28 : vector<8x1xf32> to vector<8x32xf32>
    %31 = arith.mulf %30, %29 : vector<8x32xf32>
    %32 = arith.addf %24, %31 : vector<8x32xf32>
    %33 = vector.extract_strided_slice %2 {offsets = [0, 1], sizes = [8, 1], strides = [1, 1]} : vector<8x32xf32> to vector<8x1xf32>
    %34 = vector.extract_strided_slice %27 {offsets = [0, 32], sizes = [8, 32], strides = [1, 1]} : vector<8x256xf32> to vector<8x32xf32>
    %35 = vector.broadcast %33 : vector<8x1xf32> to vector<8x32xf32>
    %36 = arith.mulf %35, %34 : vector<8x32xf32>
    %37 = arith.addf %32, %36 : vector<8x32xf32>
    %38 = vector.extract_strided_slice %2 {offsets = [0, 2], sizes = [8, 1], strides = [1, 1]} : vector<8x32xf32> to vector<8x1xf32>
    %39 = vector.extract_strided_slice %27 {offsets = [0, 64], sizes = [8, 32], strides = [1, 1]} : vector<8x256xf32> to vector<8x32xf32>
    %40 = vector.broadcast %38 : vector<8x1xf32> to vector<8x32xf32>
    %41 = arith.mulf %40, %39 : vector<8x32xf32>
    %42 = arith.addf %37, %41 : vector<8x32xf32>
    %43 = vector.extract_strided_slice %2 {offsets = [0, 3], sizes = [8, 1], strides = [1, 1]} : vector<8x32xf32> to vector<8x1xf32>
    %44 = vector.extract_strided_slice %27 {offsets = [0, 96], sizes = [8, 32], strides = [1, 1]} : vector<8x256xf32> to vector<8x32xf32>
    %45 = vector.broadcast %43 : vector<8x1xf32> to vector<8x32xf32>
    %46 = arith.mulf %45, %44 : vector<8x32xf32>
    %47 = arith.addf %42, %46 : vector<8x32xf32>
    %48 = vector.extract_strided_slice %2 {offsets = [0, 4], sizes = [8, 1], strides = [1, 1]} : vector<8x32xf32> to vector<8x1xf32>
    %49 = vector.extract_strided_slice %27 {offsets = [0, 128], sizes = [8, 32], strides = [1, 1]} : vector<8x256xf32> to vector<8x32xf32>
    %50 = vector.broadcast %48 : vector<8x1xf32> to vector<8x32xf32>
    %51 = arith.mulf %50, %49 : vector<8x32xf32>
    %52 = arith.addf %47, %51 : vector<8x32xf32>
    %53 = vector.extract_strided_slice %2 {offsets = [0, 5], sizes = [8, 1], strides = [1, 1]} : vector<8x32xf32> to vector<8x1xf32>
    %54 = vector.extract_strided_slice %27 {offsets = [0, 160], sizes = [8, 32], strides = [1, 1]} : vector<8x256xf32> to vector<8x32xf32>
    %55 = vector.broadcast %53 : vector<8x1xf32> to vector<8x32xf32>
    %56 = arith.mulf %55, %54 : vector<8x32xf32>
    %57 = arith.addf %52, %56 : vector<8x32xf32>
    %58 = vector.extract_strided_slice %2 {offsets = [0, 6], sizes = [8, 1], strides = [1, 1]} : vector<8x32xf32> to vector<8x1xf32>
    %59 = vector.extract_strided_slice %27 {offsets = [0, 192], sizes = [8, 32], strides = [1, 1]} : vector<8x256xf32> to vector<8x32xf32>
    %60 = vector.broadcast %58 : vector<8x1xf32> to vector<8x32xf32>
    %61 = arith.mulf %60, %59 : vector<8x32xf32>
    %62 = arith.addf %57, %61 : vector<8x32xf32>
    %63 = vector.extract_strided_slice %2 {offsets = [0, 7], sizes = [8, 1], strides = [1, 1]} : vector<8x32xf32> to vector<8x1xf32>
    %64 = vector.extract_strided_slice %27 {offsets = [0, 224], sizes = [8, 32], strides = [1, 1]} : vector<8x256xf32> to vector<8x32xf32>
    %65 = vector.broadcast %63 : vector<8x1xf32> to vector<8x32xf32>
    %66 = arith.mulf %65, %64 : vector<8x32xf32>
    %67 = arith.addf %62, %66 : vector<8x32xf32>
    %68 = vector.extract_strided_slice %11 {offsets = [0, 32], sizes = [8, 32], strides = [1, 1]} : vector<8x128xbf16> to vector<8x32xbf16>
    %cst_23 = arith.constant dense<0.000000e+00> : vector<8x256xf32>
    %69 = tpu.matmul %68, %25, %cst_23 {dimension_numbers = #tpu.dot_dimension_numbers<[1], [0], [0], [1], [0, 0, 1, 1], [], []>} : vector<8x32xbf16>, vector<32x256xbf16>, vector<8x256xf32> -> vector<8x256xf32>
    %70 = vector.extract_strided_slice %2 {offsets = [0, 8], sizes = [8, 1], strides = [1, 1]} : vector<8x32xf32> to vector<8x1xf32>
    %71 = vector.extract_strided_slice %69 {offsets = [0, 0], sizes = [8, 32], strides = [1, 1]} : vector<8x256xf32> to vector<8x32xf32>
    %72 = vector.broadcast %70 : vector<8x1xf32> to vector<8x32xf32>
    %73 = arith.mulf %72, %71 : vector<8x32xf32>
    %74 = arith.addf %67, %73 : vector<8x32xf32>
    %75 = vector.extract_strided_slice %2 {offsets = [0, 9], sizes = [8, 1], strides = [1, 1]} : vector<8x32xf32> to vector<8x1xf32>
    %76 = vector.extract_strided_slice %69 {offsets = [0, 32], sizes = [8, 32], strides = [1, 1]} : vector<8x256xf32> to vector<8x32xf32>
    %77 = vector.broadcast %75 : vector<8x1xf32> to vector<8x32xf32>
    %78 = arith.mulf %77, %76 : vector<8x32xf32>
    %79 = arith.addf %74, %78 : vector<8x32xf32>
    %80 = vector.extract_strided_slice %2 {offsets = [0, 10], sizes = [8, 1], strides = [1, 1]} : vector<8x32xf32> to vector<8x1xf32>
    %81 = vector.extract_strided_slice %69 {offsets = [0, 64], sizes = [8, 32], strides = [1, 1]} : vector<8x256xf32> to vector<8x32xf32>
    %82 = vector.broadcast %80 : vector<8x1xf32> to vector<8x32xf32>
    %83 = arith.mulf %82, %81 : vector<8x32xf32>
    %84 = arith.addf %79, %83 : vector<8x32xf32>
    %85 = vector.extract_strided_slice %2 {offsets = [0, 11], sizes = [8, 1], strides = [1, 1]} : vector<8x32xf32> to vector<8x1xf32>
    %86 = vector.extract_strided_slice %69 {offsets = [0, 96], sizes = [8, 32], strides = [1, 1]} : vector<8x256xf32> to vector<8x32xf32>
    %87 = vector.broadcast %85 : vector<8x1xf32> to vector<8x32xf32>
    %88 = arith.mulf %87, %86 : vector<8x32xf32>
    %89 = arith.addf %84, %88 : vector<8x32xf32>
    %90 = vector.extract_strided_slice %2 {offsets = [0, 12], sizes = [8, 1], strides = [1, 1]} : vector<8x32xf32> to vector<8x1xf32>
    %91 = vector.extract_strided_slice %69 {offsets = [0, 128], sizes = [8, 32], strides = [1, 1]} : vector<8x256xf32> to vector<8x32xf32>
    %92 = vector.broadcast %90 : vector<8x1xf32> to vector<8x32xf32>
    %93 = arith.mulf %92, %91 : vector<8x32xf32>
    %94 = arith.addf %89, %93 : vector<8x32xf32>
    %95 = vector.extract_strided_slice %2 {offsets = [0, 13], sizes = [8, 1], strides = [1, 1]} : vector<8x32xf32> to vector<8x1xf32>
    %96 = vector.extract_strided_slice %69 {offsets = [0, 160], sizes = [8, 32], strides = [1, 1]} : vector<8x256xf32> to vector<8x32xf32>
    %97 = vector.broadcast %95 : vector<8x1xf32> to vector<8x32xf32>
    %98 = arith.mulf %97, %96 : vector<8x32xf32>
    %99 = arith.addf %94, %98 : vector<8x32xf32>
    %100 = vector.extract_strided_slice %2 {offsets = [0, 14], sizes = [8, 1], strides = [1, 1]} : vector<8x32xf32> to vector<8x1xf32>
    %101 = vector.extract_strided_slice %69 {offsets = [0, 192], sizes = [8, 32], strides = [1, 1]} : vector<8x256xf32> to vector<8x32xf32>
    %102 = vector.broadcast %100 : vector<8x1xf32> to vector<8x32xf32>
    %103 = arith.mulf %102, %101 : vector<8x32xf32>
    %104 = arith.addf %99, %103 : vector<8x32xf32>
    %105 = vector.extract_strided_slice %2 {offsets = [0, 15], sizes = [8, 1], strides = [1, 1]} : vector<8x32xf32> to vector<8x1xf32>
    %106 = vector.extract_strided_slice %69 {offsets = [0, 224], sizes = [8, 32], strides = [1, 1]} : vector<8x256xf32> to vector<8x32xf32>
    %107 = vector.broadcast %105 : vector<8x1xf32> to vector<8x32xf32>
    %108 = arith.mulf %107, %106 : vector<8x32xf32>
    %109 = arith.addf %104, %108 : vector<8x32xf32>
    %110 = vector.extract_strided_slice %11 {offsets = [0, 64], sizes = [8, 32], strides = [1, 1]} : vector<8x128xbf16> to vector<8x32xbf16>
    %cst_24 = arith.constant dense<0.000000e+00> : vector<8x256xf32>
    %111 = tpu.matmul %110, %25, %cst_24 {dimension_numbers = #tpu.dot_dimension_numbers<[1], [0], [0], [1], [0, 0, 1, 1], [], []>} : vector<8x32xbf16>, vector<32x256xbf16>, vector<8x256xf32> -> vector<8x256xf32>
    %112 = vector.extract_strided_slice %2 {offsets = [0, 16], sizes = [8, 1], strides = [1, 1]} : vector<8x32xf32> to vector<8x1xf32>
    %113 = vector.extract_strided_slice %111 {offsets = [0, 0], sizes = [8, 32], strides = [1, 1]} : vector<8x256xf32> to vector<8x32xf32>
    %114 = vector.broadcast %112 : vector<8x1xf32> to vector<8x32xf32>
    %115 = arith.mulf %114, %113 : vector<8x32xf32>
    %116 = arith.addf %109, %115 : vector<8x32xf32>
    %117 = vector.extract_strided_slice %2 {offsets = [0, 17], sizes = [8, 1], strides = [1, 1]} : vector<8x32xf32> to vector<8x1xf32>
    %118 = vector.extract_strided_slice %111 {offsets = [0, 32], sizes = [8, 32], strides = [1, 1]} : vector<8x256xf32> to vector<8x32xf32>
    %119 = vector.broadcast %117 : vector<8x1xf32> to vector<8x32xf32>
    %120 = arith.mulf %119, %118 : vector<8x32xf32>
    %121 = arith.addf %116, %120 : vector<8x32xf32>
    %122 = vector.extract_strided_slice %2 {offsets = [0, 18], sizes = [8, 1], strides = [1, 1]} : vector<8x32xf32> to vector<8x1xf32>
    %123 = vector.extract_strided_slice %111 {offsets = [0, 64], sizes = [8, 32], strides = [1, 1]} : vector<8x256xf32> to vector<8x32xf32>
    %124 = vector.broadcast %122 : vector<8x1xf32> to vector<8x32xf32>
    %125 = arith.mulf %124, %123 : vector<8x32xf32>
    %126 = arith.addf %121, %125 : vector<8x32xf32>
    %127 = vector.extract_strided_slice %2 {offsets = [0, 19], sizes = [8, 1], strides = [1, 1]} : vector<8x32xf32> to vector<8x1xf32>
    %128 = vector.extract_strided_slice %111 {offsets = [0, 96], sizes = [8, 32], strides = [1, 1]} : vector<8x256xf32> to vector<8x32xf32>
    %129 = vector.broadcast %127 : vector<8x1xf32> to vector<8x32xf32>
    %130 = arith.mulf %129, %128 : vector<8x32xf32>
    %131 = arith.addf %126, %130 : vector<8x32xf32>
    %132 = vector.extract_strided_slice %2 {offsets = [0, 20], sizes = [8, 1], strides = [1, 1]} : vector<8x32xf32> to vector<8x1xf32>
    %133 = vector.extract_strided_slice %111 {offsets = [0, 128], sizes = [8, 32], strides = [1, 1]} : vector<8x256xf32> to vector<8x32xf32>
    %134 = vector.broadcast %132 : vector<8x1xf32> to vector<8x32xf32>
    %135 = arith.mulf %134, %133 : vector<8x32xf32>
    %136 = arith.addf %131, %135 : vector<8x32xf32>
    %137 = vector.extract_strided_slice %2 {offsets = [0, 21], sizes = [8, 1], strides = [1, 1]} : vector<8x32xf32> to vector<8x1xf32>
    %138 = vector.extract_strided_slice %111 {offsets = [0, 160], sizes = [8, 32], strides = [1, 1]} : vector<8x256xf32> to vector<8x32xf32>
    %139 = vector.broadcast %137 : vector<8x1xf32> to vector<8x32xf32>
    %140 = arith.mulf %139, %138 : vector<8x32xf32>
    %141 = arith.addf %136, %140 : vector<8x32xf32>
    %142 = vector.extract_strided_slice %2 {offsets = [0, 22], sizes = [8, 1], strides = [1, 1]} : vector<8x32xf32> to vector<8x1xf32>
    %143 = vector.extract_strided_slice %111 {offsets = [0, 192], sizes = [8, 32], strides = [1, 1]} : vector<8x256xf32> to vector<8x32xf32>
    %144 = vector.broadcast %142 : vector<8x1xf32> to vector<8x32xf32>
    %145 = arith.mulf %144, %143 : vector<8x32xf32>
    %146 = arith.addf %141, %145 : vector<8x32xf32>
    %147 = vector.extract_strided_slice %2 {offsets = [0, 23], sizes = [8, 1], strides = [1, 1]} : vector<8x32xf32> to vector<8x1xf32>
    %148 = vector.extract_strided_slice %111 {offsets = [0, 224], sizes = [8, 32], strides = [1, 1]} : vector<8x256xf32> to vector<8x32xf32>
    %149 = vector.broadcast %147 : vector<8x1xf32> to vector<8x32xf32>
    %150 = arith.mulf %149, %148 : vector<8x32xf32>
    %151 = arith.addf %146, %150 : vector<8x32xf32>
    %152 = vector.extract_strided_slice %11 {offsets = [0, 96], sizes = [8, 32], strides = [1, 1]} : vector<8x128xbf16> to vector<8x32xbf16>
    %cst_25 = arith.constant dense<0.000000e+00> : vector<8x256xf32>
    %153 = tpu.matmul %152, %25, %cst_25 {dimension_numbers = #tpu.dot_dimension_numbers<[1], [0], [0], [1], [0, 0, 1, 1], [], []>} : vector<8x32xbf16>, vector<32x256xbf16>, vector<8x256xf32> -> vector<8x256xf32>
    %154 = vector.extract_strided_slice %2 {offsets = [0, 24], sizes = [8, 1], strides = [1, 1]} : vector<8x32xf32> to vector<8x1xf32>
    %155 = vector.extract_strided_slice %153 {offsets = [0, 0], sizes = [8, 32], strides = [1, 1]} : vector<8x256xf32> to vector<8x32xf32>
    %156 = vector.broadcast %154 : vector<8x1xf32> to vector<8x32xf32>
    %157 = arith.mulf %156, %155 : vector<8x32xf32>
    %158 = arith.addf %151, %157 : vector<8x32xf32>
    %159 = vector.extract_strided_slice %2 {offsets = [0, 25], sizes = [8, 1], strides = [1, 1]} : vector<8x32xf32> to vector<8x1xf32>
    %160 = vector.extract_strided_slice %153 {offsets = [0, 32], sizes = [8, 32], strides = [1, 1]} : vector<8x256xf32> to vector<8x32xf32>
    %161 = vector.broadcast %159 : vector<8x1xf32> to vector<8x32xf32>
    %162 = arith.mulf %161, %160 : vector<8x32xf32>
    %163 = arith.addf %158, %162 : vector<8x32xf32>
    %164 = vector.extract_strided_slice %2 {offsets = [0, 26], sizes = [8, 1], strides = [1, 1]} : vector<8x32xf32> to vector<8x1xf32>
    %165 = vector.extract_strided_slice %153 {offsets = [0, 64], sizes = [8, 32], strides = [1, 1]} : vector<8x256xf32> to vector<8x32xf32>
    %166 = vector.broadcast %164 : vector<8x1xf32> to vector<8x32xf32>
    %167 = arith.mulf %166, %165 : vector<8x32xf32>
    %168 = arith.addf %163, %167 : vector<8x32xf32>
    %169 = vector.extract_strided_slice %2 {offsets = [0, 27], sizes = [8, 1], strides = [1, 1]} : vector<8x32xf32> to vector<8x1xf32>
    %170 = vector.extract_strided_slice %153 {offsets = [0, 96], sizes = [8, 32], strides = [1, 1]} : vector<8x256xf32> to vector<8x32xf32>
    %171 = vector.broadcast %169 : vector<8x1xf32> to vector<8x32xf32>
    %172 = arith.mulf %171, %170 : vector<8x32xf32>
    %173 = arith.addf %168, %172 : vector<8x32xf32>
    %174 = vector.extract_strided_slice %2 {offsets = [0, 28], sizes = [8, 1], strides = [1, 1]} : vector<8x32xf32> to vector<8x1xf32>
    %175 = vector.extract_strided_slice %153 {offsets = [0, 128], sizes = [8, 32], strides = [1, 1]} : vector<8x256xf32> to vector<8x32xf32>
    %176 = vector.broadcast %174 : vector<8x1xf32> to vector<8x32xf32>
    %177 = arith.mulf %176, %175 : vector<8x32xf32>
    %178 = arith.addf %173, %177 : vector<8x32xf32>
    %179 = vector.extract_strided_slice %2 {offsets = [0, 29], sizes = [8, 1], strides = [1, 1]} : vector<8x32xf32> to vector<8x1xf32>
    %180 = vector.extract_strided_slice %153 {offsets = [0, 160], sizes = [8, 32], strides = [1, 1]} : vector<8x256xf32> to vector<8x32xf32>
    %181 = vector.broadcast %179 : vector<8x1xf32> to vector<8x32xf32>
    %182 = arith.mulf %181, %180 : vector<8x32xf32>
    %183 = arith.addf %178, %182 : vector<8x32xf32>
    %184 = vector.extract_strided_slice %2 {offsets = [0, 30], sizes = [8, 1], strides = [1, 1]} : vector<8x32xf32> to vector<8x1xf32>
    %185 = vector.extract_strided_slice %153 {offsets = [0, 192], sizes = [8, 32], strides = [1, 1]} : vector<8x256xf32> to vector<8x32xf32>
    %186 = vector.broadcast %184 : vector<8x1xf32> to vector<8x32xf32>
    %187 = arith.mulf %186, %185 : vector<8x32xf32>
    %188 = arith.addf %183, %187 : vector<8x32xf32>
    %189 = vector.extract_strided_slice %2 {offsets = [0, 31], sizes = [8, 1], strides = [1, 1]} : vector<8x32xf32> to vector<8x1xf32>
    %190 = vector.extract_strided_slice %153 {offsets = [0, 224], sizes = [8, 32], strides = [1, 1]} : vector<8x256xf32> to vector<8x32xf32>
    %191 = vector.broadcast %189 : vector<8x1xf32> to vector<8x32xf32>
    %192 = arith.mulf %191, %190 : vector<8x32xf32>
    %193 = arith.addf %188, %192 : vector<8x32xf32>
    %c0_26 = arith.constant 0 : index
    %c0_27 = arith.constant 0 : index
    %194 = vector.load %arg9[%c0_26, %c0_27] : memref<32x192xbf16, #tpu.memory_space<vmem>>, vector<32x192xbf16>
    %195 = vector.extract_strided_slice %19 {offsets = [0, 0], sizes = [8, 32], strides = [1, 1]} : vector<8x160xbf16> to vector<8x32xbf16>
    %cst_28 = arith.constant dense<0.000000e+00> : vector<8x192xf32>
    %196 = tpu.matmul %195, %194, %cst_28 {dimension_numbers = #tpu.dot_dimension_numbers<[1], [0], [0], [1], [0, 0, 1, 1], [], []>} : vector<8x32xbf16>, vector<32x192xbf16>, vector<8x192xf32> -> vector<8x192xf32>
    %197 = vector.extract_strided_slice %3 {offsets = [0, 0], sizes = [8, 1], strides = [1, 1]} : vector<8x30xf32> to vector<8x1xf32>
    %198 = vector.extract_strided_slice %196 {offsets = [0, 0], sizes = [8, 32], strides = [1, 1]} : vector<8x192xf32> to vector<8x32xf32>
    %199 = vector.broadcast %197 : vector<8x1xf32> to vector<8x32xf32>
    %200 = arith.mulf %199, %198 : vector<8x32xf32>
    %201 = arith.addf %193, %200 : vector<8x32xf32>
    %202 = vector.extract_strided_slice %3 {offsets = [0, 1], sizes = [8, 1], strides = [1, 1]} : vector<8x30xf32> to vector<8x1xf32>
    %203 = vector.extract_strided_slice %196 {offsets = [0, 32], sizes = [8, 32], strides = [1, 1]} : vector<8x192xf32> to vector<8x32xf32>
    %204 = vector.broadcast %202 : vector<8x1xf32> to vector<8x32xf32>
    %205 = arith.mulf %204, %203 : vector<8x32xf32>
    %206 = arith.addf %201, %205 : vector<8x32xf32>
    %207 = vector.extract_strided_slice %3 {offsets = [0, 2], sizes = [8, 1], strides = [1, 1]} : vector<8x30xf32> to vector<8x1xf32>
    %208 = vector.extract_strided_slice %196 {offsets = [0, 64], sizes = [8, 32], strides = [1, 1]} : vector<8x192xf32> to vector<8x32xf32>
    %209 = vector.broadcast %207 : vector<8x1xf32> to vector<8x32xf32>
    %210 = arith.mulf %209, %208 : vector<8x32xf32>
    %211 = arith.addf %206, %210 : vector<8x32xf32>
    %212 = vector.extract_strided_slice %3 {offsets = [0, 3], sizes = [8, 1], strides = [1, 1]} : vector<8x30xf32> to vector<8x1xf32>
    %213 = vector.extract_strided_slice %196 {offsets = [0, 96], sizes = [8, 32], strides = [1, 1]} : vector<8x192xf32> to vector<8x32xf32>
    %214 = vector.broadcast %212 : vector<8x1xf32> to vector<8x32xf32>
    %215 = arith.mulf %214, %213 : vector<8x32xf32>
    %216 = arith.addf %211, %215 : vector<8x32xf32>
    %217 = vector.extract_strided_slice %3 {offsets = [0, 4], sizes = [8, 1], strides = [1, 1]} : vector<8x30xf32> to vector<8x1xf32>
    %218 = vector.extract_strided_slice %196 {offsets = [0, 128], sizes = [8, 32], strides = [1, 1]} : vector<8x192xf32> to vector<8x32xf32>
    %219 = vector.broadcast %217 : vector<8x1xf32> to vector<8x32xf32>
    %220 = arith.mulf %219, %218 : vector<8x32xf32>
    %221 = arith.addf %216, %220 : vector<8x32xf32>
    %222 = vector.extract_strided_slice %3 {offsets = [0, 5], sizes = [8, 1], strides = [1, 1]} : vector<8x30xf32> to vector<8x1xf32>
    %223 = vector.extract_strided_slice %196 {offsets = [0, 160], sizes = [8, 32], strides = [1, 1]} : vector<8x192xf32> to vector<8x32xf32>
    %224 = vector.broadcast %222 : vector<8x1xf32> to vector<8x32xf32>
    %225 = arith.mulf %224, %223 : vector<8x32xf32>
    %226 = arith.addf %221, %225 : vector<8x32xf32>
    %227 = vector.extract_strided_slice %19 {offsets = [0, 32], sizes = [8, 32], strides = [1, 1]} : vector<8x160xbf16> to vector<8x32xbf16>
    %cst_29 = arith.constant dense<0.000000e+00> : vector<8x192xf32>
    %228 = tpu.matmul %227, %194, %cst_29 {dimension_numbers = #tpu.dot_dimension_numbers<[1], [0], [0], [1], [0, 0, 1, 1], [], []>} : vector<8x32xbf16>, vector<32x192xbf16>, vector<8x192xf32> -> vector<8x192xf32>
    %229 = vector.extract_strided_slice %3 {offsets = [0, 6], sizes = [8, 1], strides = [1, 1]} : vector<8x30xf32> to vector<8x1xf32>
    %230 = vector.extract_strided_slice %228 {offsets = [0, 0], sizes = [8, 32], strides = [1, 1]} : vector<8x192xf32> to vector<8x32xf32>
    %231 = vector.broadcast %229 : vector<8x1xf32> to vector<8x32xf32>
    %232 = arith.mulf %231, %230 : vector<8x32xf32>
    %233 = arith.addf %226, %232 : vector<8x32xf32>
    %234 = vector.extract_strided_slice %3 {offsets = [0, 7], sizes = [8, 1], strides = [1, 1]} : vector<8x30xf32> to vector<8x1xf32>
    %235 = vector.extract_strided_slice %228 {offsets = [0, 32], sizes = [8, 32], strides = [1, 1]} : vector<8x192xf32> to vector<8x32xf32>
    %236 = vector.broadcast %234 : vector<8x1xf32> to vector<8x32xf32>
    %237 = arith.mulf %236, %235 : vector<8x32xf32>
    %238 = arith.addf %233, %237 : vector<8x32xf32>
    %239 = vector.extract_strided_slice %3 {offsets = [0, 8], sizes = [8, 1], strides = [1, 1]} : vector<8x30xf32> to vector<8x1xf32>
    %240 = vector.extract_strided_slice %228 {offsets = [0, 64], sizes = [8, 32], strides = [1, 1]} : vector<8x192xf32> to vector<8x32xf32>
    %241 = vector.broadcast %239 : vector<8x1xf32> to vector<8x32xf32>
    %242 = arith.mulf %241, %240 : vector<8x32xf32>
    %243 = arith.addf %238, %242 : vector<8x32xf32>
    %244 = vector.extract_strided_slice %3 {offsets = [0, 9], sizes = [8, 1], strides = [1, 1]} : vector<8x30xf32> to vector<8x1xf32>
    %245 = vector.extract_strided_slice %228 {offsets = [0, 96], sizes = [8, 32], strides = [1, 1]} : vector<8x192xf32> to vector<8x32xf32>
    %246 = vector.broadcast %244 : vector<8x1xf32> to vector<8x32xf32>
    %247 = arith.mulf %246, %245 : vector<8x32xf32>
    %248 = arith.addf %243, %247 : vector<8x32xf32>
    %249 = vector.extract_strided_slice %3 {offsets = [0, 10], sizes = [8, 1], strides = [1, 1]} : vector<8x30xf32> to vector<8x1xf32>
    %250 = vector.extract_strided_slice %228 {offsets = [0, 128], sizes = [8, 32], strides = [1, 1]} : vector<8x192xf32> to vector<8x32xf32>
    %251 = vector.broadcast %249 : vector<8x1xf32> to vector<8x32xf32>
    %252 = arith.mulf %251, %250 : vector<8x32xf32>
    %253 = arith.addf %248, %252 : vector<8x32xf32>
    %254 = vector.extract_strided_slice %3 {offsets = [0, 11], sizes = [8, 1], strides = [1, 1]} : vector<8x30xf32> to vector<8x1xf32>
    %255 = vector.extract_strided_slice %228 {offsets = [0, 160], sizes = [8, 32], strides = [1, 1]} : vector<8x192xf32> to vector<8x32xf32>
    %256 = vector.broadcast %254 : vector<8x1xf32> to vector<8x32xf32>
    %257 = arith.mulf %256, %255 : vector<8x32xf32>
    %258 = arith.addf %253, %257 : vector<8x32xf32>
    %259 = vector.extract_strided_slice %19 {offsets = [0, 64], sizes = [8, 32], strides = [1, 1]} : vector<8x160xbf16> to vector<8x32xbf16>
    %cst_30 = arith.constant dense<0.000000e+00> : vector<8x192xf32>
    %260 = tpu.matmul %259, %194, %cst_30 {dimension_numbers = #tpu.dot_dimension_numbers<[1], [0], [0], [1], [0, 0, 1, 1], [], []>} : vector<8x32xbf16>, vector<32x192xbf16>, vector<8x192xf32> -> vector<8x192xf32>
    %261 = vector.extract_strided_slice %3 {offsets = [0, 12], sizes = [8, 1], strides = [1, 1]} : vector<8x30xf32> to vector<8x1xf32>
    %262 = vector.extract_strided_slice %260 {offsets = [0, 0], sizes = [8, 32], strides = [1, 1]} : vector<8x192xf32> to vector<8x32xf32>
    %263 = vector.broadcast %261 : vector<8x1xf32> to vector<8x32xf32>
    %264 = arith.mulf %263, %262 : vector<8x32xf32>
    %265 = arith.addf %258, %264 : vector<8x32xf32>
    %266 = vector.extract_strided_slice %3 {offsets = [0, 13], sizes = [8, 1], strides = [1, 1]} : vector<8x30xf32> to vector<8x1xf32>
    %267 = vector.extract_strided_slice %260 {offsets = [0, 32], sizes = [8, 32], strides = [1, 1]} : vector<8x192xf32> to vector<8x32xf32>
    %268 = vector.broadcast %266 : vector<8x1xf32> to vector<8x32xf32>
    %269 = arith.mulf %268, %267 : vector<8x32xf32>
    %270 = arith.addf %265, %269 : vector<8x32xf32>
    %271 = vector.extract_strided_slice %3 {offsets = [0, 14], sizes = [8, 1], strides = [1, 1]} : vector<8x30xf32> to vector<8x1xf32>
    %272 = vector.extract_strided_slice %260 {offsets = [0, 64], sizes = [8, 32], strides = [1, 1]} : vector<8x192xf32> to vector<8x32xf32>
    %273 = vector.broadcast %271 : vector<8x1xf32> to vector<8x32xf32>
    %274 = arith.mulf %273, %272 : vector<8x32xf32>
    %275 = arith.addf %270, %274 : vector<8x32xf32>
    %276 = vector.extract_strided_slice %3 {offsets = [0, 15], sizes = [8, 1], strides = [1, 1]} : vector<8x30xf32> to vector<8x1xf32>
    %277 = vector.extract_strided_slice %260 {offsets = [0, 96], sizes = [8, 32], strides = [1, 1]} : vector<8x192xf32> to vector<8x32xf32>
    %278 = vector.broadcast %276 : vector<8x1xf32> to vector<8x32xf32>
    %279 = arith.mulf %278, %277 : vector<8x32xf32>
    %280 = arith.addf %275, %279 : vector<8x32xf32>
    %281 = vector.extract_strided_slice %3 {offsets = [0, 16], sizes = [8, 1], strides = [1, 1]} : vector<8x30xf32> to vector<8x1xf32>
    %282 = vector.extract_strided_slice %260 {offsets = [0, 128], sizes = [8, 32], strides = [1, 1]} : vector<8x192xf32> to vector<8x32xf32>
    %283 = vector.broadcast %281 : vector<8x1xf32> to vector<8x32xf32>
    %284 = arith.mulf %283, %282 : vector<8x32xf32>
    %285 = arith.addf %280, %284 : vector<8x32xf32>
    %286 = vector.extract_strided_slice %3 {offsets = [0, 17], sizes = [8, 1], strides = [1, 1]} : vector<8x30xf32> to vector<8x1xf32>
    %287 = vector.extract_strided_slice %260 {offsets = [0, 160], sizes = [8, 32], strides = [1, 1]} : vector<8x192xf32> to vector<8x32xf32>
    %288 = vector.broadcast %286 : vector<8x1xf32> to vector<8x32xf32>
    %289 = arith.mulf %288, %287 : vector<8x32xf32>
    %290 = arith.addf %285, %289 : vector<8x32xf32>
    %291 = vector.extract_strided_slice %19 {offsets = [0, 96], sizes = [8, 32], strides = [1, 1]} : vector<8x160xbf16> to vector<8x32xbf16>
    %cst_31 = arith.constant dense<0.000000e+00> : vector<8x192xf32>
    %292 = tpu.matmul %291, %194, %cst_31 {dimension_numbers = #tpu.dot_dimension_numbers<[1], [0], [0], [1], [0, 0, 1, 1], [], []>} : vector<8x32xbf16>, vector<32x192xbf16>, vector<8x192xf32> -> vector<8x192xf32>
    %293 = vector.extract_strided_slice %3 {offsets = [0, 18], sizes = [8, 1], strides = [1, 1]} : vector<8x30xf32> to vector<8x1xf32>
    %294 = vector.extract_strided_slice %292 {offsets = [0, 0], sizes = [8, 32], strides = [1, 1]} : vector<8x192xf32> to vector<8x32xf32>
    %295 = vector.broadcast %293 : vector<8x1xf32> to vector<8x32xf32>
    %296 = arith.mulf %295, %294 : vector<8x32xf32>
    %297 = arith.addf %290, %296 : vector<8x32xf32>
    %298 = vector.extract_strided_slice %3 {offsets = [0, 19], sizes = [8, 1], strides = [1, 1]} : vector<8x30xf32> to vector<8x1xf32>
    %299 = vector.extract_strided_slice %292 {offsets = [0, 32], sizes = [8, 32], strides = [1, 1]} : vector<8x192xf32> to vector<8x32xf32>
    %300 = vector.broadcast %298 : vector<8x1xf32> to vector<8x32xf32>
    %301 = arith.mulf %300, %299 : vector<8x32xf32>
    %302 = arith.addf %297, %301 : vector<8x32xf32>
    %303 = vector.extract_strided_slice %3 {offsets = [0, 20], sizes = [8, 1], strides = [1, 1]} : vector<8x30xf32> to vector<8x1xf32>
    %304 = vector.extract_strided_slice %292 {offsets = [0, 64], sizes = [8, 32], strides = [1, 1]} : vector<8x192xf32> to vector<8x32xf32>
    %305 = vector.broadcast %303 : vector<8x1xf32> to vector<8x32xf32>
    %306 = arith.mulf %305, %304 : vector<8x32xf32>
    %307 = arith.addf %302, %306 : vector<8x32xf32>
    %308 = vector.extract_strided_slice %3 {offsets = [0, 21], sizes = [8, 1], strides = [1, 1]} : vector<8x30xf32> to vector<8x1xf32>
    %309 = vector.extract_strided_slice %292 {offsets = [0, 96], sizes = [8, 32], strides = [1, 1]} : vector<8x192xf32> to vector<8x32xf32>
    %310 = vector.broadcast %308 : vector<8x1xf32> to vector<8x32xf32>
    %311 = arith.mulf %310, %309 : vector<8x32xf32>
    %312 = arith.addf %307, %311 : vector<8x32xf32>
    %313 = vector.extract_strided_slice %3 {offsets = [0, 22], sizes = [8, 1], strides = [1, 1]} : vector<8x30xf32> to vector<8x1xf32>
    %314 = vector.extract_strided_slice %292 {offsets = [0, 128], sizes = [8, 32], strides = [1, 1]} : vector<8x192xf32> to vector<8x32xf32>
    %315 = vector.broadcast %313 : vector<8x1xf32> to vector<8x32xf32>
    %316 = arith.mulf %315, %314 : vector<8x32xf32>
    %317 = arith.addf %312, %316 : vector<8x32xf32>
    %318 = vector.extract_strided_slice %3 {offsets = [0, 23], sizes = [8, 1], strides = [1, 1]} : vector<8x30xf32> to vector<8x1xf32>
    %319 = vector.extract_strided_slice %292 {offsets = [0, 160], sizes = [8, 32], strides = [1, 1]} : vector<8x192xf32> to vector<8x32xf32>
    %320 = vector.broadcast %318 : vector<8x1xf32> to vector<8x32xf32>
    %321 = arith.mulf %320, %319 : vector<8x32xf32>
    %322 = arith.addf %317, %321 : vector<8x32xf32>
    %323 = vector.extract_strided_slice %19 {offsets = [0, 128], sizes = [8, 32], strides = [1, 1]} : vector<8x160xbf16> to vector<8x32xbf16>
    %cst_32 = arith.constant dense<0.000000e+00> : vector<8x192xf32>
    %324 = tpu.matmul %323, %194, %cst_32 {dimension_numbers = #tpu.dot_dimension_numbers<[1], [0], [0], [1], [0, 0, 1, 1], [], []>} : vector<8x32xbf16>, vector<32x192xbf16>, vector<8x192xf32> -> vector<8x192xf32>
    %325 = vector.extract_strided_slice %3 {offsets = [0, 24], sizes = [8, 1], strides = [1, 1]} : vector<8x30xf32> to vector<8x1xf32>
    %326 = vector.extract_strided_slice %324 {offsets = [0, 0], sizes = [8, 32], strides = [1, 1]} : vector<8x192xf32> to vector<8x32xf32>
    %327 = vector.broadcast %325 : vector<8x1xf32> to vector<8x32xf32>
    %328 = arith.mulf %327, %326 : vector<8x32xf32>
    %329 = arith.addf %322, %328 : vector<8x32xf32>
    %330 = vector.extract_strided_slice %3 {offsets = [0, 25], sizes = [8, 1], strides = [1, 1]} : vector<8x30xf32> to vector<8x1xf32>
    %331 = vector.extract_strided_slice %324 {offsets = [0, 32], sizes = [8, 32], strides = [1, 1]} : vector<8x192xf32> to vector<8x32xf32>
    %332 = vector.broadcast %330 : vector<8x1xf32> to vector<8x32xf32>
    %333 = arith.mulf %332, %331 : vector<8x32xf32>
    %334 = arith.addf %329, %333 : vector<8x32xf32>
    %335 = vector.extract_strided_slice %3 {offsets = [0, 26], sizes = [8, 1], strides = [1, 1]} : vector<8x30xf32> to vector<8x1xf32>
    %336 = vector.extract_strided_slice %324 {offsets = [0, 64], sizes = [8, 32], strides = [1, 1]} : vector<8x192xf32> to vector<8x32xf32>
    %337 = vector.broadcast %335 : vector<8x1xf32> to vector<8x32xf32>
    %338 = arith.mulf %337, %336 : vector<8x32xf32>
    %339 = arith.addf %334, %338 : vector<8x32xf32>
    %340 = vector.extract_strided_slice %3 {offsets = [0, 27], sizes = [8, 1], strides = [1, 1]} : vector<8x30xf32> to vector<8x1xf32>
    %341 = vector.extract_strided_slice %324 {offsets = [0, 96], sizes = [8, 32], strides = [1, 1]} : vector<8x192xf32> to vector<8x32xf32>
    %342 = vector.broadcast %340 : vector<8x1xf32> to vector<8x32xf32>
    %343 = arith.mulf %342, %341 : vector<8x32xf32>
    %344 = arith.addf %339, %343 : vector<8x32xf32>
    %345 = vector.extract_strided_slice %3 {offsets = [0, 28], sizes = [8, 1], strides = [1, 1]} : vector<8x30xf32> to vector<8x1xf32>
    %346 = vector.extract_strided_slice %324 {offsets = [0, 128], sizes = [8, 32], strides = [1, 1]} : vector<8x192xf32> to vector<8x32xf32>
    %347 = vector.broadcast %345 : vector<8x1xf32> to vector<8x32xf32>
    %348 = arith.mulf %347, %346 : vector<8x32xf32>
    %349 = arith.addf %344, %348 : vector<8x32xf32>
    %350 = vector.extract_strided_slice %3 {offsets = [0, 29], sizes = [8, 1], strides = [1, 1]} : vector<8x30xf32> to vector<8x1xf32>
    %351 = vector.extract_strided_slice %324 {offsets = [0, 160], sizes = [8, 32], strides = [1, 1]} : vector<8x192xf32> to vector<8x32xf32>
    %352 = vector.broadcast %350 : vector<8x1xf32> to vector<8x32xf32>
    %353 = arith.mulf %352, %351 : vector<8x32xf32>
    %354 = arith.addf %349, %353 : vector<8x32xf32>
    %355 = arith.truncf %354 : vector<8x32xf32> to vector<8x32xbf16>
    %c0_33 = arith.constant 0 : index
    %c0_34 = arith.constant 0 : index
    %356 = vector.load %arg13[%c0_33, %c0_34] : memref<32x256xbf16, #tpu.memory_space<vmem>>, vector<32x256xbf16>
    %cst_35 = arith.constant dense<0.000000e+00> : vector<8x256xf32>
    %357 = tpu.matmul %355, %356, %cst_35 {dimension_numbers = #tpu.dot_dimension_numbers<[1], [0], [0], [1], [0, 0, 1, 1], [], []>} : vector<8x32xbf16>, vector<32x256xbf16>, vector<8x256xf32> -> vector<8x256xf32>
    %c0_36 = arith.constant 0 : index
    %c0_37 = arith.constant 0 : index
    %358 = vector.load %arg14[%c0_36, %c0_37] : memref<1x256xf32, #tpu.memory_space<vmem>>, vector<1x256xf32>
    %359 = vector.broadcast %358 : vector<1x256xf32> to vector<8x256xf32>
    %360 = arith.addf %357, %359 : vector<8x256xf32>
    %361 = tpu.concatenate %355, %355, %355, %355, %355, %355, %355, %355, %355, %355, %355, %355, %355, %355, %355, %355 in 1 : vector<8x32xbf16>, vector<8x32xbf16>, vector<8x32xbf16>, vector<8x32xbf16>, vector<8x32xbf16>, vector<8x32xbf16>, vector<8x32xbf16>, vector<8x32xbf16>, vector<8x32xbf16>, vector<8x32xbf16>, vector<8x32xbf16>, vector<8x32xbf16>, vector<8x32xbf16>, vector<8x32xbf16>, vector<8x32xbf16>, vector<8x32xbf16> -> vector<8x512xbf16>
    %362 = tpu.concatenate %355, %355, %355, %355, %355, %355, %355, %355, %355, %355, %355, %355, %355, %355, %355, %355 in 1 : vector<8x32xbf16>, vector<8x32xbf16>, vector<8x32xbf16>, vector<8x32xbf16>, vector<8x32xbf16>, vector<8x32xbf16>, vector<8x32xbf16>, vector<8x32xbf16>, vector<8x32xbf16>, vector<8x32xbf16>, vector<8x32xbf16>, vector<8x32xbf16>, vector<8x32xbf16>, vector<8x32xbf16>, vector<8x32xbf16>, vector<8x32xbf16> -> vector<8x512xbf16>
    %363 = tpu.concatenate %361, %362 in 1 : vector<8x512xbf16>, vector<8x512xbf16> -> vector<8x1024xbf16>
    %c0_38 = arith.constant 0 : index
    %c0_39 = arith.constant 0 : index
    %364 = vector.load %arg11[%c0_38, %c0_39] : memref<32x1024xbf16, #tpu.memory_space<vmem>>, vector<32x1024xbf16>
    %c0_40 = arith.constant 0 : index
    %c0_41 = arith.constant 0 : index
    %365 = vector.load %arg12[%c0_40, %c0_41] : memref<1024x32xbf16, #tpu.memory_space<vmem>>, vector<1024x32xbf16>
    %366 = vector.extract_strided_slice %11 {offsets = [0, 0], sizes = [8, 32], strides = [1, 1]} : vector<8x128xbf16> to vector<8x32xbf16>
    %cst_42 = arith.constant dense<0.000000e+00> : vector<8x1024xf32>
    %367 = tpu.matmul %366, %364, %cst_42 {dimension_numbers = #tpu.dot_dimension_numbers<[1], [0], [0], [1], [0, 0, 1, 1], [], []>} : vector<8x32xbf16>, vector<32x1024xbf16>, vector<8x1024xf32> -> vector<8x1024xf32>
    %368 = arith.extf %363 : vector<8x1024xbf16> to vector<8x1024xf32>
    %369 = arith.mulf %367, %368 : vector<8x1024xf32>
    %370 = arith.truncf %369 : vector<8x1024xf32> to vector<8x1024xbf16>
    %cst_43 = arith.constant dense<0.000000e+00> : vector<8x32xf32>
    %371 = tpu.matmul %370, %365, %cst_43 {dimension_numbers = #tpu.dot_dimension_numbers<[1], [0], [0], [1], [0, 0, 1, 1], [], []>} : vector<8x1024xbf16>, vector<1024x32xbf16>, vector<8x32xf32> -> vector<8x32xf32>
    %372 = vector.extract_strided_slice %11 {offsets = [0, 32], sizes = [8, 32], strides = [1, 1]} : vector<8x128xbf16> to vector<8x32xbf16>
    %cst_44 = arith.constant dense<0.000000e+00> : vector<8x1024xf32>
    %373 = tpu.matmul %372, %364, %cst_44 {dimension_numbers = #tpu.dot_dimension_numbers<[1], [0], [0], [1], [0, 0, 1, 1], [], []>} : vector<8x32xbf16>, vector<32x1024xbf16>, vector<8x1024xf32> -> vector<8x1024xf32>
    %374 = arith.extf %363 : vector<8x1024xbf16> to vector<8x1024xf32>
    %375 = arith.mulf %373, %374 : vector<8x1024xf32>
    %376 = arith.truncf %375 : vector<8x1024xf32> to vector<8x1024xbf16>
    %cst_45 = arith.constant dense<0.000000e+00> : vector<8x32xf32>
    %377 = tpu.matmul %376, %365, %cst_45 {dimension_numbers = #tpu.dot_dimension_numbers<[1], [0], [0], [1], [0, 0, 1, 1], [], []>} : vector<8x1024xbf16>, vector<1024x32xbf16>, vector<8x32xf32> -> vector<8x32xf32>
    %378 = vector.extract_strided_slice %11 {offsets = [0, 64], sizes = [8, 32], strides = [1, 1]} : vector<8x128xbf16> to vector<8x32xbf16>
    %cst_46 = arith.constant dense<0.000000e+00> : vector<8x1024xf32>
    %379 = tpu.matmul %378, %364, %cst_46 {dimension_numbers = #tpu.dot_dimension_numbers<[1], [0], [0], [1], [0, 0, 1, 1], [], []>} : vector<8x32xbf16>, vector<32x1024xbf16>, vector<8x1024xf32> -> vector<8x1024xf32>
    %380 = arith.extf %363 : vector<8x1024xbf16> to vector<8x1024xf32>
    %381 = arith.mulf %379, %380 : vector<8x1024xf32>
    %382 = arith.truncf %381 : vector<8x1024xf32> to vector<8x1024xbf16>
    %cst_47 = arith.constant dense<0.000000e+00> : vector<8x32xf32>
    %383 = tpu.matmul %382, %365, %cst_47 {dimension_numbers = #tpu.dot_dimension_numbers<[1], [0], [0], [1], [0, 0, 1, 1], [], []>} : vector<8x1024xbf16>, vector<1024x32xbf16>, vector<8x32xf32> -> vector<8x32xf32>
    %384 = vector.extract_strided_slice %11 {offsets = [0, 96], sizes = [8, 32], strides = [1, 1]} : vector<8x128xbf16> to vector<8x32xbf16>
    %cst_48 = arith.constant dense<0.000000e+00> : vector<8x1024xf32>
    %385 = tpu.matmul %384, %364, %cst_48 {dimension_numbers = #tpu.dot_dimension_numbers<[1], [0], [0], [1], [0, 0, 1, 1], [], []>} : vector<8x32xbf16>, vector<32x1024xbf16>, vector<8x1024xf32> -> vector<8x1024xf32>
    %386 = arith.extf %363 : vector<8x1024xbf16> to vector<8x1024xf32>
    %387 = arith.mulf %385, %386 : vector<8x1024xf32>
    %388 = arith.truncf %387 : vector<8x1024xf32> to vector<8x1024xbf16>
    %cst_49 = arith.constant dense<0.000000e+00> : vector<8x32xf32>
    %389 = tpu.matmul %388, %365, %cst_49 {dimension_numbers = #tpu.dot_dimension_numbers<[1], [0], [0], [1], [0, 0, 1, 1], [], []>} : vector<8x1024xbf16>, vector<1024x32xbf16>, vector<8x32xf32> -> vector<8x32xf32>
    %390 = tpu.concatenate %371, %377, %383, %389 in 1 : vector<8x32xf32>, vector<8x32xf32>, vector<8x32xf32>, vector<8x32xf32> -> vector<8x128xf32>
    %391 = vector.extract_strided_slice %360 {offsets = [0, 0], sizes = [8, 128], strides = [1, 1]} : vector<8x256xf32> to vector<8x128xf32>
    %392 = arith.addf %390, %391 : vector<8x128xf32>
    %c0_50 = arith.constant 0 : index
    %c0_51 = arith.constant 0 : index
    %393 = vector.load %arg15[%c0_50, %c0_51] : memref<8x256xf32, #tpu.memory_space<vmem>>, vector<8x128xf32>
    tpu.vector_store %arg15[%c0_50, %c0_51], %392 {strides = array<i32>} : memref<8x256xf32, #tpu.memory_space<vmem>>, vector<8x128xf32>,
    %394 = vector.extract_strided_slice %360 {offsets = [0, 128], sizes = [8, 128], strides = [1, 1]} : vector<8x256xf32> to vector<8x128xf32>
    %c0_52 = arith.constant 0 : index
    %c128 = arith.constant 128 : index
    %395 = vector.load %arg15[%c0_52, %c128] : memref<8x256xf32, #tpu.memory_space<vmem>>, vector<8x128xf32>
    tpu.vector_store %arg15[%c0_52, %c128], %394 {strides = array<i32>} : memref<8x256xf32, #tpu.memory_space<vmem>>, vector<8x128xf32>,
    return
  }
  func.func @transform_0(%arg0: i32) -> (i32, i32) {
    %c0_i32 = arith.constant 0 : i32
    %c0_i32_0 = arith.constant 0 : i32
    return %arg0, %c0_i32 : i32, i32
  }
  func.func @transform_1(%arg0: i32) -> (i32, i32) {
    %c0_i32 = arith.constant 0 : i32
    %c0_i32_0 = arith.constant 0 : i32
    return %arg0, %c0_i32 : i32, i32
  }
  func.func @transform_2(%arg0: i32) -> (i32, i32) {
    %c0_i32 = arith.constant 0 : i32
    %c0_i32_0 = arith.constant 0 : i32
    %c0_i32_1 = arith.constant 0 : i32
    return %c0_i32, %c0_i32_0 : i32, i32
  }
  func.func @transform_3(%arg0: i32) -> (i32, i32) {
    %c0_i32 = arith.constant 0 : i32
    %c0_i32_0 = arith.constant 0 : i32
    %c0_i32_1 = arith.constant 0 : i32
    return %c0_i32, %c0_i32_0 : i32, i32
  }
  func.func @transform_4(%arg0: i32) -> (i32, i32) {
    %c0_i32 = arith.constant 0 : i32
    %c0_i32_0 = arith.constant 0 : i32
    %c0_i32_1 = arith.constant 0 : i32
    return %c0_i32, %c0_i32_0 : i32, i32
  }
  func.func @transform_5(%arg0: i32) -> (i32, i32) {
    %c0_i32 = arith.constant 0 : i32
    %c0_i32_0 = arith.constant 0 : i32
    %c0_i32_1 = arith.constant 0 : i32
    return %c0_i32, %c0_i32_0 : i32, i32
  }
  func.func @transform_6(%arg0: i32) -> (i32, i32) {
    %c0_i32 = arith.constant 0 : i32
    %c0_i32_0 = arith.constant 0 : i32
    %c0_i32_1 = arith.constant 0 : i32
    return %c0_i32, %c0_i32_0 : i32, i32
  }
  func.func @transform_7(%arg0: i32) -> (i32, i32) {
    %c0_i32 = arith.constant 0 : i32
    %c0_i32_0 = arith.constant 0 : i32
    %c0_i32_1 = arith.constant 0 : i32
    return %c0_i32, %c0_i32_0 : i32, i32
  }
  func.func @transform_8(%arg0: i32) -> (i32, i32) {
    %c0_i32 = arith.constant 0 : i32
    %c0_i32_0 = arith.constant 0 : i32
    %c0_i32_1 = arith.constant 0 : i32
    return %c0_i32, %c0_i32_0 : i32, i32
  }
  func.func @transform_9(%arg0: i32) -> (i32, i32) {
    %c0_i32 = arith.constant 0 : i32
    %c0_i32_0 = arith.constant 0 : i32
    %c0_i32_1 = arith.constant 0 : i32
    return %c0_i32, %c0_i32_0 : i32, i32
  }
  func.func @transform_10(%arg0: i32) -> (i32, i32) {
    %c0_i32 = arith.constant 0 : i32
    %c0_i32_0 = arith.constant 0 : i32
    %c0_i32_1 = arith.constant 0 : i32
    return %c0_i32, %c0_i32_0 : i32, i32
  }
  func.func @transform_11(%arg0: i32) -> (i32, i32) {
    %c0_i32 = arith.constant 0 : i32
    %c0_i32_0 = arith.constant 0 : i32
    %c0_i32_1 = arith.constant 0 : i32
    return %c0_i32, %c0_i32_0 : i32, i32
  }
  func.func @transform_12(%arg0: i32) -> (i32, i32) {
    %c0_i32 = arith.constant 0 : i32
    %c0_i32_0 = arith.constant 0 : i32
    %c0_i32_1 = arith.constant 0 : i32
    return %c0_i32, %c0_i32_0 : i32, i32
  }
  func.func @transform_13(%arg0: i32) -> (i32, i32) {
    %c0_i32 = arith.constant 0 : i32
    %c0_i32_0 = arith.constant 0 : i32
    %c0_i32_1 = arith.constant 0 : i32
    return %c0_i32, %c0_i32_0 : i32, i32
  }
  func.func @transform_14(%arg0: i32) -> (i32, i32) {
    %c0_i32 = arith.constant 0 : i32
    %c0_i32_0 = arith.constant 0 : i32
    return %arg0, %c0_i32 : i32, i32
  }
}

</mosaic_0001>

<bundles_post_ra>
// kernel: tpu_custom_call.1
= control target key start
LH: loop header
LB: loop body
LE: loop exit
PB: predicated region body
PF: predicated region fallthrough
CT: control target
= control target key end

     0   :  { %vm124_vm0 = vcmask 1046528   ;;  %v3485_v17 = vmov 2   ;;  %v3486_v20 = vmov 3   ;;  %vm73_vm1 = vcmask 261120   ;;  %s5063_s0 = inlined_call_operand.vmem [shape: bf16[8,32], index: 0, kind: input, shape index: {}]   ;;  %s5064_s1 = inlined_call_operand.vmem [shape: bf16[8,30], index: 1, kind: input, shape index: {}]   ;;  %s5065_s2 = inlined_call_operand.vmem [shape: bf16[32,128], index: 2, kind: input, shape index: {}]   ;;  %s5066_s3 = inlined_call_operand.vmem [shape: f32[1,128], index: 3, kind: input, shape index: {}]   ;;  %s5067_s4 = inlined_call_operand.vmem [shape: bf16[32,256], index: 4, kind: input, shape index: {}]   ;;  %s5068_s5 = inlined_call_operand.vmem [shape: bf16[32,32], index: 5, kind: input, shape index: {}]   ;;  %s5069_s6 = inlined_call_operand.vmem [shape: bf16[30,160], index: 6, kind: input, shape index: {}]   ;;  %s5070_s7 = inlined_call_operand.vmem [shape: f32[1,160], index: 7, kind: input, shape index: {}]   ;;  %s5071_s8 = inlined_call_operand.vmem [shape: bf16[32,192], index: 8, kind: input, shape index: {}]   ;;  %s5072_s9 = inlined_call_operand.vmem [shape: bf16[30,32], index: 9, kind: input, shape index: {}]   ;;  %s5073_s10 = inlined_call_operand.vmem [shape: bf16[32,1024], index: 10, kind: input, shape index: {}]   ;;  %s5074_s11 = inlined_call_operand.vmem [shape: bf16[1024,32], index: 11, kind: input, shape index: {}]   ;;  %s5075_s12 = inlined_call_operand.vmem [shape: bf16[32,256], index: 12, kind: input, shape index: {}]   ;;  %s5076_s13 = inlined_call_operand.vmem [shape: f32[1,256], index: 13, kind: input, shape index: {}]   ;;  %s5077_s14 = inlined_call_operand.hbm [shape: f32[8,256], index: 14, kind: output, shape index: {}]  }
   0x1   :  { %v3182_v0 = vld [vmem:[%s5065_s2 + $0x8] sm:$0xff]  ;;  %v3181_v1 = vld [vmem:[%s5065_s2] sm:$0xff]  ;;  %v3185_v3 = vld [vmem:[%s5069_s6 + $0x14] sm:$0xf]  ;;  %3325 = vset.pattern.permute.xlu1 %v3485_v17  ;;  %3331 = vset.pattern.permute.xlu2 %v3486_v20 }
   0x2   :  { %v3605_v2 = vld [vmem:[%s5063_s0] sm:$0xf]  ;;  %v2737_v4 = vld [vmem:[%s5069_s6 + $0x18] sm:$0x70]  ;;  %v3183_v5 = vld [vmem:[%s5069_s6 + $0x4] sm:$0xf]  ;;  %83 = vmatpush.bf16.msra.mxu0 %v3182_v0 }
   0x3   :  { %v3617_v6 = vunpack.c.l.bf16 %v3605_v2  ;;  %v2740_v7 = vor.u32 %v3185_v3, %v2737_v4  ;;  %v2729_v8 = vld [vmem:[%s5069_s6 + $0x8] sm:$0xf0]  ;;  %v2735_v9 = vld [vmem:[%s5069_s6 + $0x10] sm:$0xf]  ;;  %v3186_v10 = vld [vmem:[%s5069_s6 + $0x14] sm:$0x70] }
   0x4   :  { %v2736_v11 = vor.u32 %v3186_v10, %v2735_v9  ;;  %v3631_v12 = vld [vmem:[%s5064_s1] sm:$0xf]  ;;  %v3184_v16 = vld [vmem:[%s5069_s6 + $0x4] sm:$0xf0]  ;;  %v2732_v18 = vor.u32 %v3183_v5, %v2729_v8 }
   0x5   :  { %v2727_v13 = vld [vmem:[%s5069_s6] sm:$0xf]  ;;  %v129_v14 = vsel %vm124_vm0, %v2740_v7, 0  ;;  %v3638_v15 = vunpack.c.l.bf16 %v3631_v12 }
   0x6   :  { %150 = vmatpush.bf16.msra.mxu2 %v129_v14  ;;  %v126_v19 = vsel %vm124_vm0, %v2736_v11, 0  ;;  %84 = vmatpush.bf16.msra.mxu0 %v3181_v1  ;;  %v2728_v21 = vor.u32 %v3184_v16, %v2727_v13 }
   0x7   :  { %137 = vmatpush.bf16.msra.mxu1 %v126_v19  ;;  %v3646_v22 = vpack.i.bf16 %v3638_v15, %v3617_v6 }
   0x8   :  { %19 = vsyncpa [#allocation3], 0  ;;  %vm120_vm2 = vcmask 244736   ;;  %v3487_v23 = vmov 5   ;;  %v2771_v24 = vld [vmem:[%s5067_s4 + $0x10] sm:$0xf] }
   0x9   :  { %3327 = vperm.xlu1 %3325, %v3646_v22   ;;  %3333 = vperm.xlu2 %3331, %v3646_v22   ;;  %v3194_v25 = vld [vmem:[%s5067_s4 + $0x14] sm:$0xf0]  ;;  %v3193_v26 = vld [vmem:[%s5067_s4 + $0x14] sm:$0xf]  ;;  %v2773_v28 = vld [vmem:[%s5067_s4 + $0x18] sm:$0xf0] }
   0xa   :  { %2724 = vmatmul.msk.bf16.vlgmr.msra.gmra.mxu0 %vm73_vm1, %v3605_v2  ;;  %151 = vmatpush.bf16.msra.mxu2 %v2732_v18  ;;  %v3666_v27 = vor.u32 %v3194_v25, %v2771_v24  ;;  %v3671_v29 = vor.u32 %v3193_v26, %v2773_v28  ;;  %v3488_v30 = vmov 6   ;;  %v2763_v31 = vld [vmem:[%s5067_s4] sm:$0xf]  ;;  %v3192_v32 = vld [vmem:[%s5067_s4 + $0x4] sm:$0xf0]  ;;  %v3489_v33 = vmov 9  }
   0xb   :  { %138 = vmatpush.bf16.msra.mxu1 %v2728_v21  ;;  %v2764_v34 = vor.u32 %v3192_v32, %v2763_v31  ;;  %v3191_v35 = vld [vmem:[%s5067_s4 + $0x4] sm:$0xf]  ;;  %v2765_v36 = vld [vmem:[%s5067_s4 + $0x8] sm:$0xf0]  ;;  %v3490_v38 = vmov 10   ;;  %v3491_v39 = vmov 1  }
   0xc   :  { %v3690_v37 = vor.u32 %v3191_v35, %v2765_v36  ;;  %3319 = vset.pattern.permute.xlu0 %v3491_v39  ;;  %v3492_v40 = vmov 11   ;;  %v3493_v41 = vmov 13   ;;  %v3494_v42 = vmov 17   ;;  %v2749_v43 = vld [vmem:[%s5072_s9 + $0x8] sm:$0xf]  ;;  %v3189_v48 = vld [vmem:[%s5072_s9] sm:$0xff] }
   0xd   :  { %2742 = vmatmul.msk.bf16.vlgmr.msra.gmra.mxu2 %vm120_vm2, %v3631_v12  ;;  %v3190_v44 = vld [vmem:[%s5072_s9 + $0x8] sm:$0x70]  ;;  %v3458_v46 = vld [vmem:[%s5066_s3] ss:$0 sm:$0xff]  ;;  %v3495_v54 = vmov 19   ;;  %s3497_s22 = smov 32  }
   0xe   :  { %2741 = vmatmul.msk.bf16.vlgmr.msra.gmra.mxu1 %vm120_vm2, %v3631_v12  ;;  %266 = vmatpush.bf16.msrb.mxu2 %v3671_v29  ;;  %v2750_v45 = vor.u32 %v3190_v44, %v2749_v43  ;;  %v3188_v52 = vld [vmem:[%s5068_s5 + $0x8] sm:$0xff]  ;;  %v3187_v56 = vld [vmem:[%s5068_s5] sm:$0xff]  ;;  %s3496_s5 = smov 96   ;;  %v3498_v62 = vmov 4   ;;  %v3499_v5 = vmov 27   ;;  %v3500_v9 = vmov 15  }
   0xf   :  { %253 = vmatpush.bf16.msrb.mxu1 %v3666_v27  ;;  %213 = vmatpush.bf16.msrb.mxu0 %v3188_v52  ;;  %v96_v63 = vld [vmem:[%s5070_s7] sm:$0x3]  ;;  %s3501_s7 = smov 64   ;;  %v3502_v10 = vmov 7   ;;  %v5079_v14 = vmov 18   ;;  %v3505_v17 = vmov 30  }
  0x10   :  { %v180_v47 = vsel %vm124_vm0, %v2750_v45, 0  ;;  %v98_v1 = vperm.slane %v96_v63, 0  ;;  %v99_v3 = vperm.slane %v96_v63, 1  ;;  %v3506_v18 = vmov 14   ;;  %v3198_v43 = vld [vmem:[%s5071_s8 + $0x14] sm:$0xf0] }
  0x11   :  { %3337 = vset.pattern.permute.xlu1 %v3487_v23  ;;  %3343 = vset.pattern.permute.xlu2 %v3488_v30  ;;  %v3507_v19 = vmov 21   ;;  %v3508_v20 = vmov 0   ;;  %v3509_v21 = vmov 22   ;;  %v3510_v23 = vmov 23   ;;  %v3197_v44 = vld [vmem:[%s5071_s8 + $0x14] sm:$0xf] }
  0x12   :  { %3339 = vperm.xlu1 %3337, %v3646_v22   ;;  %327 = vperm.xlu2 %3343, %v3617_v6   ;;  %v3511_v24 = vmov 31   ;;  %v3512_v25 = vmov 25   ;;  %v3514_v31 = vmov 26   ;;  %v5081_v32 = vmov 12   ;;  %s2707_s29 = sshll.u32 %s5077_s14, 4  ;;  %s2708_s29 = int_to_ptr.hbm [resolvable:$true] %s2707_s29 }
  0x13   :  { %254 = vmatpush.bf16.msrb.mxu1 %v2764_v34  ;;  %267 = vmatpush.bf16.msrb.mxu2 %v3690_v37  ;;  %v3517_v36 = vmov 29   ;;  %vm1170_vm3 = vcmask 523264   ;;  %vm1173_vm4 = vcmask 785408  }
  0x14   :  { %188 = vmatpush.bf16.msra.mxu3 %v180_v47  ;;  %214 = vmatpush.bf16.msrb.mxu0 %v3187_v56  ;;  %v5078_v47 = vmov 28  }
  0x17   :  { %463 = vmatpush.bf16.msra.mxu1 %v3666_v27  ;;  %476 = vmatpush.bf16.msra.mxu2 %v3671_v29 }
  0x18   :  { %189 = vmatpush.bf16.msra.mxu3 %v3189_v48  ;;  %373 = vmatpush.bf16.msra.mxu0 %v3671_v29  ;;  %v2787_v48 = vld [vmem:[%s5071_s8] sm:$0xf] }
  0x1a   :  { %3350 = vset.pattern.permute.xlu1 %v3489_v33  ;;  %3356 = vset.pattern.permute.xlu2 %v3490_v38 }
  0x1b   :  { %3352 = vperm.xlu1 %3350, %v3646_v22   ;;  %464 = vmatpush.bf16.msra.mxu1 %v2764_v34 }
  0x1c   :  { %397 = vperm.xlu2 %3356, %v3617_v6   ;;  %477 = vmatpush.bf16.msra.mxu2 %v3690_v37 }
  0x1d   :  { %360 = vmatpush.bf16.msrb.mxu3 %v3666_v27  ;;  %2760 = vmatmul.msk.bf16.vlgmr.msrb.gmra.mxu0 %vm73_vm1, %v3605_v2 }
  0x1e   :  { %2751 = vmatmul.msk.bf16.vlgmr.msra.gmra.mxu3 %vm120_vm2, %v3631_v12  ;;  %374 = vmatpush.bf16.msra.mxu0 %v3690_v37  ;;  %v3503_v12 = vmov 8  }
  0x21   :  { %361 = vmatpush.bf16.msrb.mxu3 %v2764_v34 }
  0x22   :  { %579 = vmatpush.bf16.msrb.mxu0 %v3671_v29 }
  0x23   :  { %3357 = vset.pattern.permute.xlu1 %v3492_v40  ;;  %v3518_v40 = vmov 20  }
  0x24   :  { %3363 = vset.pattern.permute.xlu2 %v3493_v41 }
  0x25   :  { %3365 = vperm.xlu2 %3363, %v3646_v22   ;;  %566 = vmatpush.bf16.msra.mxu3 %v3666_v27  ;;  %v5082_v27 = vmov 16  }
  0x26   :  { %580 = vmatpush.bf16.msrb.mxu0 %v3690_v37 }
  0x29   :  { %567 = vmatpush.bf16.msra.mxu3 %v2764_v34  ;;  %v5080_v34 = vmov 24  }
  0x2d   :  { %3381 = vset.pattern.permute.xlu2 %v3494_v42  ;;  %v2795_v42 = vld [vmem:[%s5071_s8 + $0x10] sm:$0xf] }
  0x2e   :  { %3383 = vperm.xlu2 %3381, %v3646_v22   ;;  %v3804_v45 = vor.u32 %v3198_v43, %v2795_v42 }
  0x36   :  { %3388 = vset.pattern.permute.xlu2 %v3495_v54 }
  0x37   :  { %3390 = vperm.xlu2 %3388, %v3646_v22  }
  0x3f   :  { %3413 = vset.pattern.permute.xlu2 %v3498_v62 }
  0x40   :  { %3415 = vperm.xlu2 %3413, %v3646_v22  }
  0x48   :  { %3426 = vset.pattern.permute.xlu2 %v3499_v5 }
  0x49   :  { %613 = vperm.xlu2 %3426, %v3617_v6  }
  0x51   :  { %3427 = vset.pattern.permute.xlu2 %v3503_v12 }
  0x52   :  { %3429 = vperm.xlu2 %3427, %v3646_v22  }
  0x5a   :  { %3434 = vset.pattern.permute.xlu2 %v3505_v17 }
  0x63   :  { %v3768_v26 = vpop.permute.xlu2 %3333 }
  0x6c   :  { %v3772_v28 = vpop.permute.xlu2 %327 }
  0x76   :  { %v3774_v29 = vpop.permute.xlu2 %397 }
  0x7b   :  { %v3778_v33 = vpop.permute.xlu1 %3327 }
  0x7f   :  { %v3783_v35 = vpop.permute.xlu2 %3365 }
  0x84   :  { %v3788_v37 = vpop.permute.xlu1 %3339 }
  0x87   :  { %v86_v49 = vpop.f32.mrf.mxu0 }
  0x88   :  { %v87_v50 = vadd.f32 %v3458_v46, %v86_v49  ;;  %v3790_v39 = vpop.permute.xlu2 %3383  ;;  %v3196_v49 = vld [vmem:[%s5071_s8 + $0x4] sm:$0xf0] }
  0x89   :  { %v3826_v52 = vor.u32 %v3196_v49, %v2787_v48  ;;  %v2863_v48 = vld [vmem:[%s5073_s10 + $0x40] sm:$0xf] }
  0x8a   :  { %v90_v51 = vmax.f32 %v87_v50, 0.0  ;;  %v3195_v50 = vld [vmem:[%s5071_s8 + $0x4] sm:$0xf] }
  0x8b   :  { %v140_v53 = vpop.f32.mrf.mxu1 }
  0x8c   :  { %v3717_v55 = vpack.c.bf16 %v90_v51, %v90_v51  ;;  %v141_v2 = vadd.f32 %v140_v53, %v98_v1  ;;  %v2789_v53 = vld [vmem:[%s5071_s8 + $0x8] sm:$0xf0] }
  0x8d   :  { %v3793_v41 = vpop.permute.xlu1 %3352  ;;  %v3831_v54 = vor.u32 %v3195_v50, %v2789_v53  ;;  %v2865_v50 = vld [vmem:[%s5073_s10 + $0x60] sm:$0xf0] }
  0x8e   :  { %2777 = vmatmul.msk.bf16.vlgmr.msrb.gmra.mxu1 %vm73_vm1, %v3717_v55  ;;  %2778 = vmatmul.msk.bf16.vlgmr.msrb.gmra.mxu2 %vm73_vm1, %v3717_v55  ;;  %v347_v57 = vunpack.c.l.b16 %v3717_v55  ;;  %v157_v7 = vmax.f32 %v141_v2, 0.0 }
  0x8f   :  { %v88_v58 = vpop.f32.mrf.mxu0  ;;  %691 = vmatpush.bf16.msrb.mxu1 %v3804_v45 }
  0x90   :  { %v348_v59 = vpack.c.b16 %v347_v57, %v347_v57  ;;  %v153_v60 = vpop.f32.mrf.mxu2 }
  0x91   :  { %v154_v4 = vadd.f32 %v153_v60, %v99_v3  ;;  %v3823_v51 = vpop.permute.xlu2 %3390 }
  0x92   :  { %349 = vrot.lane.b32.xlu0 %v348_v59, %s3496_s5  ;;  %555 = vrot.lane.b32.xlu1 %v348_v59, %s3497_s22 }
  0x93   :  { %v142_v61 = vpop.f32.mrf.mxu1  ;;  %v158_v8 = vmax.f32 %v154_v4, 0.0  ;;  %692 = vmatpush.bf16.msrb.mxu1 %v3826_v52 }
  0x95   :  { %v3749_v11 = vpack.c.bf16 %v158_v8, %v157_v7 }
  0x97   :  { %v765_v13 = vunpack.c.l.b16 %v3749_v11 }
  0x98   :  { %v155_v0 = vpop.f32.mrf.mxu2 }
  0x99   :  { %v766_v16 = vpack.c.b16 %v765_v13, %v765_v13 }
  0x9a   :  { %3359 = vperm.xlu1 %3357, %v3646_v22   ;;  %3321 = vperm.xlu0 %3319, %v3646_v22   ;;  %v216_v2 = vpop.f32.mrf.mxu0 }
  0x9b   :  { %850 = vrot.lane.b32.xlu2 %v766_v16, %s3501_s7 }
  0xa1   :  { %v191_v3 = vpop.f32.mrf.mxu3 }
  0xa2   :  { %3375 = vset.pattern.permute.xlu1 %v3500_v9  ;;  %452 = vrot.lane.b32.xlu0 %v348_v59, %s3501_s7  ;;  %v3851_v59 = vpop.permute.xlu2 %3415  ;;  %v217_v8 = vadd.f32 %v216_v2, %v191_v3  ;;  %v2879_v2 = vld [vmem:[%s5073_s10 + $0x50] sm:$0xf] }
  0xa3   :  { %3377 = vperm.xlu1 %3375, %v3646_v22   ;;  %3344 = vset.pattern.permute.xlu0 %v3502_v10 }
  0xa4   :  { %933 = vrot.lane.b32.xlu2 %v766_v16, %s3497_s22 }
  0xaa   :  { %3346 = vperm.xlu0 %3344, %v3646_v22   ;;  %v3879_v13 = vpop.permute.xlu2 %613 }
  0xab   :  { %3387 = vset.pattern.permute.xlu1 %v5079_v14 }
  0xac   :  { %500 = vperm.xlu1 %3387, %v3617_v6   ;;  %639 = vperm.xlu2 %3434, %v3617_v6  }
  0xb2   :  { %3369 = vset.pattern.permute.xlu0 %v3506_v18  ;;  %v193_v18 = vpop.f32.mrf.mxu3 }
  0xb3   :  { %3371 = vperm.xlu0 %3369, %v3646_v22  }
  0xb4   :  { %767 = vrot.lane.b32.xlu1 %v766_v16, %s3496_s5  ;;  %3435 = vset.pattern.permute.xlu2 %v3511_v24 }
  0xb5   :  { %3400 = vset.pattern.permute.xlu1 %v3507_v19  ;;  %649 = vperm.xlu2 %3435, %v3617_v6   ;;  %v218_v19 = vpop.f32.mrf.mxu0 }
  0xb6   :  { %v3209_v19 = vld [vmem:[%s5073_s10 + $0x2c] sm:$0xf0] }
  0xbb   :  { %3394 = vset.pattern.permute.xlu0 %v3508_v20  ;;  %v3341_v20 = vunpack.i.l.bf16 %v3788_v37 }
  0xbc   :  { %3396 = vperm.xlu0 %3394, %v3646_v22   ;;  %3402 = vperm.xlu1 %3400, %v3646_v22  }
  0xbd   :  { %3437 = vset.pattern.permute.xlu2 %v5082_v27 }
  0xbe   :  { %484 = vperm.xlu2 %3437, %v3617_v6  }
  0xc4   :  { %3406 = vset.pattern.permute.xlu1 %v3509_v21  ;;  %3407 = vset.pattern.permute.xlu0 %v3510_v23 }
  0xc5   :  { %536 = vperm.xlu1 %3406, %v3617_v6   ;;  %3409 = vperm.xlu0 %3407, %v3646_v22  }
  0xc6   :  { %3444 = vset.pattern.permute.xlu2 %v5080_v34 }
  0xc7   :  { %587 = vperm.xlu2 %3444, %v3617_v6  }
  0xcd   :  { %3419 = vset.pattern.permute.xlu1 %v3512_v25  ;;  %3425 = vset.pattern.permute.xlu0 %v3514_v31 }
  0xce   :  { %3421 = vperm.xlu1 %3419, %v3646_v22   ;;  %603 = vperm.xlu0 %3425, %v3617_v6  }
  0xcf   :  { %3448 = vset.pattern.permute.xlu2 %v3499_v5  ;;  %v3329_v5 = vunpack.i.l.bf16 %v3778_v33 }
  0xd6   :  { %3436 = vset.pattern.permute.xlu1 %v5081_v32  ;;  %3433 = vset.pattern.permute.xlu0 %v3517_v36 }
  0xd7   :  { %417 = vperm.xlu1 %3436, %v3617_v6   ;;  %629 = vperm.xlu0 %3433, %v3617_v6  }
  0xdf   :  { %3447 = vset.pattern.permute.xlu1 %v3514_v31  ;;  %3438 = vset.pattern.permute.xlu0 %v3518_v40  ;;  %v3898_v40 = vpop.permute.xlu2 %3429 }
  0xe0   :  { %3440 = vperm.xlu0 %3438, %v3646_v22   ;;  %v2797_v22 = vld [vmem:[%s5071_s8 + $0x18] sm:$0xf0] }
  0xe1   :  { %v3809_v46 = vor.u32 %v3197_v44, %v2797_v22 }
  0xe3   :  { %704 = vmatpush.bf16.msrb.mxu2 %v3809_v46 }
  0xe7   :  { %705 = vmatpush.bf16.msrb.mxu2 %v3831_v54 }
  0xe8   :  { %3445 = vset.pattern.permute.xlu0 %v5078_v47 }
  0xe9   :  { %623 = vperm.xlu0 %3445, %v3617_v6   ;;  %v3335_v6 = vunpack.i.l.bf16 %v3768_v26 }
  0xf1   :  { %3446 = vset.pattern.permute.xlu0 %v3488_v30  ;;  %v3417_v30 = vunpack.i.l.bf16 %v3851_v59 }
  0xf5   :  { %v851_v44 = vpop.permute.xlu2 %850 }
 0x104   :  { %v3834_v56 = vpop.permute.xlu0 %349  ;;  %v3836_v57 = vpop.permute.xlu1 %555 }
 0x105   :  { %5165 = vst [vmem:[#allocation5_spill] sm:$0xff] %v3836_v57  ;;  %2779 = vmatmul.msk.bf16.vlgmr.msrb.gmra.mxu3 %vm73_vm1, %v3834_v56  ;;  %2780 = vmatmul.msk.bf16.vlgmr.msra.gmra.mxu0 %vm73_vm1, %v3834_v56 }
 0x106   :  { %778 = vmatpush.bf16.msrb.mxu3 %v3804_v45  ;;  %791 = vmatpush.bf16.msra.mxu0 %v3809_v46 }
 0x10a   :  { %779 = vmatpush.bf16.msrb.mxu3 %v3826_v52  ;;  %792 = vmatpush.bf16.msra.mxu0 %v3831_v54 }
 0x10b   :  { %v3849_v58 = vpop.f32.mrf.mxu1 }
 0x10c   :  { %v3853_v60 = vpop.permute.xlu0 %3321  ;;  %v304_v61 = vmul.f32 %v3335_v6, %v3849_v58  ;;  %v3856_v62 = vpop.permute.xlu1 %3359  ;;  %v294_v16 = vmul.f32 %v3329_v5, %v3849_v58  ;;  %v2831_v6 = vld [vmem:[%s5073_s10] sm:$0xf]  ;;  %v1016_v5 = vunpack.c.h.b16 %v3749_v11 }
 0x10d   :  { %v3323_v63 = vunpack.i.l.bf16 %v3853_v60 }
 0x10e   :  { %306 = vrot.lane.b32.xlu1 %v304_v61, %s3497_s22  ;;  %v3207_v61 = vld [vmem:[%s5073_s10 + $0x1c] sm:$0xf0]  ;;  %v1017_v18 = vpack.c.b16 %v1016_v5, %v1016_v5 }
 0x10f   :  { %v284_v0 = vmul.f32 %v3323_v63, %v3849_v58  ;;  %v3203_v63 = vld [vmem:[%s5073_s10 + $0x4] sm:$0xf] }
 0x111   :  { %v269_v1 = vpop.f32.mrf.mxu2  ;;  %286 = vrot.lane.b32.xlu2 %v284_v0, %s3496_s5  ;;  %v934_v0 = vpop.permute.xlu2 %933 }
 0x112   :  { %v3863_v4 = vmul.f32 %v3417_v30, %v269_v1  ;;  %v330_v10 = vmul.f32 %v3772_v28, %v269_v1  ;;  %v320_v31 = vmul.f32 %v3341_v20, %v269_v1  ;;  %v3205_v20 = vld [vmem:[%s5073_s10 + $0x14] sm:$0xf] }
 0x113   :  { %v258_v7 = vpop.f32.mrf.mxu1 }
 0x114   :  { %v3866_v9 = vpop.permute.xlu0 %452  ;;  %v3217_v7 = vld [vmem:[%s5073_s10 + $0x6c] sm:$0xf0] }
 0x115   :  { %5166 = vst [vmem:[#allocation6_spill] sm:$0xff] %v3866_v9  ;;  %2781 = vmatmul.msk.bf16.vlgmr.msra.gmra.mxu1 %vm73_vm1, %v3866_v9  ;;  %2782 = vmatmul.msk.bf16.vlgmr.msra.gmra.mxu2 %vm73_vm1, %v3866_v9  ;;  %v3873_v12 = vpop.permute.xlu1 %3377  ;;  %v4579_v9 = vld [vmem:[%s5074_s11 + $0x88] sm:$0xff] }
 0x116   :  { %2783 = vmatmul.msk.bf16.vlgmr.msra.gmra.mxu3 %vm73_vm1, %v3836_v57  ;;  %2784 = vmatmul.msk.bf16.vlgmr.msrb.gmra.mxu0 %vm73_vm1, %v3836_v57  ;;  %v4573_v57 = vld [vmem:[%s5074_s11 + $0x1f8] sm:$0xff]  ;;  %5189 = vst [vmem:[#allocation24_spill] sm:$0xff] %v4579_v9 }
 0x117   :  { %332 = vrot.lane.b32.xlu1 %v330_v10, %s3501_s7  ;;  %861 = vmatpush.bf16.msra.mxu1 %v3804_v45  ;;  %v2881_v10 = vld [vmem:[%s5073_s10 + $0x70] sm:$0xf0]  ;;  %5188 = vst [vmem:[#allocation23_spill] sm:$0xff] %v4573_v57 }
 0x118   :  { %874 = vmatpush.bf16.msra.mxu2 %v3809_v46  ;;  %944 = vmatpush.bf16.msra.mxu3 %v3804_v45 }
 0x119   :  { %v271_v17 = vpop.f32.mrf.mxu2  ;;  %296 = vrot.lane.b32.xlu2 %v294_v16, %s3501_s7  ;;  %957 = vmatpush.bf16.msrb.mxu0 %v3809_v46  ;;  %v3971_v16 = vor.u32 %v3217_v7, %v2879_v2 }
 0x11b   :  { %862 = vmatpush.bf16.msra.mxu1 %v3826_v52 }
 0x11c   :  { %v3890_v23 = vpop.permute.xlu0 %3346  ;;  %875 = vmatpush.bf16.msra.mxu2 %v3831_v54  ;;  %945 = vmatpush.bf16.msra.mxu3 %v3826_v52 }
 0x11d   :  { %v3348_v24 = vunpack.i.l.bf16 %v3890_v23  ;;  %958 = vmatpush.bf16.msrb.mxu0 %v3831_v54 }
 0x11e   :  { %v3896_v25 = vpop.permute.xlu1 %500 }
 0x11f   :  { %v340_v28 = vmul.f32 %v3348_v24, %v269_v1  ;;  %v3950_v1 = vor.u32 %v3207_v61, %v2831_v6  ;;  %v2849_v24 = vld [vmem:[%s5073_s10 + $0x30] sm:$0xf0] }
 0x121   :  { %342 = vrot.lane.b32.xlu1 %v340_v28, %s3497_s22  ;;  %322 = vrot.lane.b32.xlu2 %v320_v31, %s3496_s5  ;;  %v3993_v31 = vor.u32 %v3205_v20, %v2849_v24 }
 0x125   :  { %2801 = vmatmul.msk.bf16.vlgmr.msrb.gmra.mxu1 %vm73_vm1, %v3749_v11  ;;  %2802 = vmatmul.msk.bf16.vlgmr.msrb.gmra.mxu2 %vm73_vm1, %v3749_v11  ;;  %v3906_v42 = vpop.permute.xlu0 %3371  ;;  %v2847_v11 = vld [vmem:[%s5073_s10 + $0x10] sm:$0xf] }
 0x126   :  { %v768_v43 = vpop.permute.xlu1 %767  ;;  %1027 = vmatpush.bf16.msrb.mxu1 %v3804_v45  ;;  %1040 = vmatpush.bf16.msrb.mxu2 %v3809_v46  ;;  %v3215_v45 = vld [vmem:[%s5073_s10 + $0x5c] sm:$0xf0]  ;;  %v3211_v46 = vld [vmem:[%s5073_s10 + $0x44] sm:$0xf]  ;;  %v3991_v28 = vor.u32 %v3209_v19, %v2847_v11  ;;  %v3367_v11 = vunpack.i.l.bf16 %v3783_v35 }
 0x127   :  { %2803 = vmatmul.msk.bf16.vlgmr.msrb.gmra.mxu3 %vm73_vm1, %v768_v43  ;;  %2804 = vmatmul.msk.bf16.vlgmr.msra.gmra.mxu0 %vm73_vm1, %v768_v43  ;;  %v3930_v53 = vor.u32 %v3215_v45, %v2863_v48  ;;  %v3995_v43 = vpop.permute.xlu2 %639 }
 0x12a   :  { %1028 = vmatpush.bf16.msrb.mxu1 %v3826_v52  ;;  %1041 = vmatpush.bf16.msrb.mxu2 %v3831_v54  ;;  %v3932_v54 = vor.u32 %v3211_v46, %v2865_v50 }
 0x12e   :  { %v3914_v22 = vpop.permute.xlu0 %3396  ;;  %v4005_v48 = vpop.permute.xlu1 %3402 }
 0x12f   :  { %v3398_v49 = vunpack.i.l.bf16 %v3914_v22 }
 0x131   :  { %v278_v52 = vmul.f32 %v3398_v49, %v3849_v58  ;;  %v2833_v58 = vld [vmem:[%s5073_s10 + $0x20] sm:$0xf0] }
 0x132   :  { %v3952_v3 = vor.u32 %v3203_v63, %v2833_v58 }
 0x133   :  { %v279_v30 = vadd.f32 %v278_v52, %v217_v8  ;;  %v3213_v8 = vld [vmem:[%s5073_s10 + $0x54] sm:$0xf] }
 0x134   :  { %5167 = vst [vmem:[#allocation7_spill] sm:$0xff] %v3952_v3  ;;  %v3973_v17 = vor.u32 %v3213_v8, %v2881_v10  ;;  %v3379_v8 = vunpack.i.l.bf16 %v3873_v12 }
 0x135   :  { %2805 = vmatmul.msk.bf16.vlgmr.msra.gmra.mxu1 %vm73_vm1, %v851_v44  ;;  %2806 = vmatmul.msk.bf16.vlgmr.msra.gmra.mxu2 %vm73_vm1, %v851_v44  ;;  %v3999_v44 = vpop.permute.xlu2 %649 }
 0x136   :  { %1407 = vmatpush.bf16.msra.mxu1 %v3930_v53  ;;  %1420 = vmatpush.bf16.msra.mxu2 %v3932_v54 }
 0x137   :  { %2807 = vmatmul.msk.bf16.vlgmr.msra.gmra.mxu3 %vm73_vm1, %v934_v0  ;;  %2808 = vmatmul.msk.bf16.vlgmr.msrb.gmra.mxu0 %vm73_vm1, %v934_v0  ;;  %v4009_v45 = vpop.permute.xlu1 %536  ;;  %v4017_v6 = vpop.permute.xlu0 %3409  ;;  %v3373_v0 = vunpack.i.l.bf16 %v3906_v42 }
 0x13a   :  { %1408 = vmatpush.bf16.msra.mxu1 %v3950_v1  ;;  %1421 = vmatpush.bf16.msra.mxu2 %v3952_v3 }
 0x13d   :  { %v4007_v49 = vpop.permute.xlu2 %484 }
 0x140   :  { %v4015_v50 = vpop.permute.xlu1 %3421  ;;  %v4020_v5 = vpop.permute.xlu0 %603 }
 0x145   :  { %2809 = vmatmul.msk.bf16.vlgmr.msrb.gmra.mxu1 %vm73_vm1, %v1017_v18  ;;  %2810 = vmatmul.msk.bf16.vlgmr.msrb.gmra.mxu2 %vm73_vm1, %v1017_v18  ;;  %v588_v46 = vpop.permute.xlu2 %587 }
 0x146   :  { %1459 = vmatpush.bf16.msrb.mxu1 %v3971_v16  ;;  %1472 = vmatpush.bf16.msrb.mxu2 %v3973_v17 }
 0x149   :  { %v418_v61 = vpop.permute.xlu1 %417  ;;  %v4031_v34 = vpop.permute.xlu0 %629 }
 0x14a   :  { %1460 = vmatpush.bf16.msrb.mxu1 %v3991_v28  ;;  %1473 = vmatpush.bf16.msrb.mxu2 %v3993_v31 }
 0x155   :  { %2893 = vmatmul.msk.bf16.vlgmr.msra.gmra.mxu1 %vm73_vm1, %v3717_v55  ;;  %2894 = vmatmul.msk.bf16.vlgmr.msra.gmra.mxu2 %vm73_vm1, %v3717_v55 }
 0x165   :  { %2897 = vmatmul.msk.bf16.vlgmr.msrb.gmra.mxu1 %vm73_vm1, %v3717_v55  ;;  %2898 = vmatmul.msk.bf16.vlgmr.msrb.gmra.mxu2 %vm73_vm1, %v3717_v55 }
 0x16b   :  { %v287_v52 = vpop.permute.xlu2 %286 }
 0x16c   :  { %v289_v58 = vadd.f32 %v287_v52, %v279_v30  ;;  %v3431_v30 = vunpack.i.l.bf16 %v3898_v40 }
 0x173   :  { %v297_v63 = vpop.permute.xlu2 %296 }
 0x174   :  { %v299_v2 = vadd.f32 %v297_v63, %v289_v58 }
 0x17b   :  { %v323_v52 = vpop.permute.xlu2 %322 }
 0x180   :  { %v307_v7 = vpop.permute.xlu1 %306 }
 0x181   :  { %v309_v10 = vadd.f32 %v307_v7, %v299_v2 }
 0x182   :  { %v376_v18 = vpop.f32.mrf.mxu0 }
 0x183   :  { %v315_v19 = vadd.f32 %v3863_v4, %v309_v10  ;;  %v4025_v20 = vmul.f32 %v418_v61, %v376_v18  ;;  %v436_v24 = vmul.f32 %v3373_v0, %v376_v18  ;;  %v446_v47 = vmul.f32 %v3379_v8, %v376_v18 }
 0x184   :  { %v426_v14 = vmul.f32 %v3367_v11, %v376_v18  ;;  %v3385_v8 = vunpack.i.l.bf16 %v3790_v39  ;;  %v3392_v10 = vunpack.i.l.bf16 %v3823_v51 }
 0x185   :  { %438 = vrot.lane.b32.xlu0 %v436_v24, %s3501_s7  ;;  %448 = vrot.lane.b32.xlu1 %v446_v47, %s3497_s22  ;;  %v325_v58 = vadd.f32 %v323_v52, %v315_v19 }
 0x186   :  { %428 = vrot.lane.b32.xlu2 %v426_v14, %s3496_s5 }
 0x188   :  { %v363_v63 = vpop.f32.mrf.mxu3 }
 0x189   :  { %v333_v2 = vpop.permute.xlu1 %332  ;;  %v384_v7 = vmul.f32 %v3431_v30, %v363_v63  ;;  %v4043_v30 = vpop.permute.xlu0 %3440 }
 0x18a   :  { %v335_v4 = vadd.f32 %v333_v2, %v325_v58  ;;  %v378_v61 = vpop.f32.mrf.mxu0  ;;  %v3442_v58 = vunpack.i.l.bf16 %v4043_v30 }
 0x190   :  { %v365_v0 = vpop.f32.mrf.mxu3 }
 0x191   :  { %v3354_v0 = vunpack.i.l.bf16 %v3793_v41 }
 0x192   :  { %v4035_v11 = vpop.f32.mrf.mxu1 }
 0x193   :  { %v4037_v47 = vpop.f32.mrf.mxu0  ;;  %v343_v14 = vpop.permute.xlu1 %342  ;;  %v493_v18 = vmul.f32 %v3385_v8, %v4035_v11  ;;  %v503_v19 = vmul.f32 %v3896_v25, %v4035_v11  ;;  %v513_v24 = vmul.f32 %v3392_v10, %v4035_v11  ;;  %v3361_v25 = vunpack.i.l.bf16 %v3856_v62 }
 0x194   :  { %v345_v52 = vadd.f32 %v343_v14, %v335_v4 }
 0x195   :  { %495 = vrot.lane.b32.xlu0 %v493_v18, %s3496_s5  ;;  %505 = vrot.lane.b32.xlu1 %v503_v19, %s3501_s7  ;;  %v410_v32 = vmul.f32 %v3361_v25, %v363_v63  ;;  %v390_v19 = vmul.f32 %v3354_v0, %v363_v63  ;;  %v3330_v25 = vunpack.i.h.bf16 %v3778_v33  ;;  %v3423_v33 = vunpack.i.l.bf16 %v4015_v50 }
 0x196   :  { %515 = vrot.lane.b32.xlu2 %v513_v24, %s3497_s22  ;;  %v4049_v2 = vadd.f32 %v384_v7, %v345_v52  ;;  %v3399_v7 = vunpack.i.h.bf16 %v3914_v22 }
 0x198   :  { %v479_v61 = vpop.f32.mrf.mxu2 }
 0x199   :  { %v4053_v8 = vpop.f32.mrf.mxu3  ;;  %v4055_v10 = vmul.f32 %v3442_v58, %v479_v61  ;;  %v539_v0 = vmul.f32 %v4009_v45, %v479_v61 }
 0x19a   :  { %v468_v4 = vpop.f32.mrf.mxu1  ;;  %v4058_v14 = vmul.f32 %v588_v46, %v4053_v8  ;;  %v400_v46 = vmul.f32 %v3774_v29, %v363_v63 }
 0x19b   :  { %v584_v18 = vpop.f32.mrf.mxu0 }
 0x19d   :  { %412 = vrot.lane.b32.xlu0 %v410_v32, %s3497_s22  ;;  %392 = vrot.lane.b32.xlu1 %v390_v19, %s3496_s5  ;;  %v3418_v32 = vunpack.i.h.bf16 %v3851_v59  ;;  %v642_v19 = vmul.f32 %v3995_v43, %v4037_v47  ;;  %v596_v43 = vmul.f32 %v3423_v33, %v4053_v8 }
 0x19e   :  { %1074 = vperm.xlu2 %3448, %v3638_v15  }
 0x1a0   :  { %v481_v24 = vpop.f32.mrf.mxu2 }
 0x1a1   :  { %v571_v52 = vpop.f32.mrf.mxu3  ;;  %v3324_v24 = vunpack.i.h.bf16 %v3853_v60  ;;  %v3411_v60 = vunpack.i.l.bf16 %v4017_v6 }
 0x1a2   :  { %v4064_v27 = vpop.f32.mrf.mxu1 }
 0x1a3   :  { %v4067_v58 = vmul.f32 %v3399_v7, %v4064_v27  ;;  %v732_v45 = vmul.f32 %v3330_v25, %v4064_v27 }
 0x1a4   :  { %v4070_v4 = vpop.f32.mrf.mxu0 }
 0x1a5   :  { %799 = vperm.xlu0 %3446, %v3638_v15   ;;  %402 = vrot.lane.b32.xlu1 %v400_v46, %s3501_s7 }
 0x1a6   :  { %541 = vrot.lane.b32.xlu2 %v539_v0, %s3501_s7 }
 0x1a7   :  { %3450 = vset.pattern.permute.xlu2 %v3490_v38  ;;  %v3404_v38 = vunpack.i.l.bf16 %v4005_v48 }
 0x1a8   :  { %v707_v22 = vpop.f32.mrf.mxu2 }
 0x1a9   :  { %v4079_v18 = vmul.f32 %v3418_v32, %v707_v22  ;;  %v529_v0 = vmul.f32 %v3404_v38, %v479_v61  ;;  %v722_v32 = vmul.f32 %v3324_v24, %v4064_v27 }
 0x1aa   :  { %v696_v29 = vpop.f32.mrf.mxu1  ;;  %v4081_v63 = vpop.f32.mrf.mxu3 }
 0x1ac   :  { %v796_v7 = vpop.f32.mrf.mxu0 }
 0x1ad   :  { %734 = vrot.lane.b32.xlu0 %v732_v45, %s3501_s7  ;;  %1064 = vperm.xlu1 %3447, %v3638_v15   ;;  %v549_v7 = vmul.f32 %v3411_v60, %v479_v61  ;;  %v652_v60 = vmul.f32 %v3999_v44, %v4037_v47  ;;  %v3405_v44 = vunpack.i.h.bf16 %v4005_v48  ;;  %v3380_v48 = vunpack.i.h.bf16 %v3873_v12 }
 0x1ae   :  { %644 = vrot.lane.b32.xlu2 %v642_v19, %s3501_s7  ;;  %3449 = vset.pattern.permute.xlu0 %v3517_v36 }
 0x1b0   :  { %v709_v59 = vpop.f32.mrf.mxu2 }
 0x1b2   :  { %v783_v52 = vpop.f32.mrf.mxu3  ;;  %v4093_v46 = vpop.f32.mrf.mxu1 }
 0x1b3   :  { %v5168_v52 = vmov 16  }
 0x1b4   :  { %v4097_v25 = vpop.f32.mrf.mxu0 }
 0x1b5   :  { %598 = vrot.lane.b32.xlu0 %v596_v43, %s3496_s5  ;;  %531 = vrot.lane.b32.xlu1 %v529_v0, %s3496_s5  ;;  %v5169_v43 = vmov 12   ;;  %v3368_v0 = vunpack.i.h.bf16 %v3783_v35  ;;  %v3336_v35 = vunpack.i.h.bf16 %v3768_v26 }
 0x1b6   :  { %724 = vrot.lane.b32.xlu2 %v722_v32, %s3496_s5  ;;  %3454 = vset.pattern.permute.xlu1 %v3509_v21  ;;  %v632_v21 = vmul.f32 %v4031_v34, %v4037_v47 }
 0x1b7   :  { %v891_v34 = vmul.f32 %v3368_v0, %v4093_v46 }
 0x1b8   :  { %v4104_v29 = vpop.f32.mrf.mxu2 }
 0x1ba   :  { %v866_v45 = vpop.f32.mrf.mxu1  ;;  %v4106_v19 = vpop.f32.mrf.mxu3 }
 0x1bb   :  { %v616_v45 = vmul.f32 %v3879_v13, %v4053_v8  ;;  %v994_v13 = vmul.f32 %v3405_v44, %v4106_v19  ;;  %v4172_v44 = vpop.permute.xlu0 %623 }
 0x1bc   :  { %v962_v38 = vpop.f32.mrf.mxu0 }
 0x1bd   :  { %1090 = vperm.xlu0 %3449, %v3638_v15   ;;  %551 = vrot.lane.b32.xlu1 %v549_v7, %s3497_s22  ;;  %v5170_v7 = vmov 24  }
 0x1be   :  { %835 = vperm.xlu2 %3450, %v3638_v15  }
 0x1c0   :  { %v879_v33 = vpop.f32.mrf.mxu2 }
 0x1c1   :  { %v5171_v33 = vmov 18  }
 0x1c2   :  { %v4111_v59 = vpop.f32.mrf.mxu1  ;;  %v949_v24 = vpop.f32.mrf.mxu3 }
 0x1c5   :  { %3452 = vset.pattern.permute.xlu0 %v5168_v52  ;;  %634 = vrot.lane.b32.xlu1 %v632_v21, %s3496_s5  ;;  %v3342_v21 = vunpack.i.h.bf16 %v3788_v37  ;;  %v742_v52 = vmul.f32 %v3336_v35, %v4064_v27  ;;  %v911_v27 = vmul.f32 %v3380_v48, %v4093_v46 }
 0x1c6   :  { %3451 = vset.pattern.permute.xlu2 %v5169_v43  ;;  %918 = vperm.xlu0 %3452, %v3638_v15  }
 0x1c7   :  { %882 = vperm.xlu2 %3451, %v3638_v15   ;;  %v758_v43 = vmul.f32 %v3342_v21, %v707_v22  ;;  %v3362_v22 = vunpack.i.h.bf16 %v3856_v62  ;;  %v3355_v21 = vunpack.i.h.bf16 %v3793_v41  ;;  %v3386_v41 = vunpack.i.h.bf16 %v3790_v39 }
 0x1c8   :  { %v4120_v61 = vpop.f32.mrf.mxu2  ;;  %v3424_v39 = vunpack.i.h.bf16 %v4015_v50 }
 0x1c9   :  { %v844_v12 = vmul.f32 %v3362_v22, %v4070_v4 }
 0x1ca   :  { %v1032_v32 = vpop.f32.mrf.mxu1 }
 0x1cb   :  { %v606_v32 = vmul.f32 %v4020_v5, %v4053_v8 }
 0x1cd   :  { %654 = vrot.lane.b32.xlu1 %v652_v60, %s3497_s22 }
 0x1ce   :  { %893 = vrot.lane.b32.xlu0 %v891_v34, %s3496_s5  ;;  %v3432_v34 = vunpack.i.h.bf16 %v3898_v40 }
 0x1cf   :  { %618 = vrot.lane.b32.xlu2 %v616_v45, %s3497_s22  ;;  %3455 = vset.pattern.permute.xlu0 %v5170_v7  ;;  %v3374_v45 = vunpack.i.h.bf16 %v3906_v42  ;;  %v5172_v42 = vmov 28  }
 0x1d0   :  { %v1045_v38 = vpop.f32.mrf.mxu2  ;;  %3453 = vset.pattern.permute.xlu2 %v5171_v33  ;;  %v818_v5 = vmul.f32 %v3432_v34, %v4081_v63  ;;  %v3412_v33 = vunpack.i.h.bf16 %v4017_v6 }
 0x1d1   :  { %v901_v62 = vmul.f32 %v3374_v45, %v4093_v46  ;;  %v3349_v38 = vunpack.i.h.bf16 %v3890_v23  ;;  %v828_v23 = vmul.f32 %v3355_v21, %v4081_v63 }
 0x1d2   :  { %v4135_v24 = vpop.f32.mrf.mxu1  ;;  %v1010_v35 = vmul.f32 %v3412_v33, %v4097_v25 }
 0x1d5   :  { %744 = vrot.lane.b32.xlu1 %v742_v52, %s3497_s22  ;;  %v3443_v52 = vunpack.i.h.bf16 %v4043_v30  ;;  %v927_v30 = vmul.f32 %v3386_v41, %v4104_v29 }
 0x1d6   :  { %996 = vrot.lane.b32.xlu0 %v994_v13, %s3497_s22 }
 0x1d7   :  { %760 = vrot.lane.b32.xlu2 %v758_v43, %s3496_s5  ;;  %v984_v6 = vmul.f32 %v3443_v52, %v4106_v19 }
 0x1d8   :  { %v4143_v0 = vpop.f32.mrf.mxu2 }
 0x1da   :  { %v1412_v26 = vpop.f32.mrf.mxu1 }
 0x1dd   :  { %608 = vrot.lane.b32.xlu1 %v606_v32, %s3501_s7 }
 0x1de   :  { %1048 = vperm.xlu0 %3455, %v3638_v15  }
 0x1df   :  { %913 = vrot.lane.b32.xlu2 %v911_v27, %s3497_s22 }
 0x1e0   :  { %v1425_v37 = vpop.f32.mrf.mxu2  ;;  %v429_v13 = vpop.permute.xlu2 %428 }
 0x1e2   :  { %v4153_v60 = vpop.f32.mrf.mxu1 }
 0x1e5   :  { %846 = vrot.lane.b32.xlu1 %v844_v12, %s3496_s5  ;;  %v3393_v12 = vunpack.i.h.bf16 %v3823_v51 }
 0x1e6   :  { %3457 = vset.pattern.permute.xlu0 %v3517_v36  ;;  %v808_v36 = vmul.f32 %v3349_v38, %v4081_v63 }
 0x1e7   :  { %820 = vrot.lane.b32.xlu2 %v818_v5, %s3501_s7  ;;  %v974_v5 = vmul.f32 %v3393_v12, %v4106_v19 }
 0x1e8   :  { %v4161_v8 = vpop.f32.mrf.mxu2 }
 0x1ea   :  { %v1464_v7 = vpop.f32.mrf.mxu1 }
 0x1ed   :  { %903 = vrot.lane.b32.xlu1 %v901_v62, %s3501_s7 }
 0x1ef   :  { %965 = vperm.xlu2 %3453, %v3638_v15  }
 0x1f0   :  { %v1477_v40 = vpop.f32.mrf.mxu2  ;;  %v516_v48 = vpop.permute.xlu2 %515 }
 0x1f5   :  { %810 = vrot.lane.b32.xlu1 %v808_v36, %s3496_s5  ;;  %v1057_v36 = vmul.f32 %v3424_v39, %v4111_v59 }
 0x1f7   :  { %1012 = vrot.lane.b32.xlu2 %v1010_v35, %s3496_s5  ;;  %v439_v43 = vpop.permute.xlu0 %438  ;;  %v449_v26 = vpop.permute.xlu1 %448 }
 0x1f8   :  { %3456 = vset.pattern.permute.xlu2 %v5172_v42  ;;  %v1075_v34 = vpop.permute.xlu2 %1074 }
 0x1f9   :  { %v1077_v50 = vmul.f32 %v1075_v34, %v4111_v59 }
 0x1fd   :  { %830 = vrot.lane.b32.xlu1 %v828_v23, %s3497_s22 }
 0x1ff   :  { %986 = vrot.lane.b32.xlu2 %v984_v6, %s3501_s7 }
 0x200   :  { %v542_v38 = vpop.permute.xlu2 %541 }
 0x205   :  { %1001 = vperm.xlu1 %3454, %v3638_v15  }
 0x207   :  { %v496_v32 = vpop.permute.xlu0 %495  ;;  %v506_v27 = vpop.permute.xlu1 %505 }
 0x208   :  { %v645_v41 = vpop.permute.xlu2 %644 }
 0x20d   :  { %929 = vrot.lane.b32.xlu1 %v927_v30, %s3496_s5 }
 0x20f   :  { %v413_v37 = vpop.permute.xlu0 %412  ;;  %v393_v22 = vpop.permute.xlu1 %392 }
 0x210   :  { %v395_v45 = vadd.f32 %v393_v22, %v4049_v2  ;;  %v487_v2 = vmul.f32 %v4007_v49, %v4035_v11 }
 0x215   :  { %976 = vrot.lane.b32.xlu1 %v974_v5, %s3496_s5  ;;  %v725_v5 = vpop.permute.xlu2 %724 }
 0x217   :  { %v800_v7 = vpop.permute.xlu0 %799  ;;  %v403_v62 = vpop.permute.xlu1 %402 }
 0x218   :  { %v405_v40 = vadd.f32 %v403_v62, %v395_v45 }
 0x21a   :  { %v415_v33 = vadd.f32 %v413_v37, %v405_v40 }
 0x21c   :  { %v421_v35 = vadd.f32 %v4025_v20, %v415_v33 }
 0x21d   :  { %1059 = vrot.lane.b32.xlu1 %v1057_v36, %s3496_s5  ;;  %v836_v39 = vpop.permute.xlu2 %835 }
 0x21e   :  { %v431_v51 = vadd.f32 %v429_v13, %v421_v35 }
 0x21f   :  { %v735_v42 = vpop.permute.xlu0 %734  ;;  %v1065_v21 = vpop.permute.xlu1 %1064 }
 0x220   :  { %v441_v52 = vadd.f32 %v439_v43, %v431_v51  ;;  %v1067_v23 = vmul.f32 %v1065_v21, %v4111_v59  ;;  %v626_v51 = vmul.f32 %v4172_v44, %v4037_v47 }
 0x222   :  { %v451_v6 = vadd.f32 %v449_v26, %v441_v52  ;;  %1069 = vrot.lane.b32.xlu2 %v1067_v23, %s3501_s7 }
 0x224   :  { %v488_v30 = vadd.f32 %v487_v2, %v451_v6 }
 0x225   :  { %1079 = vrot.lane.b32.xlu1 %v1077_v50, %s3497_s22 }
 0x226   :  { %v498_v20 = vadd.f32 %v496_v32, %v488_v30 }
 0x227   :  { %v599_v37 = vpop.permute.xlu0 %598  ;;  %v532_v13 = vpop.permute.xlu1 %531 }
 0x228   :  { %v508_v22 = vadd.f32 %v506_v27, %v498_v20 }
 0x22a   :  { %v518_v12 = vadd.f32 %v516_v48, %v508_v22  ;;  %1084 = vperm.xlu2 %3456, %v3638_v15   ;;  %v883_v48 = vpop.permute.xlu2 %882 }
 0x22c   :  { %v524_v43 = vadd.f32 %v4055_v10, %v518_v12 }
 0x22e   :  { %v534_v49 = vadd.f32 %v532_v13, %v524_v43  ;;  %v802_v43 = vmul.f32 %v800_v7, %v4081_v63  ;;  %v2821_v7 = vld [vmem:[%s5075_s12 + $0x10] sm:$0xf] }
 0x22f   :  { %v1091_v11 = vpop.permute.xlu0 %1090  ;;  %v552_v26 = vpop.permute.xlu1 %551 }
 0x230   :  { %v1093_v45 = vmul.f32 %v1091_v11, %v4120_v61  ;;  %v544_v34 = vadd.f32 %v542_v38, %v534_v49 }
 0x232   :  { %v554_v62 = vadd.f32 %v552_v26, %v544_v34  ;;  %1095 = vrot.lane.b32.xlu0 %v1093_v45, %s3496_s5  ;;  %v619_v15 = vpop.permute.xlu2 %618 }
 0x234   :  { %v591_v32 = vadd.f32 %v4058_v14, %v554_v62  ;;  %v838_v62 = vmul.f32 %v836_v39, %v4070_v4  ;;  %v2813_v4 = vld [vmem:[%s5075_s12] sm:$0xf] }
 0x236   :  { %v601_v36 = vadd.f32 %v599_v37, %v591_v32 }
 0x237   :  { %v635_v40 = vpop.permute.xlu1 %634 }
 0x238   :  { %v919_v45 = vpop.permute.xlu0 %918 }
 0x23a   :  { %v761_v23 = vpop.permute.xlu2 %760 }
 0x23f   :  { %v655_v27 = vpop.permute.xlu1 %654 }
 0x242   :  { %v914_v22 = vpop.permute.xlu2 %913 }
 0x247   :  { %v745_v33 = vpop.permute.xlu1 %744 }
 0x24a   :  { %v821_v26 = vpop.permute.xlu2 %820 }
 0x24f   :  { %v609_v10 = vpop.permute.xlu1 %608 }
 0x250   :  { %v611_v35 = vadd.f32 %v609_v10, %v601_v36  ;;  %v2823_v36 = vld [vmem:[%s5075_s12 + $0x18] sm:$0xf0] }
 0x252   :  { %v621_v21 = vadd.f32 %v619_v15, %v611_v35  ;;  %v3202_v15 = vld [vmem:[%s5075_s12 + $0x14] sm:$0xf0] }
 0x253   :  { %v2822_v39 = vor.u32 %v3202_v15, %v2821_v7 }
 0x254   :  { %v627_v52 = vadd.f32 %v626_v51, %v621_v21  ;;  %v921_v21 = vmul.f32 %v919_v45, %v4104_v29 }
 0x255   :  { %1139 = vmatpush.bf16.msrb.mxu3 %v2822_v39 }
 0x256   :  { %v637_v38 = vadd.f32 %v635_v40, %v627_v52  ;;  %v966_v40 = vpop.permute.xlu2 %965 }
 0x257   :  { %v847_v2 = vpop.permute.xlu1 %846 }
 0x258   :  { %v647_v6 = vadd.f32 %v645_v41, %v637_v38 }
 0x25a   :  { %v657_v50 = vadd.f32 %v655_v27, %v647_v6 }
 0x25c   :  { %v717_v14 = vadd.f32 %v4067_v58, %v657_v50 }
 0x25e   :  { %v727_v30 = vadd.f32 %v725_v5, %v717_v14  ;;  %v968_v14 = vmul.f32 %v966_v40, %v4106_v19  ;;  %v3216_v19 = vld [vmem:[%s5073_s10 + $0x64] sm:$0xf0] }
 0x25f   :  { %v904_v20 = vpop.permute.xlu1 %903 }
 0x260   :  { %v737_v13 = vadd.f32 %v735_v42, %v727_v30  ;;  %v885_v42 = vmul.f32 %v883_v48, %v4093_v46  ;;  %v3200_v46 = vld [vmem:[%s5075_s12 + $0x4] sm:$0xf0]  ;;  %v3201_v48 = vld [vmem:[%s5075_s12 + $0x14] sm:$0xf]  ;;  %v3199_v30 = vld [vmem:[%s5075_s12 + $0x4] sm:$0xf] }
 0x261   :  { %v2826_v35 = vor.u32 %v3201_v48, %v2823_v36  ;;  %v2814_v51 = vor.u32 %v3200_v46, %v2813_v4 }
 0x262   :  { %v747_v12 = vadd.f32 %v745_v33, %v737_v13 }
 0x263   :  { %1152 = vmatpush.bf16.msra.mxu0 %v2826_v35  ;;  %1140 = vmatpush.bf16.msrb.mxu3 %v2814_v51  ;;  %v3218_v35 = vld [vmem:[%s5073_s10 + $0x74] sm:$0xf0]  ;;  %v3214_v51 = vld [vmem:[%s5073_s10 + $0x5c] sm:$0xf] }
 0x264   :  { %v753_v37 = vadd.f32 %v4079_v18, %v747_v12  ;;  %v894_v18 = vpop.permute.xlu0 %893 }
 0x266   :  { %v763_v49 = vadd.f32 %v761_v23, %v753_v37  ;;  %v1013_v23 = vpop.permute.xlu2 %1012 }
 0x267   :  { %v811_v47 = vpop.permute.xlu1 %810 }
 0x268   :  { %v803_v44 = vadd.f32 %v802_v43, %v763_v49  ;;  %v2871_v43 = vld [vmem:[%s5073_s10 + $0x48] sm:$0xf] }
 0x26a   :  { %v813_v11 = vadd.f32 %v811_v47, %v803_v44  ;;  %v4244_v47 = vor.u32 %v3216_v19, %v2871_v43  ;;  %v4333_v43 = vld [vmem:[%s5074_s11 + $0x30] sm:$0xff] }
 0x26b   :  { %v4338_v19 = vld [vmem:[%s5074_s11 + $0x70] sm:$0xff] }
 0x26c   :  { %v823_v34 = vadd.f32 %v821_v26, %v813_v11  ;;  %v997_v50 = vpop.permute.xlu0 %996  ;;  %1433 = vmatpush.bf16.msra.mxu3 %v4244_v47 }
 0x26e   :  { %v987_v37 = vpop.permute.xlu2 %986 }
 0x26f   :  { %v831_v41 = vpop.permute.xlu1 %830 }
 0x270   :  { %v833_v58 = vadd.f32 %v831_v41, %v823_v34  ;;  %v2839_v34 = vld [vmem:[%s5073_s10 + $0x8] sm:$0xf] }
 0x271   :  { %v3208_v41 = vld [vmem:[%s5073_s10 + $0x24] sm:$0xf0] }
 0x272   :  { %v839_v5 = vadd.f32 %v838_v62, %v833_v58  ;;  %v3212_v62 = vld [vmem:[%s5073_s10 + $0x4c] sm:$0xf]  ;;  %v4257_v58 = vor.u32 %v3208_v41, %v2839_v34  ;;  %v4392_v34 = vld [vmem:[%s5074_s11 + $0x58] sm:$0xff]  ;;  %v4398_v41 = vld [vmem:[%s5074_s11 + $0xf0] sm:$0xff] }
 0x274   :  { %v849_v32 = vadd.f32 %v847_v2, %v839_v5  ;;  %v1049_v26 = vpop.permute.xlu0 %1048  ;;  %v3204_v5 = vld [vmem:[%s5073_s10 + $0xc] sm:$0xf]  ;;  %1434 = vmatpush.bf16.msra.mxu3 %v4257_v58 }
 0x276   :  { %v886_v27 = vadd.f32 %v885_v42, %v849_v32  ;;  %v2841_v42 = vld [vmem:[%s5073_s10 + $0x28] sm:$0xf0] }
 0x277   :  { %v1002_v33 = vpop.permute.xlu1 %1001 }
 0x278   :  { %v896_v63 = vadd.f32 %v894_v18, %v886_v27  ;;  %v1004_v44 = vmul.f32 %v1002_v33, %v4097_v25  ;;  %v2873_v25 = vld [vmem:[%s5073_s10 + $0x68] sm:$0xf0]  ;;  %v1051_v27 = vmul.f32 %v1049_v26, %v4111_v59  ;;  %v4273_v33 = vor.u32 %v3204_v5, %v2841_v42  ;;  %v2887_v59 = vld [vmem:[%s5073_s10 + $0x58] sm:$0xf]  ;;  %v4375_v26 = vld [vmem:[%s5074_s11 + $0x60] sm:$0xff] }
 0x279   :  { %v4268_v40 = vor.u32 %v3212_v62, %v2873_v25  ;;  %v4403_v62 = vld [vmem:[%s5074_s11 + $0xb8] sm:$0xff]  ;;  %v4409_v25 = vld [vmem:[%s5074_s11 + $0xb0] sm:$0xff] }
 0x27a   :  { %v906_v10 = vadd.f32 %v904_v20, %v896_v63  ;;  %v2815_v20 = vld [vmem:[%s5075_s12 + $0x8] sm:$0xf0]  ;;  %v4416_v5 = vld [vmem:[%s5074_s11 + $0x10] sm:$0xff] }
 0x27b   :  { %v2818_v29 = vor.u32 %v3199_v30, %v2815_v20  ;;  %v2857_v30 = vld [vmem:[%s5073_s10 + $0x38] sm:$0xf0]  ;;  %v4421_v42 = vld [vmem:[%s5074_s11 + $0x50] sm:$0xff] }
 0x27c   :  { %v916_v52 = vadd.f32 %v914_v22, %v906_v10  ;;  %v1070_v7 = vpop.permute.xlu2 %1069 }
 0x27d   :  { %1153 = vmatpush.bf16.msra.mxu0 %v2818_v29  ;;  %v4320_v29 = vld [vmem:[%s5074_s11 + $0x78] sm:$0xff] }
 0x27e   :  { %v922_v38 = vadd.f32 %v921_v21, %v916_v52  ;;  %v2889_v21 = vld [vmem:[%s5073_s10 + $0x78] sm:$0xf0]  ;;  %1919 = vmatpush.bf16.msra.mxu2 %v4320_v29 }
 0x27f   :  { %v930_v2 = vpop.permute.xlu1 %929 }
 0x280   :  { %v932_v6 = vadd.f32 %v930_v2, %v922_v38 }
 0x281   :  { %1446 = vmatpush.bf16.msrb.mxu0 %v4268_v40 }
 0x282   :  { %v969_v13 = vadd.f32 %v968_v14, %v932_v6  ;;  %v2855_v6 = vld [vmem:[%s5073_s10 + $0x18] sm:$0xf]  ;;  %v3206_v14 = vld [vmem:[%s5073_s10 + $0x1c] sm:$0xf]  ;;  %1920 = vmatpush.bf16.msra.mxu2 %v4338_v19 }
 0x284   :  { %v1085_v46 = vpop.permute.xlu2 %1084 }
 0x285   :  { %1447 = vmatpush.bf16.msrb.mxu0 %v4273_v33  ;;  %v1087_v36 = vmul.f32 %v1085_v46, %v4120_v61  ;;  %v4289_v61 = vor.u32 %v3218_v35, %v2887_v59  ;;  %v4474_v46 = vld [vmem:[%s5074_s11 + $0x178] sm:$0xff]  ;;  %v4507_v35 = vld [vmem:[%s5074_s11 + $0x128] sm:$0xff] }
 0x286   :  { %5175 = vst [vmem:[#allocation10_spill] sm:$0xff] %v4474_v46  ;;  %v4496_v59 = vld [vmem:[%s5074_s11 + $0xd8] sm:$0xff] }
 0x287   :  { %v977_v22 = vpop.permute.xlu1 %976 }
 0x288   :  { %v979_v12 = vadd.f32 %v977_v22, %v969_v13  ;;  %v4315_v13 = vld [vmem:[%s5074_s11 + $0x38] sm:$0xff] }
 0x289   :  { %1906 = vmatpush.bf16.msra.mxu1 %v4315_v13 }
 0x28a   :  { %v989_v49 = vadd.f32 %v987_v37, %v979_v12  ;;  %v4326_v37 = vor.u32 %v3206_v14, %v2857_v30  ;;  %v4550_v14 = vld [vmem:[%s5074_s11 + $0x90] sm:$0xff]  ;;  %v4555_v30 = vld [vmem:[%s5074_s11 + $0x118] sm:$0xff] }
 0x28b   :  { %5184 = vst [vmem:[#allocation19_spill] sm:$0xff] %v4550_v14 }
 0x28c   :  { %v999_v11 = vadd.f32 %v997_v50, %v989_v49  ;;  %v3210_v50 = vld [vmem:[%s5073_s10 + $0x34] sm:$0xf0]  ;;  %v4349_v49 = vld [vmem:[%s5074_s11 + $0x28] sm:$0xff]  ;;  %5185 = vst [vmem:[#allocation20_spill] sm:$0xff] %v4555_v30 }
 0x28d   :  { %v4323_v22 = vor.u32 %v3210_v50, %v2855_v6  ;;  %1907 = vmatpush.bf16.msra.mxu1 %v4333_v43  ;;  %v4536_v6 = vld [vmem:[%s5074_s11 + $0x160] sm:$0xff]  ;;  %v4542_v50 = vld [vmem:[%s5074_s11 + $0xc8] sm:$0xff] }
 0x28e   :  { %v1005_v45 = vadd.f32 %v1004_v44, %v999_v11  ;;  %v4355_v44 = vld [vmem:[%s5074_s11 + $0x68] sm:$0xff]  ;;  %v4370_v11 = vld [vmem:[%s5074_s11 + $0x20] sm:$0xff]  ;;  %5182 = vst [vmem:[#allocation17_spill] sm:$0xff] %v4536_v6 }
 0x28f   :  { %v1060_v18 = vpop.permute.xlu1 %1059  ;;  %1921 = vmatpush.bf16.msra.mxu2 %v4355_v44  ;;  %5183 = vst [vmem:[#allocation18_spill] sm:$0xff] %v4542_v50 }
 0x290   :  { %v1015_v32 = vadd.f32 %v1013_v23, %v1005_v45  ;;  %v4291_v23 = vor.u32 %v3214_v51, %v2889_v21  ;;  %v4380_v45 = vld [vmem:[%s5074_s11 + $0xf8] sm:$0xff]  ;;  %v4512_v51 = vld [vmem:[%s5074_s11 + $0x168] sm:$0xff]  ;;  %v4518_v21 = vld [vmem:[%s5074_s11 + $0xd0] sm:$0xff] }
 0x291   :  { %1908 = vmatpush.bf16.msra.mxu1 %v4349_v49  ;;  %5178 = vst [vmem:[#allocation13_spill] sm:$0xff] %v4512_v51 }
 0x292   :  { %v1052_v63 = vadd.f32 %v1051_v27, %v1015_v32  ;;  %v4427_v32 = vld [vmem:[%s5074_s11 + $0xe8] sm:$0xff]  ;;  %5179 = vst [vmem:[#allocation14_spill] sm:$0xff] %v4518_v21 }
 0x293   :  { %1922 = vmatpush.bf16.msra.mxu2 %v4375_v26  ;;  %v4433_v27 = vld [vmem:[%s5074_s11 + $0xa8] sm:$0xff] }
 0x294   :  { %v1062_v15 = vadd.f32 %v1060_v18, %v1052_v63  ;;  %5173 = vst [vmem:[#allocation8_spill] sm:$0xff] %v4433_v27  ;;  %v4440_v18 = vld [vmem:[%s5074_s11 + $0x8] sm:$0xff] }
 0x295   :  { %1909 = vmatpush.bf16.msra.mxu1 %v4370_v11  ;;  %v4445_v63 = vld [vmem:[%s5074_s11 + $0x48] sm:$0xff] }
 0x296   :  { %v1072_v4 = vadd.f32 %v1070_v7, %v1062_v15  ;;  %v4451_v7 = vld [vmem:[%s5074_s11 + $0xe0] sm:$0xff] }
 0x297   :  { %v1080_v39 = vpop.permute.xlu1 %1079  ;;  %1923 = vmatpush.bf16.msra.mxu2 %v4392_v34  ;;  %v4459_v15 = vld [vmem:[%s5074_s11] sm:$0xff] }
 0x298   :  { %v1082_v48 = vadd.f32 %v1080_v39, %v1072_v4  ;;  %v4464_v4 = vld [vmem:[%s5074_s11 + $0x40] sm:$0xff]  ;;  %v4469_v39 = vld [vmem:[%s5074_s11 + $0x138] sm:$0xff] }
 0x299   :  { %5174 = vst [vmem:[#allocation9_spill] sm:$0xff] %v4464_v4 }
 0x29a   :  { %v1088_v10 = vadd.f32 %v1087_v36, %v1082_v48  ;;  %v4484_v48 = vld [vmem:[%s5074_s11 + $0x130] sm:$0xff] }
 0x29b   :  { %1924 = vmatpush.bf16.msra.mxu2 %v4421_v42  ;;  %v4489_v36 = vld [vmem:[%s5074_s11 + $0x170] sm:$0xff] }
 0x29c   :  { %5176 = vst [vmem:[#allocation11_spill] sm:$0xff] %v4489_v36 }
 0x29f   :  { %1925 = vmatpush.bf16.msra.mxu2 %v4445_v63 }
 0x2a3   :  { %1926 = vmatpush.bf16.msra.mxu2 %v4464_v4 }
 0x2a4   :  { %v1096_v52 = vpop.permute.xlu0 %1095 }
 0x2a5   :  { %v1098_v38 = vadd.f32 %v1096_v52, %v1088_v10  ;;  %v4502_v10 = vld [vmem:[%s5074_s11 + $0xa0] sm:$0xff]  ;;  %v4526_v52 = vld [vmem:[%s5074_s11 + $0x98] sm:$0xff] }
 0x2a6   :  { %5177 = vst [vmem:[#allocation12_spill] sm:$0xff] %v4502_v10 }
 0x2a7   :  { %v4293_v2 = vpack.c.bf16 %v1098_v38, %v1098_v38  ;;  %1971 = vmatpush.bf16.msrb.mxu2 %v4474_v46  ;;  %5180 = vst [vmem:[#allocation15_spill] sm:$0xff] %v4526_v52  ;;  %v4531_v38 = vld [vmem:[%s5074_s11 + $0x120] sm:$0xff] }
 0x2a8   :  { %5181 = vst [vmem:[#allocation16_spill] sm:$0xff] %v4531_v38 }
 0x2a9   :  { %2827 = vmatmul.msk.bf16.vlgmr.msrb.gmra.mxu3 %vm73_vm1, %v4293_v2  ;;  %2828 = vmatmul.msk.bf16.vlgmr.msra.gmra.mxu0 %vm73_vm1, %v4293_v2  ;;  %v1160_v20 = vunpack.c.l.b16 %v4293_v2 }
 0x2aa   :  { %1485 = vmatpush.bf16.msrb.mxu3 %v4289_v61  ;;  %1498 = vmatpush.bf16.msra.mxu0 %v4291_v23 }
 0x2ab   :  { %v1161_v12 = vpack.c.b16 %v1160_v20, %v1160_v20  ;;  %1972 = vmatpush.bf16.msrb.mxu2 %v4489_v36  ;;  %v4560_v20 = vld [vmem:[%s5074_s11 + $0x158] sm:$0xff] }
 0x2ac   :  { %5186 = vst [vmem:[#allocation21_spill] sm:$0xff] %v4560_v20 }
 0x2ad   :  { %1166 = vrot.lane.b32.xlu0 %v1161_v12, %s3496_s5  ;;  %1164 = vrot.lane.b32.xlu2 %v1161_v12, %s3501_s7 }
 0x2ae   :  { %1162 = vrot.lane.b32.xlu1 %v1161_v12, %s3497_s22  ;;  %1486 = vmatpush.bf16.msrb.mxu3 %v4323_v22  ;;  %v4565_v12 = vld [vmem:[%s5074_s11 + $0xc0] sm:$0xff] }
 0x2af   :  { %1499 = vmatpush.bf16.msra.mxu0 %v4326_v37  ;;  %1973 = vmatpush.bf16.msrb.mxu2 %v4512_v51  ;;  %5187 = vst [vmem:[#allocation22_spill] sm:$0xff] %v4565_v12 }
 0x2b3   :  { %1974 = vmatpush.bf16.msrb.mxu2 %v4536_v6  ;;  %v4613_v6 = vld [vmem:[%s5074_s11 + $0x148] sm:$0xff] }
 0x2b4   :  { %5195 = vst [vmem:[#allocation30_spill] sm:$0xff] %v4613_v6 }
 0x2b7   :  { %1975 = vmatpush.bf16.msrb.mxu2 %v4560_v20  ;;  %v4590_v20 = vld [vmem:[%s5074_s11 + $0x150] sm:$0xff] }
 0x2b8   :  { %5191 = vst [vmem:[#allocation26_spill] sm:$0xff] %v4590_v20 }
 0x2b9   :  { %2895 = vmatmul.msk.bf16.vlgmr.msra.gmra.mxu3 %vm73_vm1, %v3717_v55  ;;  %2896 = vmatmul.msk.bf16.vlgmr.msrb.gmra.mxu0 %vm73_vm1, %v3717_v55 }
 0x2ba   :  { %1945 = vmatpush.bf16.msrb.mxu0 %v4380_v45  ;;  %1932 = vmatpush.bf16.msra.mxu3 %v4403_v62 }
 0x2bb   :  { %1976 = vmatpush.bf16.msrb.mxu2 %v4590_v20  ;;  %v4627_v20 = vld [vmem:[%s5074_s11 + $0x1e8] sm:$0xff] }
 0x2bc   :  { %5197 = vst [vmem:[#allocation32_spill] sm:$0xff] %v4627_v20 }
 0x2be   :  { %1946 = vmatpush.bf16.msrb.mxu0 %v4398_v41  ;;  %1933 = vmatpush.bf16.msra.mxu3 %v4409_v25 }
 0x2bf   :  { %1977 = vmatpush.bf16.msrb.mxu2 %v4613_v6  ;;  %v4644_v6 = vld [vmem:[%s5074_s11 + $0x1b0] sm:$0xff] }
 0x2c0   :  { %5200 = vst [vmem:[#allocation35_spill] sm:$0xff] %v4644_v6 }
 0x2c2   :  { %1947 = vmatpush.bf16.msrb.mxu0 %v4427_v32  ;;  %1934 = vmatpush.bf16.msra.mxu3 %v4433_v27 }
 0x2c6   :  { %1948 = vmatpush.bf16.msrb.mxu0 %v4451_v7  ;;  %1935 = vmatpush.bf16.msra.mxu3 %v4502_v10 }
 0x2c9   :  { %2899 = vmatmul.msk.bf16.vlgmr.msrb.gmra.mxu3 %vm73_vm1, %v3717_v55  ;;  %2900 = vmatmul.msk.bf16.vlgmr.msra.gmra.mxu0 %vm73_vm1, %v3717_v55  ;;  %v4387_v55 = vld [vmem:[%s5074_s11 + $0x18] sm:$0xff] }
 0x2ca   :  { %1910 = vmatpush.bf16.msra.mxu1 %v4387_v55  ;;  %1949 = vmatpush.bf16.msrb.mxu0 %v4496_v59 }
 0x2cb   :  { %1936 = vmatpush.bf16.msra.mxu3 %v4526_v52 }
 0x2ce   :  { %1911 = vmatpush.bf16.msra.mxu1 %v4416_v5  ;;  %1950 = vmatpush.bf16.msrb.mxu0 %v4518_v21 }
 0x2cf   :  { %1937 = vmatpush.bf16.msra.mxu3 %v4550_v14  ;;  %v4608_v14 = vld [vmem:[%s5074_s11 + $0x108] sm:$0xff] }
 0x2d0   :  { %5194 = vst [vmem:[#allocation29_spill] sm:$0xff] %v4608_v14 }
 0x2d2   :  { %1912 = vmatpush.bf16.msra.mxu1 %v4440_v18  ;;  %1951 = vmatpush.bf16.msrb.mxu0 %v4542_v50 }
 0x2d3   :  { %1938 = vmatpush.bf16.msra.mxu3 %v4579_v9  ;;  %v4618_v9 = vld [vmem:[%s5074_s11 + $0x1b8] sm:$0xff] }
 0x2d4   :  { %5196 = vst [vmem:[#allocation31_spill] sm:$0xff] %v4618_v9 }
 0x2d6   :  { %1913 = vmatpush.bf16.msra.mxu1 %v4459_v15  ;;  %1952 = vmatpush.bf16.msrb.mxu0 %v4565_v12  ;;  %v4595_v12 = vld [vmem:[%s5074_s11 + $0x1f0] sm:$0xff] }
 0x2d7   :  { %5192 = vst [vmem:[#allocation27_spill] sm:$0xff] %v4595_v12 }
 0x2da   :  { %1958 = vmatpush.bf16.msrb.mxu1 %v4469_v39  ;;  %1997 = vmatpush.bf16.msra.mxu0 %v4573_v57  ;;  %v4601_v57 = vld [vmem:[%s5074_s11 + $0x80] sm:$0xff] }
 0x2db   :  { %5193 = vst [vmem:[#allocation28_spill] sm:$0xff] %v4601_v57  ;;  %1939 = vmatpush.bf16.msra.mxu3 %v4601_v57  ;;  %v1104_v57 = vld [vmem:[%s5076_s13] sm:$0x3] }
 0x2dc   :  { %v1107_v51 = vperm.slane %v1104_v57, 1 }
 0x2de   :  { %1959 = vmatpush.bf16.msrb.mxu1 %v4484_v48  ;;  %1998 = vmatpush.bf16.msra.mxu0 %v4595_v12  ;;  %v4686_v12 = vld [vmem:[%s5074_s11 + $0x198] sm:$0xff] }
 0x2df   :  { %1984 = vmatpush.bf16.msrb.mxu3 %v4618_v9  ;;  %v4658_v9 = vld [vmem:[%s5074_s11 + $0x1a8] sm:$0xff]  ;;  %5206 = vst [vmem:[#allocation41_spill] sm:$0xff] %v4686_v12 }
 0x2e0   :  { %5202 = vst [vmem:[#allocation37_spill] sm:$0xff] %v4658_v9 }
 0x2e2   :  { %1960 = vmatpush.bf16.msrb.mxu1 %v4507_v35  ;;  %1999 = vmatpush.bf16.msra.mxu0 %v4627_v20  ;;  %v4651_v20 = vld [vmem:[%s5074_s11 + $0x1e0] sm:$0xff] }
 0x2e3   :  { %5201 = vst [vmem:[#allocation36_spill] sm:$0xff] %v4651_v20  ;;  %1985 = vmatpush.bf16.msrb.mxu3 %v4644_v6 }
 0x2e6   :  { %1961 = vmatpush.bf16.msrb.mxu1 %v4531_v38  ;;  %2000 = vmatpush.bf16.msra.mxu0 %v4651_v20  ;;  %v4675_v20 = vld [vmem:[%s5074_s11 + $0x1d0] sm:$0xff] }
 0x2e7   :  { %1986 = vmatpush.bf16.msrb.mxu3 %v4658_v9  ;;  %5205 = vst [vmem:[#allocation40_spill] sm:$0xff] %v4675_v20 }
 0x2ea   :  { %1962 = vmatpush.bf16.msrb.mxu1 %v4555_v30  ;;  %v4585_v30 = vld [vmem:[%s5074_s11 + $0x110] sm:$0xff] }
 0x2eb   :  { %5190 = vst [vmem:[#allocation25_spill] sm:$0xff] %v4585_v30 }
 0x2ee   :  { %1963 = vmatpush.bf16.msrb.mxu1 %v4585_v30  ;;  %v4634_v30 = vld [vmem:[%s5074_s11 + $0x100] sm:$0xff] }
 0x2ef   :  { %5198 = vst [vmem:[#allocation33_spill] sm:$0xff] %v4634_v30 }
 0x2f2   :  { %1964 = vmatpush.bf16.msrb.mxu1 %v4608_v14  ;;  %v4639_v14 = vld [vmem:[%s5074_s11 + $0x140] sm:$0xff] }
 0x2f3   :  { %5199 = vst [vmem:[#allocation34_spill] sm:$0xff] %v4639_v14  ;;  %1978 = vmatpush.bf16.msrb.mxu2 %v4639_v14  ;;  %v4670_v14 = vld [vmem:[%s5074_s11 + $0x1a0] sm:$0xff] }
 0x2f4   :  { %5204 = vst [vmem:[#allocation39_spill] sm:$0xff] %v4670_v14  ;;  %1987 = vmatpush.bf16.msrb.mxu3 %v4670_v14 }
 0x2f6   :  { %1965 = vmatpush.bf16.msrb.mxu1 %v4634_v30  ;;  %v4663_v30 = vld [vmem:[%s5074_s11 + $0x1d8] sm:$0xff] }
 0x2f7   :  { %5203 = vst [vmem:[#allocation38_spill] sm:$0xff] %v4663_v30  ;;  %2001 = vmatpush.bf16.msra.mxu0 %v4663_v30 }
 0x2f8   :  { %1988 = vmatpush.bf16.msrb.mxu3 %v4686_v12  ;;  %v4712_v12 = vld [vmem:[%s5074_s11 + $0x1c0] sm:$0xff] }
 0x2f9   :  { %5209 = vst [vmem:[#allocation44_spill] sm:$0xff] %v4712_v12 }
 0x2fb   :  { %2002 = vmatpush.bf16.msra.mxu0 %v4675_v20 }
 0x307   :  { %v1165_v9 = vpop.permute.xlu2 %1164 }
 0x31f   :  { %v1167_v50 = vpop.permute.xlu0 %1166 }
 0x320   :  { %v1163_v6 = vpop.permute.xlu1 %1162 }
 0x321   :  { %v1169_v30 = vsel %vm73_vm1, %v4293_v2, %v1163_v6  ;;  %v4696_v2 = vld [vmem:[%s5074_s11 + $0x1c8] sm:$0xff] }
 0x322   :  { %v1172_v38 = vsel %vm1170_vm3, %v1169_v30, %v1165_v9  ;;  %5207 = vst [vmem:[#allocation42_spill] sm:$0xff] %v4696_v2  ;;  %2003 = vmatpush.bf16.msra.mxu0 %v4696_v2 }
 0x323   :  { %v1175_v52 = vsel %vm1173_vm4, %v1172_v38, %v1167_v50 }
 0x324   :  { %v4691_v21 = vunpack.c.l.bf16 %v1175_v52  ;;  %v4707_v52 = vld [vmem:[%s5074_s11 + $0x190] sm:$0xff] }
 0x325   :  { %5208 = vst [vmem:[#allocation43_spill] sm:$0xff] %v4707_v52  ;;  %1989 = vmatpush.bf16.msrb.mxu3 %v4707_v52 }
 0x326   :  { %v1506_v6 = vmul.f32 %v4691_v21, %v4135_v24  ;;  %v1507_v9 = vmul.f32 %v4691_v21, %v4143_v0  ;;  %v1155_v30 = vpop.f32.mrf.mxu0  ;;  %v1106_v24 = vperm.slane %v1104_v57, 0  ;;  %v4718_v0 = vld [vmem:[%s5074_s11 + $0x188] sm:$0xff]  ;;  %2004 = vmatpush.bf16.msra.mxu0 %v4712_v12 }
 0x327   :  { %v1156_v38 = vadd.f32 %v1155_v30, %v1107_v51  ;;  %5210 = vst [vmem:[#allocation45_spill] sm:$0xff] %v4718_v0  ;;  %v1511_v30 = vmul.f32 %v4691_v21, %v4161_v8 }
 0x328   :  { %v1514_v50 = vpack.c.bf16 %v1506_v6, %v1506_v6  ;;  %v1515_v20 = vpack.c.bf16 %v1507_v9, %v1507_v9  ;;  %v1510_v9 = vmul.f32 %v4691_v21, %v4153_v60 }
 0x329   :  { %2699 = vst [vmem:[#allocation2 + $0x8] sm:$0xff] %v1156_v38  ;;  %1990 = vmatpush.bf16.msrb.mxu3 %v4718_v0 }
 0x32a   :  { %1914 = vmatmul.bf16.vlgmr.msra.gmra.mxu1 %v1514_v50  ;;  %1927 = vmatmul.bf16.vlgmr.msra.gmra.mxu2 %v1515_v20  ;;  %v4729_v20 = vld [vmem:[%s5074_s11 + $0x180] sm:$0xff]  ;;  %s3520_s11 = smov [#allocation2]  }
 0x32b   :  { %2016 = vmatpush.bf16.msra.mxu1 %v3930_v53  ;;  %2029 = vmatpush.bf16.msra.mxu2 %v3932_v54  ;;  %5212 = vst [vmem:[#allocation47_spill] sm:$0xff] %v4729_v20 }
 0x32c   :  { %v1142_v51 = vpop.f32.mrf.mxu3 }
 0x32d   :  { %v4723_v6 = vadd.f32 %v1142_v51, %v1106_v24  ;;  %1991 = vmatpush.bf16.msrb.mxu3 %v4729_v20  ;;  %v1518_v51 = vpack.c.bf16 %v1510_v9, %v1510_v9 }
 0x32e   :  { %v1157_v57 = vpop.f32.mrf.mxu0 }
 0x32f   :  { %5211 = vst [vmem:[#allocation46_spill] sm:$0xff] %v4723_v6  ;;  %2017 = vmatpush.bf16.msra.mxu1 %v3950_v1  ;;  %2030 = vmatpush.bf16.msra.mxu2 %v3952_v3  ;;  %v1519_v57 = vpack.c.bf16 %v1511_v30, %v1511_v30 }
 0x334   :  { %v1144_v38 = vpop.f32.mrf.mxu3 }
 0x336   :  { %v1449_v50 = vpop.f32.mrf.mxu0 }
 0x337   :  { %v1509_v24 = vmul.f32 %v4691_v21, %v1449_v50 }
 0x339   :  { %v1517_v6 = vpack.c.bf16 %v1509_v24, %v1509_v24 }
 0x33a   :  { %1966 = vmatmul.bf16.vlgmr.msrb.gmra.mxu1 %v1518_v51  ;;  %1979 = vmatmul.bf16.vlgmr.msrb.gmra.mxu2 %v1519_v57 }
 0x33b   :  { %1953 = vmatmul.bf16.vlgmr.msrb.gmra.mxu0 %v1517_v6  ;;  %2068 = vmatpush.bf16.msrb.mxu1 %v3971_v16 }
 0x33c   :  { %v1436_v3 = vpop.f32.mrf.mxu3  ;;  %2081 = vmatpush.bf16.msrb.mxu2 %v3973_v17  ;;  %2055 = vmatpush.bf16.msrb.mxu0 %v4268_v40 }
 0x33d   :  { %v1508_v60 = vmul.f32 %v4691_v21, %v1436_v3 }
 0x33e   :  { %v1451_v8 = vpop.f32.mrf.mxu0 }
 0x33f   :  { %v1516_v38 = vpack.c.bf16 %v1508_v60, %v1508_v60  ;;  %2069 = vmatpush.bf16.msrb.mxu1 %v3991_v28  ;;  %v5213_v8 = vld [vmem:[#allocation14_spill] sm:$0xff] }
 0x340   :  { %2082 = vmatpush.bf16.msrb.mxu2 %v3993_v31  ;;  %2056 = vmatpush.bf16.msrb.mxu0 %v4273_v33 }
 0x341   :  { %1940 = vmatmul.bf16.vlgmr.msra.gmra.mxu3 %v1516_v38  ;;  %v5214_v38 = vld [vmem:[#allocation13_spill] sm:$0xff] }
 0x342   :  { %2042 = vmatpush.bf16.msra.mxu3 %v4244_v47 }
 0x344   :  { %v1438_v6 = vpop.f32.mrf.mxu3 }
 0x345   :  { %v5215_v6 = vld [vmem:[#allocation15_spill] sm:$0xff] }
 0x346   :  { %v1501_v9 = vpop.f32.mrf.mxu0  ;;  %2043 = vmatpush.bf16.msra.mxu3 %v4257_v58 }
 0x347   :  { %v1513_v30 = vmul.f32 %v4691_v21, %v1501_v9  ;;  %v5216_v9 = vld [vmem:[#allocation16_spill] sm:$0xff] }
 0x349   :  { %v1521_v50 = vpack.c.bf16 %v1513_v30, %v1513_v30  ;;  %v5217_v30 = vld [vmem:[#allocation18_spill] sm:$0xff] }
 0x34a   :  { %3157 = vmatmul.msk.bf16.vlgmr.msra.gmra.mxu1 %vm73_vm1, %v3834_v56  ;;  %3158 = vmatmul.msk.bf16.vlgmr.msra.gmra.mxu2 %vm73_vm1, %v3834_v56 }
 0x34b   :  { %2005 = vmatmul.bf16.vlgmr.msra.gmra.mxu0 %v1521_v50  ;;  %2130 = vmatpush.bf16.msra.mxu1 %v4315_v13  ;;  %v5218_v50 = vld [vmem:[#allocation17_spill] sm:$0xff] }
 0x34c   :  { %v1488_v3 = vpop.f32.mrf.mxu3  ;;  %2107 = vmatpush.bf16.msra.mxu0 %v4291_v23  ;;  %2143 = vmatpush.bf16.msra.mxu2 %v4320_v29 }
 0x34d   :  { %v1512_v24 = vmul.f32 %v4691_v21, %v1488_v3  ;;  %v5219_v3 = vld [vmem:[#allocation19_spill] sm:$0xff] }
 0x34e   :  { %v1503_v51 = vpop.f32.mrf.mxu0 }
 0x34f   :  { %v1520_v57 = vpack.c.bf16 %v1512_v24, %v1512_v24  ;;  %2131 = vmatpush.bf16.msra.mxu1 %v4333_v43  ;;  %v5220_v24 = vld [vmem:[#allocation20_spill] sm:$0xff]  ;;  %v5221_v51 = vld [vmem:[#allocation22_spill] sm:$0xff] }
 0x350   :  { %2108 = vmatpush.bf16.msra.mxu0 %v4326_v37  ;;  %2144 = vmatpush.bf16.msra.mxu2 %v4338_v19 }
 0x351   :  { %1992 = vmatmul.bf16.vlgmr.msrb.gmra.mxu3 %v1520_v57  ;;  %v5222_v57 = vld [vmem:[#allocation23_spill] sm:$0xff] }
 0x352   :  { %2094 = vmatpush.bf16.msrb.mxu3 %v4289_v61 }
 0x353   :  { %2132 = vmatpush.bf16.msra.mxu1 %v4349_v49 }
 0x354   :  { %v1490_v60 = vpop.f32.mrf.mxu3  ;;  %2145 = vmatpush.bf16.msra.mxu2 %v4355_v44 }
 0x355   :  { %v5223_v60 = vld [vmem:[#allocation21_spill] sm:$0xff] }
 0x356   :  { %2095 = vmatpush.bf16.msrb.mxu3 %v4323_v22 }
 0x357   :  { %2133 = vmatpush.bf16.msra.mxu1 %v4370_v11 }
 0x358   :  { %2146 = vmatpush.bf16.msra.mxu2 %v4375_v26 }
 0x35a   :  { %3161 = vmatmul.msk.bf16.vlgmr.msrb.gmra.mxu1 %vm73_vm1, %v3834_v56  ;;  %3162 = vmatmul.msk.bf16.vlgmr.msrb.gmra.mxu2 %vm73_vm1, %v3834_v56 }
 0x35b   :  { %3160 = vmatmul.msk.bf16.vlgmr.msrb.gmra.mxu0 %vm73_vm1, %v3834_v56  ;;  %2134 = vmatpush.bf16.msra.mxu1 %v4387_v55 }
 0x35c   :  { %2169 = vmatpush.bf16.msrb.mxu0 %v4380_v45  ;;  %2147 = vmatpush.bf16.msra.mxu2 %v4392_v34 }
 0x35f   :  { %2135 = vmatpush.bf16.msra.mxu1 %v4416_v5 }
 0x360   :  { %2170 = vmatpush.bf16.msrb.mxu0 %v4398_v41  ;;  %2148 = vmatpush.bf16.msra.mxu2 %v4421_v42 }
 0x361   :  { %3159 = vmatmul.msk.bf16.vlgmr.msra.gmra.mxu3 %vm73_vm1, %v3834_v56 }
 0x362   :  { %2156 = vmatpush.bf16.msra.mxu3 %v4403_v62 }
 0x363   :  { %2136 = vmatpush.bf16.msra.mxu1 %v4440_v18 }
 0x364   :  { %2171 = vmatpush.bf16.msrb.mxu0 %v4427_v32  ;;  %2149 = vmatpush.bf16.msra.mxu2 %v4445_v63 }
 0x366   :  { %2157 = vmatpush.bf16.msra.mxu3 %v4409_v25 }
 0x367   :  { %2137 = vmatpush.bf16.msra.mxu1 %v4459_v15 }
 0x368   :  { %2172 = vmatpush.bf16.msrb.mxu0 %v4451_v7  ;;  %2150 = vmatpush.bf16.msra.mxu2 %v4464_v4 }
 0x36a   :  { %2158 = vmatpush.bf16.msra.mxu3 %v4433_v27 }
 0x36b   :  { %2182 = vmatpush.bf16.msrb.mxu1 %v4469_v39  ;;  %3164 = vmatmul.msk.bf16.vlgmr.msra.gmra.mxu0 %vm73_vm1, %v3834_v56 }
 0x36c   :  { %2195 = vmatpush.bf16.msrb.mxu2 %v4474_v46  ;;  %2173 = vmatpush.bf16.msrb.mxu0 %v4496_v59 }
 0x36e   :  { %2159 = vmatpush.bf16.msra.mxu3 %v4502_v10  ;;  %v5227_v10 = vld [vmem:[#allocation26_spill] sm:$0xff] }
 0x36f   :  { %2183 = vmatpush.bf16.msrb.mxu1 %v4484_v48 }
 0x370   :  { %2196 = vmatpush.bf16.msrb.mxu2 %v4489_v36  ;;  %2174 = vmatpush.bf16.msrb.mxu0 %v5213_v8 }
 0x371   :  { %3163 = vmatmul.msk.bf16.vlgmr.msrb.gmra.mxu3 %vm73_vm1, %v3834_v56  ;;  %v5224_v56 = vld [vmem:[#allocation24_spill] sm:$0xff] }
 0x372   :  { %2160 = vmatpush.bf16.msra.mxu3 %v5215_v6  ;;  %v5226_v6 = vld [vmem:[#allocation27_spill] sm:$0xff] }
 0x373   :  { %2184 = vmatpush.bf16.msrb.mxu1 %v4507_v35 }
 0x374   :  { %2197 = vmatpush.bf16.msrb.mxu2 %v5214_v38  ;;  %2175 = vmatpush.bf16.msrb.mxu0 %v5217_v30  ;;  %v5225_v38 = vld [vmem:[#allocation25_spill] sm:$0xff]  ;;  %v5228_v30 = vld [vmem:[#allocation28_spill] sm:$0xff] }
 0x376   :  { %2161 = vmatpush.bf16.msra.mxu3 %v5219_v3  ;;  %v5230_v3 = vld [vmem:[#allocation29_spill] sm:$0xff] }
 0x377   :  { %2185 = vmatpush.bf16.msrb.mxu1 %v5216_v9 }
 0x378   :  { %2198 = vmatpush.bf16.msrb.mxu2 %v5218_v50  ;;  %2176 = vmatpush.bf16.msrb.mxu0 %v5221_v51  ;;  %v5229_v50 = vld [vmem:[#allocation31_spill] sm:$0xff]  ;;  %v5232_v51 = vld [vmem:[#allocation30_spill] sm:$0xff] }
 0x37a   :  { %2162 = vmatpush.bf16.msra.mxu3 %v5224_v56  ;;  %v5235_v56 = vld [vmem:[#allocation36_spill] sm:$0xff] }
 0x37b   :  { %2186 = vmatpush.bf16.msrb.mxu1 %v5220_v24  ;;  %v5231_v24 = vld [vmem:[#allocation32_spill] sm:$0xff] }
 0x37c   :  { %2221 = vmatpush.bf16.msra.mxu0 %v5222_v57  ;;  %2199 = vmatpush.bf16.msrb.mxu2 %v5223_v60  ;;  %v5233_v57 = vld [vmem:[#allocation35_spill] sm:$0xff]  ;;  %v5234_v60 = vld [vmem:[#allocation33_spill] sm:$0xff] }
 0x37e   :  { %2163 = vmatpush.bf16.msra.mxu3 %v5228_v30  ;;  %v5240_v30 = vld [vmem:[#allocation41_spill] sm:$0xff] }
 0x37f   :  { %2187 = vmatpush.bf16.msrb.mxu1 %v5225_v38  ;;  %v5236_v38 = vld [vmem:[#allocation34_spill] sm:$0xff] }
 0x380   :  { %2222 = vmatpush.bf16.msra.mxu0 %v5226_v6  ;;  %2200 = vmatpush.bf16.msrb.mxu2 %v5227_v10  ;;  %v5237_v6 = vld [vmem:[#allocation37_spill] sm:$0xff]  ;;  %v5238_v10 = vld [vmem:[#allocation38_spill] sm:$0xff] }
 0x382   :  { %2208 = vmatpush.bf16.msrb.mxu3 %v5229_v50  ;;  %v5239_v50 = vld [vmem:[#allocation40_spill] sm:$0xff] }
 0x383   :  { %2188 = vmatpush.bf16.msrb.mxu1 %v5230_v3 }
 0x384   :  { %2223 = vmatpush.bf16.msra.mxu0 %v5231_v24  ;;  %2201 = vmatpush.bf16.msrb.mxu2 %v5232_v51 }
 0x386   :  { %2209 = vmatpush.bf16.msrb.mxu3 %v5233_v57 }
 0x387   :  { %2189 = vmatpush.bf16.msrb.mxu1 %v5234_v60 }
 0x388   :  { %2224 = vmatpush.bf16.msra.mxu0 %v5235_v56  ;;  %2202 = vmatpush.bf16.msrb.mxu2 %v5236_v38 }
 0x38a   :  { %2210 = vmatpush.bf16.msrb.mxu3 %v5237_v6 }
 0x38c   :  { %2225 = vmatpush.bf16.msra.mxu0 %v5238_v10 }
 0x38e   :  { %2211 = vmatpush.bf16.msrb.mxu3 %v4670_v14 }
 0x390   :  { %2226 = vmatpush.bf16.msra.mxu0 %v5239_v50 }
 0x392   :  { %2212 = vmatpush.bf16.msrb.mxu3 %v5240_v30 }
 0x394   :  { %2227 = vmatpush.bf16.msra.mxu0 %v4696_v2 }
 0x396   :  { %2213 = vmatpush.bf16.msrb.mxu3 %v4707_v52 }
 0x398   :  { %2228 = vmatpush.bf16.msra.mxu0 %v4712_v12 }
 0x39a   :  { %2214 = vmatpush.bf16.msrb.mxu3 %v4718_v0 }
 0x39e   :  { %2215 = vmatpush.bf16.msrb.mxu3 %v4729_v20 }
 0x3a7   :  { %v1915_v57 = vpop.f32.mrf.mxu1 }
 0x3ad   :  { %v1928_v6 = vpop.f32.mrf.mxu2 }
 0x3ae   :  { %v1929_v38 = vadd.f32 %v1928_v6, %v1915_v57 }
 0x3af   :  { %v1917_v10 = vpop.f32.mrf.mxu1 }
 0x3b5   :  { %v1930_v51 = vpop.f32.mrf.mxu2 }
 0x3b7   :  { %v1967_v14 = vpop.f32.mrf.mxu1 }
 0x3b8   :  { %v1954_v56 = vpop.f32.mrf.mxu0 }
 0x3bd   :  { %v1980_v50 = vpop.f32.mrf.mxu2 }
 0x3bf   :  { %v1969_v60 = vpop.f32.mrf.mxu1 }
 0x3c0   :  { %v1956_v30 = vpop.f32.mrf.mxu0 }
 0x3c4   :  { %v1941_v24 = vpop.f32.mrf.mxu3 }
 0x3c5   :  { %v1942_v2 = vadd.f32 %v1941_v24, %v1929_v38  ;;  %v1982_v3 = vpop.f32.mrf.mxu2 }
 0x3c7   :  { %v1955_v52 = vadd.f32 %v1954_v56, %v1942_v2  ;;  %v2019_v9 = vpop.f32.mrf.mxu1 }
 0x3c8   :  { %v2114_v12 = vmul.f32 %v2019_v9, %v4691_v21  ;;  %v2006_v0 = vpop.f32.mrf.mxu0 }
 0x3c9   :  { %v1968_v36 = vadd.f32 %v1967_v14, %v1955_v52  ;;  %v5242_v52 = vld [vmem:[#allocation7_spill] sm:$0xff] }
 0x3ca   :  { %v2122_v20 = vpack.c.bf16 %v2114_v12, %v2114_v12 }
 0x3cb   :  { %v1981_v27 = vadd.f32 %v1980_v50, %v1968_v36 }
 0x3cc   :  { %2138 = vmatmul.bf16.vlgmr.msra.gmra.mxu1 %v2122_v20  ;;  %v1943_v6 = vpop.f32.mrf.mxu3 }
 0x3cd   :  { %v2032_v10 = vpop.f32.mrf.mxu2  ;;  %2240 = vmatpush.bf16.msra.mxu1 %v3930_v53 }
 0x3ce   :  { %v2115_v51 = vmul.f32 %v2032_v10, %v4691_v21 }
 0x3cf   :  { %v2021_v57 = vpop.f32.mrf.mxu1 }
 0x3d0   :  { %v2123_v30 = vpack.c.bf16 %v2115_v51, %v2115_v51  ;;  %v2008_v60 = vpop.f32.mrf.mxu0 }
 0x3d1   :  { %2241 = vmatpush.bf16.msra.mxu1 %v3950_v1 }
 0x3d2   :  { %2151 = vmatmul.bf16.vlgmr.msra.gmra.mxu2 %v2123_v30 }
 0x3d3   :  { %2253 = vmatpush.bf16.msra.mxu2 %v3932_v54 }
 0x3d4   :  { %v1993_v2 = vpop.f32.mrf.mxu3 }
 0x3d5   :  { %v1994_v38 = vadd.f32 %v1993_v2, %v1981_v27  ;;  %v2034_v14 = vpop.f32.mrf.mxu2 }
 0x3d7   :  { %v4839_v12 = vadd.f32 %v2006_v0, %v1994_v38  ;;  %v2071_v36 = vpop.f32.mrf.mxu1  ;;  %2254 = vmatpush.bf16.msra.mxu2 %v5242_v52 }
 0x3d8   :  { %v2118_v20 = vmul.f32 %v2071_v36, %v4691_v21  ;;  %v2058_v9 = vpop.f32.mrf.mxu0 }
 0x3d9   :  { %5241 = vst [vmem:[#allocation14_spill] sm:$0xff] %v4839_v12  ;;  %v2117_v50 = vmul.f32 %v2058_v9, %v4691_v21  ;;  %v5262_v12 = vld [vmem:[#allocation26_spill] sm:$0xff] }
 0x3da   :  { %v2126_v3 = vpack.c.bf16 %v2118_v20, %v2118_v20  ;;  %v5243_v20 = vld [vmem:[#allocation6_spill] sm:$0xff] }
 0x3db   :  { %v2125_v24 = vpack.c.bf16 %v2117_v50, %v2117_v50 }
 0x3dc   :  { %2190 = vmatmul.bf16.vlgmr.msrb.gmra.mxu1 %v2126_v3  ;;  %v1995_v56 = vpop.f32.mrf.mxu3 }
 0x3dd   :  { %v2084_v6 = vpop.f32.mrf.mxu2  ;;  %2177 = vmatmul.bf16.vlgmr.msrb.gmra.mxu0 %v2125_v24  ;;  %2292 = vmatpush.bf16.msrb.mxu1 %v3971_v16 }
 0x3de   :  { %v2119_v27 = vmul.f32 %v2084_v6, %v4691_v21  ;;  %2279 = vmatpush.bf16.msrb.mxu0 %v4268_v40 }
 0x3df   :  { %v2073_v0 = vpop.f32.mrf.mxu1 }
 0x3e0   :  { %v2127_v10 = vpack.c.bf16 %v2119_v27, %v2119_v27  ;;  %v2060_v51 = vpop.f32.mrf.mxu0  ;;  %v5244_v27 = vld [vmem:[#allocation8_spill] sm:$0xff]  ;;  %v5245_v0 = vld [vmem:[#allocation11_spill] sm:$0xff] }
 0x3e1   :  { %2293 = vmatpush.bf16.msrb.mxu1 %v3991_v28  ;;  %v5247_v51 = vld [vmem:[#allocation18_spill] sm:$0xff] }
 0x3e2   :  { %2203 = vmatmul.bf16.vlgmr.msrb.gmra.mxu2 %v2127_v10  ;;  %2280 = vmatpush.bf16.msrb.mxu0 %v4273_v33  ;;  %v5246_v10 = vld [vmem:[#allocation16_spill] sm:$0xff] }
 0x3e3   :  { %2305 = vmatpush.bf16.msrb.mxu2 %v3973_v17 }
 0x3e4   :  { %v2045_v57 = vpop.f32.mrf.mxu3 }
 0x3e5   :  { %v2116_v30 = vmul.f32 %v2045_v57, %v4691_v21  ;;  %v2086_v60 = vpop.f32.mrf.mxu2  ;;  %v5248_v57 = vld [vmem:[#allocation12_spill] sm:$0xff] }
 0x3e6   :  { %v5250_v60 = vld [vmem:[#allocation20_spill] sm:$0xff] }
 0x3e7   :  { %v2124_v2 = vpack.c.bf16 %v2116_v30, %v2116_v30  ;;  %2306 = vmatpush.bf16.msrb.mxu2 %v3993_v31  ;;  %v5249_v30 = vld [vmem:[#allocation13_spill] sm:$0xff] }
 0x3e8   :  { %v2110_v38 = vpop.f32.mrf.mxu0 }
 0x3e9   :  { %v2121_v14 = vmul.f32 %v2110_v38, %v4691_v21  ;;  %2164 = vmatmul.bf16.vlgmr.msra.gmra.mxu3 %v2124_v2  ;;  %v5251_v2 = vld [vmem:[#allocation22_spill] sm:$0xff]  ;;  %v5252_v38 = vld [vmem:[#allocation23_spill] sm:$0xff] }
 0x3ea   :  { %2266 = vmatpush.bf16.msra.mxu3 %v4244_v47 }
 0x3eb   :  { %v2129_v36 = vpack.c.bf16 %v2121_v14, %v2121_v14  ;;  %v5253_v14 = vld [vmem:[#allocation15_spill] sm:$0xff] }
 0x3ec   :  { %3165 = vmatmul.msk.bf16.vlgmr.msra.gmra.mxu1 %vm73_vm1, %v5243_v20  ;;  %v2047_v9 = vpop.f32.mrf.mxu3 }
 0x3ed   :  { %2229 = vmatmul.bf16.vlgmr.msra.gmra.mxu0 %v2129_v36  ;;  %2354 = vmatpush.bf16.msra.mxu1 %v4315_v13  ;;  %v5254_v36 = vld [vmem:[#allocation17_spill] sm:$0xff] }
 0x3ee   :  { %2267 = vmatpush.bf16.msra.mxu3 %v4257_v58  ;;  %2331 = vmatpush.bf16.msra.mxu0 %v4291_v23  ;;  %v5255_v9 = vld [vmem:[#allocation25_spill] sm:$0xff] }
 0x3f0   :  { %v2112_v50 = vpop.f32.mrf.mxu0 }
 0x3f1   :  { %2355 = vmatpush.bf16.msra.mxu1 %v4333_v43  ;;  %v5256_v50 = vld [vmem:[#allocation27_spill] sm:$0xff] }
 0x3f2   :  { %3166 = vmatmul.msk.bf16.vlgmr.msra.gmra.mxu2 %vm73_vm1, %v5243_v20  ;;  %2332 = vmatpush.bf16.msra.mxu0 %v4326_v37 }
 0x3f3   :  { %2367 = vmatpush.bf16.msra.mxu2 %v4320_v29 }
 0x3f4   :  { %v2097_v3 = vpop.f32.mrf.mxu3 }
 0x3f5   :  { %v2120_v24 = vmul.f32 %v2097_v3, %v4691_v21  ;;  %2356 = vmatpush.bf16.msra.mxu1 %v4349_v49  ;;  %v5257_v3 = vld [vmem:[#allocation19_spill] sm:$0xff] }
 0x3f7   :  { %v2128_v56 = vpack.c.bf16 %v2120_v24, %v2120_v24  ;;  %2368 = vmatpush.bf16.msra.mxu2 %v4338_v19  ;;  %v5258_v24 = vld [vmem:[#allocation21_spill] sm:$0xff] }
 0x3f9   :  { %2216 = vmatmul.bf16.vlgmr.msrb.gmra.mxu3 %v2128_v56  ;;  %2357 = vmatpush.bf16.msra.mxu1 %v4370_v11  ;;  %v5259_v56 = vld [vmem:[#allocation29_spill] sm:$0xff] }
 0x3fa   :  { %2318 = vmatpush.bf16.msrb.mxu3 %v4289_v61 }
 0x3fb   :  { %2369 = vmatpush.bf16.msra.mxu2 %v4355_v44 }
 0x3fc   :  { %3169 = vmatmul.msk.bf16.vlgmr.msrb.gmra.mxu1 %vm73_vm1, %v5243_v20  ;;  %v2099_v6 = vpop.f32.mrf.mxu3 }
 0x3fd   :  { %3168 = vmatmul.msk.bf16.vlgmr.msrb.gmra.mxu0 %vm73_vm1, %v5243_v20  ;;  %2358 = vmatpush.bf16.msra.mxu1 %v4387_v55  ;;  %v5261_v6 = vld [vmem:[#allocation24_spill] sm:$0xff] }
 0x3fe   :  { %2319 = vmatpush.bf16.msrb.mxu3 %v4323_v22  ;;  %2393 = vmatpush.bf16.msrb.mxu0 %v4380_v45 }
 0x3ff   :  { %2370 = vmatpush.bf16.msra.mxu2 %v4375_v26 }
 0x401   :  { %2359 = vmatpush.bf16.msra.mxu1 %v4416_v5 }
 0x402   :  { %3170 = vmatmul.msk.bf16.vlgmr.msrb.gmra.mxu2 %vm73_vm1, %v5243_v20  ;;  %2394 = vmatpush.bf16.msrb.mxu0 %v4398_v41 }
 0x403   :  { %2371 = vmatpush.bf16.msra.mxu2 %v4392_v34 }
 0x405   :  { %2360 = vmatpush.bf16.msra.mxu1 %v4440_v18 }
 0x406   :  { %2395 = vmatpush.bf16.msrb.mxu0 %v4427_v32 }
 0x407   :  { %2372 = vmatpush.bf16.msra.mxu2 %v4421_v42 }
 0x409   :  { %3167 = vmatmul.msk.bf16.vlgmr.msra.gmra.mxu3 %vm73_vm1, %v5243_v20  ;;  %2361 = vmatpush.bf16.msra.mxu1 %v4459_v15 }
 0x40a   :  { %2396 = vmatpush.bf16.msrb.mxu0 %v4451_v7  ;;  %2380 = vmatpush.bf16.msra.mxu3 %v4403_v62 }
 0x40b   :  { %2373 = vmatpush.bf16.msra.mxu2 %v4445_v63 }
 0x40d   :  { %2406 = vmatpush.bf16.msrb.mxu1 %v4469_v39  ;;  %3172 = vmatmul.msk.bf16.vlgmr.msra.gmra.mxu0 %vm73_vm1, %v5243_v20 }
 0x40e   :  { %2397 = vmatpush.bf16.msrb.mxu0 %v4496_v59  ;;  %2381 = vmatpush.bf16.msra.mxu3 %v4409_v25 }
 0x40f   :  { %2374 = vmatpush.bf16.msra.mxu2 %v4464_v4 }
 0x411   :  { %2407 = vmatpush.bf16.msrb.mxu1 %v4484_v48 }
 0x412   :  { %2398 = vmatpush.bf16.msrb.mxu0 %v5213_v8  ;;  %2382 = vmatpush.bf16.msra.mxu3 %v5244_v27 }
 0x413   :  { %2419 = vmatpush.bf16.msrb.mxu2 %v4474_v46 }
 0x415   :  { %2408 = vmatpush.bf16.msrb.mxu1 %v4507_v35 }
 0x416   :  { %2399 = vmatpush.bf16.msrb.mxu0 %v5247_v51  ;;  %2383 = vmatpush.bf16.msra.mxu3 %v5248_v57 }
 0x417   :  { %2420 = vmatpush.bf16.msrb.mxu2 %v5245_v0 }
 0x419   :  { %2409 = vmatpush.bf16.msrb.mxu1 %v5246_v10  ;;  %3171 = vmatmul.msk.bf16.vlgmr.msrb.gmra.mxu3 %vm73_vm1, %v5243_v20  ;;  %v5260_v20 = vld [vmem:[#allocation32_spill] sm:$0xff] }
 0x41a   :  { %2400 = vmatpush.bf16.msrb.mxu0 %v5251_v2  ;;  %2384 = vmatpush.bf16.msra.mxu3 %v5253_v14  ;;  %v5264_v14 = vld [vmem:[#allocation36_spill] sm:$0xff] }
 0x41b   :  { %2421 = vmatpush.bf16.msrb.mxu2 %v5249_v30  ;;  %v5263_v30 = vld [vmem:[#allocation33_spill] sm:$0xff] }
 0x41d   :  { %2410 = vmatpush.bf16.msrb.mxu1 %v5250_v60 }
 0x41e   :  { %2445 = vmatpush.bf16.msra.mxu0 %v5252_v38  ;;  %2385 = vmatpush.bf16.msra.mxu3 %v5257_v3  ;;  %v5268_v3 = vld [vmem:[#allocation38_spill] sm:$0xff] }
 0x41f   :  { %2422 = vmatpush.bf16.msrb.mxu2 %v5254_v36  ;;  %v5265_v36 = vld [vmem:[#allocation28_spill] sm:$0xff] }
 0x421   :  { %2411 = vmatpush.bf16.msrb.mxu1 %v5255_v9  ;;  %v5266_v9 = vld [vmem:[#allocation30_spill] sm:$0xff] }
 0x422   :  { %2446 = vmatpush.bf16.msra.mxu0 %v5256_v50  ;;  %2386 = vmatpush.bf16.msra.mxu3 %v5261_v6  ;;  %v5267_v50 = vld [vmem:[#allocation31_spill] sm:$0xff]  ;;  %v5272_v6 = vld [vmem:[#allocation37_spill] sm:$0xff] }
 0x423   :  { %2423 = vmatpush.bf16.msrb.mxu2 %v5258_v24  ;;  %v5269_v24 = vld [vmem:[#allocation34_spill] sm:$0xff] }
 0x425   :  { %2412 = vmatpush.bf16.msrb.mxu1 %v5259_v56  ;;  %v5270_v56 = vld [vmem:[#allocation35_spill] sm:$0xff] }
 0x426   :  { %2447 = vmatpush.bf16.msra.mxu0 %v5260_v20  ;;  %2387 = vmatpush.bf16.msra.mxu3 %v5265_v36  ;;  %v5271_v20 = vld [vmem:[#allocation40_spill] sm:$0xff]  ;;  %v5276_v36 = vld [vmem:[#allocation41_spill] sm:$0xff] }
 0x427   :  { %2424 = vmatpush.bf16.msrb.mxu2 %v5262_v12  ;;  %v5273_v12 = vld [vmem:[#allocation42_spill] sm:$0xff] }
 0x429   :  { %2413 = vmatpush.bf16.msrb.mxu1 %v5263_v30  ;;  %v5274_v30 = vld [vmem:[#allocation39_spill] sm:$0xff] }
 0x42a   :  { %2448 = vmatpush.bf16.msra.mxu0 %v5264_v14  ;;  %2432 = vmatpush.bf16.msrb.mxu3 %v5267_v50  ;;  %v5275_v14 = vld [vmem:[#allocation44_spill] sm:$0xff]  ;;  %v5278_v50 = vld [vmem:[#allocation45_spill] sm:$0xff] }
 0x42b   :  { %2425 = vmatpush.bf16.msrb.mxu2 %v5266_v9  ;;  %v5277_v9 = vld [vmem:[#allocation43_spill] sm:$0xff] }
 0x42e   :  { %2449 = vmatpush.bf16.msra.mxu0 %v5268_v3  ;;  %2433 = vmatpush.bf16.msrb.mxu3 %v5270_v56  ;;  %v5279_v3 = vld [vmem:[#allocation47_spill] sm:$0xff] }
 0x42f   :  { %2426 = vmatpush.bf16.msrb.mxu2 %v5269_v24 }
 0x432   :  { %2450 = vmatpush.bf16.msra.mxu0 %v5271_v20  ;;  %2434 = vmatpush.bf16.msrb.mxu3 %v5272_v6 }
 0x436   :  { %2451 = vmatpush.bf16.msra.mxu0 %v5273_v12  ;;  %2435 = vmatpush.bf16.msrb.mxu3 %v5274_v30 }
 0x43a   :  { %2452 = vmatpush.bf16.msra.mxu0 %v5275_v14  ;;  %2436 = vmatpush.bf16.msrb.mxu3 %v5276_v36 }
 0x43e   :  { %2437 = vmatpush.bf16.msrb.mxu3 %v5277_v9 }
 0x442   :  { %2438 = vmatpush.bf16.msrb.mxu3 %v5278_v50 }
 0x446   :  { %2439 = vmatpush.bf16.msrb.mxu3 %v5279_v3 }
 0x449   :  { %v2139_v24 = vpop.f32.mrf.mxu1 }
 0x451   :  { %v2141_v56 = vpop.f32.mrf.mxu1 }
 0x455   :  { %v2152_v57 = vpop.f32.mrf.mxu2 }
 0x456   :  { %v2153_v9 = vadd.f32 %v2152_v57, %v2139_v24 }
 0x459   :  { %v2191_v20 = vpop.f32.mrf.mxu1 }
 0x45a   :  { %v2178_v38 = vpop.f32.mrf.mxu0 }
 0x45d   :  { %v2154_v6 = vpop.f32.mrf.mxu2 }
 0x461   :  { %v2193_v60 = vpop.f32.mrf.mxu1 }
 0x462   :  { %v2180_v12 = vpop.f32.mrf.mxu0 }
 0x465   :  { %v2204_v0 = vpop.f32.mrf.mxu2 }
 0x469   :  { %v2243_v30 = vpop.f32.mrf.mxu1 }
 0x46a   :  { %v2338_v14 = vmul.f32 %v2243_v30, %v4691_v21  ;;  %v2230_v2 = vpop.f32.mrf.mxu0 }
 0x46c   :  { %v2346_v36 = vpack.c.bf16 %v2338_v14, %v2338_v14  ;;  %v2165_v27 = vpop.f32.mrf.mxu3 }
 0x46d   :  { %v2206_v10 = vpop.f32.mrf.mxu2  ;;  %v2166_v50 = vadd.f32 %v2165_v27, %v2153_v9 }
 0x46e   :  { %2362 = vmatmul.bf16.vlgmr.msra.gmra.mxu1 %v2346_v36 }
 0x46f   :  { %2464 = vmatpush.bf16.msra.mxu1 %v3930_v53  ;;  %v2179_v46 = vadd.f32 %v2178_v38, %v2166_v50 }
 0x471   :  { %v2245_v56 = vpop.f32.mrf.mxu1  ;;  %v2192_v51 = vadd.f32 %v2191_v20, %v2179_v46 }
 0x472   :  { %v2232_v3 = vpop.f32.mrf.mxu0  ;;  %v5280_v56 = vld [vmem:[#allocation5_spill] sm:$0xff] }
 0x473   :  { %2465 = vmatpush.bf16.msra.mxu1 %v3950_v1  ;;  %v2205_v57 = vadd.f32 %v2204_v0, %v2192_v51 }
 0x474   :  { %v2167_v60 = vpop.f32.mrf.mxu3 }
 0x475   :  { %v2256_v12 = vpop.f32.mrf.mxu2  ;;  %v5310_v60 = vld [vmem:[#allocation34_spill] sm:$0xff] }
 0x476   :  { %v2339_v6 = vmul.f32 %v2256_v12, %v4691_v21  ;;  %v5311_v12 = vld [vmem:[#allocation42_spill] sm:$0xff] }
 0x478   :  { %v2347_v30 = vpack.c.bf16 %v2339_v6, %v2339_v6  ;;  %v5312_v6 = vld [vmem:[#allocation37_spill] sm:$0xff] }
 0x479   :  { %v2295_v4 = vpop.f32.mrf.mxu1 }
 0x47a   :  { %v2342_v14 = vmul.f32 %v2295_v4, %v4691_v21  ;;  %2375 = vmatmul.bf16.vlgmr.msra.gmra.mxu2 %v2347_v30  ;;  %v2282_v10 = vpop.f32.mrf.mxu0  ;;  %v5313_v30 = vld [vmem:[#allocation44_spill] sm:$0xff] }
 0x47b   :  { %v2341_v27 = vmul.f32 %v2282_v10, %v4691_v21  ;;  %2477 = vmatpush.bf16.msra.mxu2 %v3932_v54  ;;  %v5315_v10 = vld [vmem:[#allocation41_spill] sm:$0xff] }
 0x47c   :  { %v2350_v53 = vpack.c.bf16 %v2342_v14, %v2342_v14  ;;  %v2217_v38 = vpop.f32.mrf.mxu3  ;;  %v5314_v14 = vld [vmem:[#allocation39_spill] sm:$0xff] }
 0x47d   :  { %v2349_v36 = vpack.c.bf16 %v2341_v27, %v2341_v27  ;;  %v2218_v1 = vadd.f32 %v2217_v38, %v2205_v57  ;;  %v2258_v9 = vpop.f32.mrf.mxu2  ;;  %v5316_v27 = vld [vmem:[#allocation43_spill] sm:$0xff]  ;;  %v5317_v57 = vld [vmem:[#allocation45_spill] sm:$0xff] }
 0x47e   :  { %2414 = vmatmul.bf16.vlgmr.msrb.gmra.mxu1 %v2350_v53  ;;  %v5318_v38 = vld [vmem:[#allocation47_spill] sm:$0xff] }
 0x47f   :  { %v2231_v50 = vadd.f32 %v2230_v2, %v2218_v1  ;;  %2401 = vmatmul.bf16.vlgmr.msrb.gmra.mxu0 %v2349_v36  ;;  %2478 = vmatpush.bf16.msra.mxu2 %v5242_v52 }
 0x480   :  { %2516 = vmatpush.bf16.msrb.mxu1 %v3971_v16  ;;  %2503 = vmatpush.bf16.msrb.mxu0 %v4268_v40 }
 0x481   :  { %v2297_v4 = vpop.f32.mrf.mxu1  ;;  %2683 = vrot.lane.b32.xlu1 %v2231_v50, %s3497_s22  ;;  %s2705_s22 = sshll.u32 %s3520_s11, 4  ;;  %s2706_s22 = int_to_ptr.vmem [resolvable:$true] %s2705_s22 }
 0x482   :  { %v2284_v46 = vpop.f32.mrf.mxu0 }
 0x484   :  { %v2219_v0 = vpop.f32.mrf.mxu3  ;;  %2517 = vmatpush.bf16.msrb.mxu1 %v3991_v28  ;;  %2504 = vmatpush.bf16.msrb.mxu0 %v4273_v33 }
 0x485   :  { %v2308_v54 = vpop.f32.mrf.mxu2 }
 0x486   :  { %v2343_v51 = vmul.f32 %v2308_v54, %v4691_v21 }
 0x488   :  { %v2351_v2 = vpack.c.bf16 %v2343_v51, %v2343_v51 }
 0x48a   :  { %2427 = vmatmul.bf16.vlgmr.msrb.gmra.mxu2 %v2351_v2  ;;  %v2334_v3 = vpop.f32.mrf.mxu0 }
 0x48b   :  { %v2345_v52 = vmul.f32 %v2334_v3, %v4691_v21  ;;  %2529 = vmatpush.bf16.msrb.mxu2 %v3973_v17 }
 0x48c   :  { %v2269_v16 = vpop.f32.mrf.mxu3 }
 0x48d   :  { %v2353_v40 = vpack.c.bf16 %v2345_v52, %v2345_v52  ;;  %v2340_v24 = vmul.f32 %v2269_v16, %v4691_v21  ;;  %v2310_v20 = vpop.f32.mrf.mxu2 }
 0x48e   :  { %3173 = vmatmul.msk.bf16.vlgmr.msra.gmra.mxu1 %vm73_vm1, %v5280_v56 }
 0x48f   :  { %v2348_v28 = vpack.c.bf16 %v2340_v24, %v2340_v24  ;;  %2453 = vmatmul.bf16.vlgmr.msra.gmra.mxu0 %v2353_v40  ;;  %2530 = vmatpush.bf16.msrb.mxu2 %v3993_v31 }
 0x490   :  { %2555 = vmatpush.bf16.msra.mxu0 %v4291_v23  ;;  %2578 = vmatpush.bf16.msra.mxu1 %v4315_v13  ;;  %v5282_v13 = vld [vmem:[#allocation18_spill] sm:$0xff] }
 0x491   :  { %2388 = vmatmul.bf16.vlgmr.msra.gmra.mxu3 %v2348_v28 }
 0x492   :  { %v2336_v33 = vpop.f32.mrf.mxu0  ;;  %2490 = vmatpush.bf16.msra.mxu3 %v4244_v47 }
 0x494   :  { %v2271_v17 = vpop.f32.mrf.mxu3  ;;  %2556 = vmatpush.bf16.msra.mxu0 %v4326_v37  ;;  %2579 = vmatpush.bf16.msra.mxu1 %v4333_v43  ;;  %v5285_v37 = vld [vmem:[#allocation8_spill] sm:$0xff]  ;;  %v5286_v43 = vld [vmem:[#allocation22_spill] sm:$0xff] }
 0x496   :  { %2491 = vmatpush.bf16.msra.mxu3 %v4257_v58 }
 0x498   :  { %2580 = vmatpush.bf16.msra.mxu1 %v4349_v49  ;;  %v5288_v49 = vld [vmem:[#allocation20_spill] sm:$0xff] }
 0x49a   :  { %3174 = vmatmul.msk.bf16.vlgmr.msra.gmra.mxu2 %vm73_vm1, %v5280_v56 }
 0x49b   :  { %2591 = vmatpush.bf16.msra.mxu2 %v4320_v29  ;;  %v5283_v29 = vld [vmem:[#allocation10_spill] sm:$0xff] }
 0x49c   :  { %v2321_v31 = vpop.f32.mrf.mxu3  ;;  %2581 = vmatpush.bf16.msra.mxu1 %v4370_v11  ;;  %v5290_v11 = vld [vmem:[#allocation12_spill] sm:$0xff] }
 0x49d   :  { %v2344_v23 = vmul.f32 %v2321_v31, %v4691_v21 }
 0x49e   :  { %3177 = vmatmul.msk.bf16.vlgmr.msrb.gmra.mxu1 %vm73_vm1, %v5280_v56 }
 0x49f   :  { %v2352_v47 = vpack.c.bf16 %v2344_v23, %v2344_v23  ;;  %3176 = vmatmul.msk.bf16.vlgmr.msrb.gmra.mxu0 %vm73_vm1, %v5280_v56  ;;  %2592 = vmatpush.bf16.msra.mxu2 %v4338_v19  ;;  %v5287_v19 = vld [vmem:[#allocation11_spill] sm:$0xff] }
 0x4a0   :  { %2582 = vmatpush.bf16.msra.mxu1 %v4387_v55  ;;  %2617 = vmatpush.bf16.msrb.mxu0 %v4380_v45  ;;  %v5292_v45 = vld [vmem:[#allocation25_spill] sm:$0xff]  ;;  %v5293_v55 = vld [vmem:[#allocation27_spill] sm:$0xff] }
 0x4a1   :  { %2440 = vmatmul.bf16.vlgmr.msrb.gmra.mxu3 %v2352_v47 }
 0x4a2   :  { %2542 = vmatpush.bf16.msrb.mxu3 %v4289_v61  ;;  %v5281_v61 = vld [vmem:[#allocation9_spill] sm:$0xff] }
 0x4a3   :  { %2593 = vmatpush.bf16.msra.mxu2 %v4355_v44  ;;  %v5289_v44 = vld [vmem:[#allocation23_spill] sm:$0xff] }
 0x4a4   :  { %v2323_v58 = vpop.f32.mrf.mxu3  ;;  %2583 = vmatpush.bf16.msra.mxu1 %v4416_v5  ;;  %2618 = vmatpush.bf16.msrb.mxu0 %v4398_v41  ;;  %v5295_v41 = vld [vmem:[#allocation17_spill] sm:$0xff]  ;;  %v5298_v5 = vld [vmem:[#allocation19_spill] sm:$0xff] }
 0x4a6   :  { %2543 = vmatpush.bf16.msrb.mxu3 %v4323_v22  ;;  %v5284_v22 = vld [vmem:[#allocation16_spill] sm:$0xff] }
 0x4a7   :  { %2594 = vmatpush.bf16.msra.mxu2 %v4375_v26  ;;  %v5291_v26 = vld [vmem:[#allocation13_spill] sm:$0xff] }
 0x4a8   :  { %2584 = vmatpush.bf16.msra.mxu1 %v4440_v18  ;;  %2619 = vmatpush.bf16.msrb.mxu0 %v4427_v32  ;;  %v5300_v32 = vld [vmem:[#allocation33_spill] sm:$0xff]  ;;  %v5301_v18 = vld [vmem:[#allocation36_spill] sm:$0xff] }
 0x4aa   :  { %3178 = vmatmul.msk.bf16.vlgmr.msrb.gmra.mxu2 %vm73_vm1, %v5280_v56 }
 0x4ab   :  { %2595 = vmatpush.bf16.msra.mxu2 %v4392_v34  ;;  %v5294_v34 = vld [vmem:[#allocation15_spill] sm:$0xff] }
 0x4ac   :  { %2585 = vmatpush.bf16.msra.mxu1 %v4459_v15  ;;  %2620 = vmatpush.bf16.msrb.mxu0 %v4451_v7  ;;  %v5303_v7 = vld [vmem:[#allocation26_spill] sm:$0xff] }
 0x4ad   :  { %v5304_v15 = vld [vmem:[#allocation38_spill] sm:$0xff] }
 0x4af   :  { %3180 = vmatmul.msk.bf16.vlgmr.msra.gmra.mxu0 %vm73_vm1, %v5280_v56  ;;  %2596 = vmatpush.bf16.msra.mxu2 %v4421_v42  ;;  %v5299_v42 = vld [vmem:[#allocation21_spill] sm:$0xff] }
 0x4b0   :  { %2630 = vmatpush.bf16.msrb.mxu1 %v4469_v39  ;;  %2621 = vmatpush.bf16.msrb.mxu0 %v4496_v59  ;;  %v5305_v39 = vld [vmem:[#allocation28_spill] sm:$0xff]  ;;  %v5307_v59 = vld [vmem:[#allocation30_spill] sm:$0xff] }
 0x4b1   :  { %3175 = vmatmul.msk.bf16.vlgmr.msra.gmra.mxu3 %vm73_vm1, %v5280_v56 }
 0x4b2   :  { %2604 = vmatpush.bf16.msra.mxu3 %v4403_v62  ;;  %v5296_v62 = vld [vmem:[#allocation29_spill] sm:$0xff] }
 0x4b3   :  { %2597 = vmatpush.bf16.msra.mxu2 %v4445_v63  ;;  %v5302_v63 = vld [vmem:[#allocation24_spill] sm:$0xff] }
 0x4b4   :  { %2631 = vmatpush.bf16.msrb.mxu1 %v4484_v48  ;;  %2622 = vmatpush.bf16.msrb.mxu0 %v5213_v8  ;;  %v5306_v48 = vld [vmem:[#allocation31_spill] sm:$0xff] }
 0x4b5   :  { %v5309_v8 = vld [vmem:[#allocation35_spill] sm:$0xff] }
 0x4b6   :  { %2605 = vmatpush.bf16.msra.mxu3 %v4409_v25  ;;  %v5297_v25 = vld [vmem:[#allocation32_spill] sm:$0xff] }
 0x4b7   :  { %2598 = vmatpush.bf16.msra.mxu2 %v5281_v61 }
 0x4b8   :  { %2632 = vmatpush.bf16.msrb.mxu1 %v4507_v35  ;;  %2623 = vmatpush.bf16.msrb.mxu0 %v5282_v13  ;;  %v5308_v35 = vld [vmem:[#allocation40_spill] sm:$0xff] }
 0x4ba   :  { %2606 = vmatpush.bf16.msra.mxu3 %v5285_v37 }
 0x4bb   :  { %2643 = vmatpush.bf16.msrb.mxu2 %v5283_v29 }
 0x4bc   :  { %2633 = vmatpush.bf16.msrb.mxu1 %v5284_v22  ;;  %2624 = vmatpush.bf16.msrb.mxu0 %v5286_v43 }
 0x4be   :  { %2607 = vmatpush.bf16.msra.mxu3 %v5290_v11 }
 0x4bf   :  { %2644 = vmatpush.bf16.msrb.mxu2 %v5287_v19 }
 0x4c0   :  { %2634 = vmatpush.bf16.msrb.mxu1 %v5288_v49  ;;  %2669 = vmatpush.bf16.msra.mxu0 %v5289_v44 }
 0x4c1   :  { %3179 = vmatmul.msk.bf16.vlgmr.msrb.gmra.mxu3 %vm73_vm1, %v5280_v56 }
 0x4c2   :  { %2608 = vmatpush.bf16.msra.mxu3 %v5294_v34 }
 0x4c3   :  { %2645 = vmatpush.bf16.msrb.mxu2 %v5291_v26 }
 0x4c4   :  { %2635 = vmatpush.bf16.msrb.mxu1 %v5292_v45  ;;  %2670 = vmatpush.bf16.msra.mxu0 %v5293_v55 }
 0x4c6   :  { %2609 = vmatpush.bf16.msra.mxu3 %v5298_v5 }
 0x4c7   :  { %2646 = vmatpush.bf16.msrb.mxu2 %v5295_v41 }
 0x4c8   :  { %2636 = vmatpush.bf16.msrb.mxu1 %v5296_v62  ;;  %2671 = vmatpush.bf16.msra.mxu0 %v5297_v25 }
 0x4ca   :  { %2610 = vmatpush.bf16.msra.mxu3 %v5302_v63 }
 0x4cb   :  { %2647 = vmatpush.bf16.msrb.mxu2 %v5299_v42 }
 0x4cc   :  { %2637 = vmatpush.bf16.msrb.mxu1 %v5300_v32  ;;  %2672 = vmatpush.bf16.msra.mxu0 %v5301_v18 }
 0x4ce   :  { %2611 = vmatpush.bf16.msra.mxu3 %v5305_v39 }
 0x4cf   :  { %2648 = vmatpush.bf16.msrb.mxu2 %v5303_v7 }
 0x4d0   :  { %2673 = vmatpush.bf16.msra.mxu0 %v5304_v15 }
 0x4d2   :  { %2656 = vmatpush.bf16.msrb.mxu3 %v5306_v48 }
 0x4d3   :  { %2649 = vmatpush.bf16.msrb.mxu2 %v5307_v59 }
 0x4d4   :  { %2674 = vmatpush.bf16.msra.mxu0 %v5308_v35 }
 0x4d6   :  { %2657 = vmatpush.bf16.msrb.mxu3 %v5309_v8 }
 0x4d7   :  { %2650 = vmatpush.bf16.msrb.mxu2 %v5310_v60 }
 0x4d8   :  { %2675 = vmatpush.bf16.msra.mxu0 %v5311_v12 }
 0x4da   :  { %2658 = vmatpush.bf16.msrb.mxu3 %v5312_v6 }
 0x4dc   :  { %2676 = vmatpush.bf16.msra.mxu0 %v5313_v30 }
 0x4de   :  { %2659 = vmatpush.bf16.msrb.mxu3 %v5314_v14 }
 0x4e2   :  { %2660 = vmatpush.bf16.msrb.mxu3 %v5315_v10 }
 0x4e6   :  { %2661 = vmatpush.bf16.msrb.mxu3 %v5316_v27 }
 0x4ea   :  { %2662 = vmatpush.bf16.msrb.mxu3 %v5317_v57 }
 0x4eb   :  { %v2363_v53 = vpop.f32.mrf.mxu1 }
 0x4ee   :  { %2663 = vmatpush.bf16.msrb.mxu3 %v5318_v38 }
 0x4f3   :  { %v2365_v36 = vpop.f32.mrf.mxu1 }
 0x4fb   :  { %v2415_v1 = vpop.f32.mrf.mxu1 }
 0x4fc   :  { %v2402_v9 = vpop.f32.mrf.mxu0 }
 0x4fd   :  { %v2376_v50 = vpop.f32.mrf.mxu2 }
 0x4fe   :  { %v2377_v20 = vadd.f32 %v2376_v50, %v2363_v53 }
 0x503   :  { %v2417_v4 = vpop.f32.mrf.mxu1 }
 0x504   :  { %v2404_v46 = vpop.f32.mrf.mxu0 }
 0x505   :  { %v2378_v0 = vpop.f32.mrf.mxu2 }
 0x50b   :  { %v2467_v54 = vpop.f32.mrf.mxu1 }
 0x50c   :  { %v2562_v51 = vmul.f32 %v2467_v54, %v4691_v21  ;;  %v2454_v2 = vpop.f32.mrf.mxu0 }
 0x50d   :  { %v2428_v3 = vpop.f32.mrf.mxu2 }
 0x50e   :  { %v2570_v52 = vpack.c.bf16 %v2562_v51, %v2562_v51 }
 0x510   :  { %2586 = vmatmul.bf16.vlgmr.msra.gmra.mxu1 %v2570_v52 }
 0x513   :  { %v2469_v16 = vpop.f32.mrf.mxu1 }
 0x514   :  { %v2389_v40 = vpop.f32.mrf.mxu3  ;;  %v2456_v24 = vpop.f32.mrf.mxu0 }
 0x515   :  { %v2430_v56 = vpop.f32.mrf.mxu2  ;;  %v2390_v28 = vadd.f32 %v2389_v40, %v2377_v20  ;;  %v2684_v40 = vpop.permute.xlu1 %2683  ;;  %v5319_v20 = vld [vmem:[#allocation14_spill] sm:$0xff] }
 0x516   :  { %v2694_v56 = vsel %vm73_vm1, %v5319_v20, %v2684_v40 }
 0x517   :  { %v2403_v33 = vadd.f32 %v2402_v9, %v2390_v28 }
 0x519   :  { %v2416_v37 = vadd.f32 %v2415_v1, %v2403_v33 }
 0x51b   :  { %v2519_v17 = vpop.f32.mrf.mxu1  ;;  %v2429_v49 = vadd.f32 %v2428_v3, %v2416_v37 }
 0x51c   :  { %v2566_v31 = vmul.f32 %v2519_v17, %v4691_v21  ;;  %v2391_v23 = vpop.f32.mrf.mxu3  ;;  %v2506_v47 = vpop.f32.mrf.mxu0 }
 0x51d   :  { %v2480_v58 = vpop.f32.mrf.mxu2  ;;  %v2565_v61 = vmul.f32 %v2506_v47, %v4691_v21 }
 0x51e   :  { %v2574_v13 = vpack.c.bf16 %v2566_v31, %v2566_v31  ;;  %v2563_v29 = vmul.f32 %v2480_v58, %v4691_v21  ;;  %v5320_v31 = vld [vmem:[#allocation46_spill] sm:$0xff] }
 0x51f   :  { %v2573_v22 = vpack.c.bf16 %v2565_v61, %v2565_v61 }
 0x520   :  { %v2571_v43 = vpack.c.bf16 %v2563_v29, %v2563_v29  ;;  %2638 = vmatmul.bf16.vlgmr.msrb.gmra.mxu1 %v2574_v13 }
 0x521   :  { %2625 = vmatmul.bf16.vlgmr.msrb.gmra.mxu0 %v2573_v22 }
 0x522   :  { %2599 = vmatmul.bf16.vlgmr.msra.gmra.mxu2 %v2571_v43 }
 0x523   :  { %v2521_v19 = vpop.f32.mrf.mxu1 }
 0x524   :  { %v2441_v44 = vpop.f32.mrf.mxu3  ;;  %v2508_v11 = vpop.f32.mrf.mxu0 }
 0x525   :  { %v2442_v26 = vadd.f32 %v2441_v44, %v2429_v49  ;;  %v2482_v45 = vpop.f32.mrf.mxu2 }
 0x527   :  { %v2455_v55 = vadd.f32 %v2454_v2, %v2442_v26 }
 0x529   :  { %2687 = vrot.lane.b32.xlu2 %v2455_v55, %s3501_s7 }
 0x52c   :  { %v2443_v34 = vpop.f32.mrf.mxu3  ;;  %v2558_v41 = vpop.f32.mrf.mxu0 }
 0x52d   :  { %v2532_v62 = vpop.f32.mrf.mxu2  ;;  %v2569_v25 = vmul.f32 %v2558_v41, %v4691_v21 }
 0x52e   :  { %v2567_v5 = vmul.f32 %v2532_v62, %v4691_v21 }
 0x52f   :  { %v2577_v42 = vpack.c.bf16 %v2569_v25, %v2569_v25 }
 0x530   :  { %v2575_v32 = vpack.c.bf16 %v2567_v5, %v2567_v5 }
 0x531   :  { %2677 = vmatmul.bf16.vlgmr.msra.gmra.mxu0 %v2577_v42 }
 0x532   :  { %2651 = vmatmul.bf16.vlgmr.msrb.gmra.mxu2 %v2575_v32 }
 0x534   :  { %v2493_v18 = vpop.f32.mrf.mxu3  ;;  %v2560_v63 = vpop.f32.mrf.mxu0 }
 0x535   :  { %v2564_v7 = vmul.f32 %v2493_v18, %v4691_v21  ;;  %v2534_v15 = vpop.f32.mrf.mxu2 }
 0x537   :  { %v2572_v39 = vpack.c.bf16 %v2564_v7, %v2564_v7 }
 0x539   :  { %2612 = vmatmul.bf16.vlgmr.msra.gmra.mxu3 %v2572_v39 }
 0x53c   :  { %v2495_v48 = vpop.f32.mrf.mxu3 }
 0x544   :  { %v2545_v59 = vpop.f32.mrf.mxu3 }
 0x545   :  { %v2568_v35 = vmul.f32 %v2545_v59, %v4691_v21 }
 0x547   :  { %v2576_v8 = vpack.c.bf16 %v2568_v35, %v2568_v35 }
 0x549   :  { %2664 = vmatmul.bf16.vlgmr.msrb.gmra.mxu3 %v2576_v8 }
 0x54c   :  { %v2547_v60 = vpop.f32.mrf.mxu3 }
 0x583   :  { %v2688_v24 = vpop.permute.xlu2 %2687 }
 0x584   :  { %v2695_v28 = vsel %vm1170_vm3, %v2694_v56, %v2688_v24 }
 0x58d   :  { %v2587_v12 = vpop.f32.mrf.mxu1 }
 0x595   :  { %v2589_v6 = vpop.f32.mrf.mxu1 }
 0x59d   :  { %v2639_v30 = vpop.f32.mrf.mxu1 }
 0x59e   :  { %v2626_v14 = vpop.f32.mrf.mxu0 }
 0x5a5   :  { %v2600_v10 = vpop.f32.mrf.mxu2  ;;  %v2641_v27 = vpop.f32.mrf.mxu1 }
 0x5a6   :  { %v2628_v57 = vpop.f32.mrf.mxu0  ;;  %v2601_v50 = vadd.f32 %v2600_v10, %v2587_v12 }
 0x5ad   :  { %v2602_v53 = vpop.f32.mrf.mxu2 }
 0x5ae   :  { %v2678_v38 = vpop.f32.mrf.mxu0 }
 0x5b5   :  { %v2652_v36 = vpop.f32.mrf.mxu2 }
 0x5b6   :  { %v2680_v1 = vpop.f32.mrf.mxu0 }
 0x5bc   :  { %v2613_v9 = vpop.f32.mrf.mxu3 }
 0x5bd   :  { %v2654_v4 = vpop.f32.mrf.mxu2  ;;  %v2614_v46 = vadd.f32 %v2613_v9, %v2601_v50 }
 0x5bf   :  { %v2627_v0 = vadd.f32 %v2626_v14, %v2614_v46 }
 0x5c1   :  { %v2640_v54 = vadd.f32 %v2639_v30, %v2627_v0 }
 0x5c3   :  { %v2653_v51 = vadd.f32 %v2652_v36, %v2640_v54 }
 0x5c4   :  { %v2615_v21 = vpop.f32.mrf.mxu3 }
 0x5cc   :  { %v2665_v2 = vpop.f32.mrf.mxu3 }
 0x5cd   :  { %v2666_v3 = vadd.f32 %v2665_v2, %v2653_v51 }
 0x5cf   :  { %v2679_v52 = vadd.f32 %v2678_v38, %v2666_v3 }
 0x5d1   :  { %2691 = vrot.lane.b32.xlu0 %v2679_v52, %s3496_s5 }
 0x5d4   :  { %v2667_v16 = vpop.f32.mrf.mxu3 }
 0x643   :  { %v2692_v33 = vpop.permute.xlu0 %2691 }
 0x644   :  { %v2696_v17 = vsel %vm1173_vm4, %v2695_v28, %v2692_v33 }
 0x645   :  { %v2697_v23 = vadd.f32 %v2696_v17, %v5320_v31 }
 0x647   :  { %2698 = vst [vmem:[#allocation2] sm:$0xff] %v2697_v23 }
 0x648   :  { %2710 = dma.vmem_to_hbm [thread:$0]  %s2706_s22, 256, %s2708_s29, [#allocation3]  }
 0x649   :  { %3483 = dma.done.wait [#allocation3], 256  }
 0x64a   :  { %3484 = vsyncadd [#allocation3], 4294967040 }
 0x64b   :  { %2715 = vsyncpa [#allocation3], 1 }

</bundles_post_ra>
